<compile_context>
chip_gen: v7x
topology: tpu7x:2x2x1
jax: 0.10.0
libtpu: 0.0.40
codegen_flags: <defaults>
</compile_context>

<pallas_src>
import functools

import jax
import jax.numpy as jnp
from jax.experimental import pallas as pl
from jax.experimental.pallas import tpu as pltpu

# ---------------------------------------------------------------------------
# Small-shape configuration (structurally consistent with the PyTorch module:
# patch_size=6, 3 input channels, square image divisible by the patch size,
# mask_ratio=0.75, predictor_embed_dim = embed_dim // 2, no cls token).
# ---------------------------------------------------------------------------
PATCH = 6
IMG = 24                              # small stand-in for 84 (divisible by PATCH)
IN_CHANS = 3
NUM_PATCHES = (IMG // PATCH) ** 2     # 16
EMBED_DIM = 32
NUM_HEADS = 2
DEPTH = 2
MLP_RATIO = 4
DEC_DIM = EMBED_DIM // 2              # predictor_embed_dim
DEC_DEPTH = 2
MASK_RATIO = 0.75
PATCH_DIM = PATCH * PATCH * IN_CHANS  # 108
LEN_KEEP = int(NUM_PATCHES * (1 - MASK_RATIO))   # 4


# ---------------------------------------------------------------------------
# Fused forward kernel (one grid step == one batch sample)
# ---------------------------------------------------------------------------
def _make_fused_kernel(idx, num_heads, patch_dim):
    d_idx = idx["data"]

    def kernel(*refs):
        o_ref = refs[-1]

        def rd(i):
            return refs[i][...]

        def layer_norm(x, g, b):
            # TODO(synk): eps=1e-6 follows the timm ViT convention; plain
            # torch.nn.LayerNorm default would be 1e-5.
            mean = jnp.mean(x, axis=-1, keepdims=True)
            xc = x - mean
            var = jnp.mean(xc * xc, axis=-1, keepdims=True)   # biased, like nn.LayerNorm
            return xc * jax.lax.rsqrt(var + 1e-6) * g + b

        def vit_block(x, bp):
            s, d = x.shape
            dh = d // num_heads
            scale = dh ** -0.5
            h = layer_norm(x, rd(bp["ln1_g"]), rd(bp["ln1_b"]))
            qkv = (jnp.dot(h, rd(bp["w_qkv"]), preferred_element_type=jnp.float32)
                   + rd(bp["b_qkv"]))                         # (s, 3d)
            w_proj = rd(bp["w_proj"])
            attn = jnp.zeros((s, d), jnp.float32)
            for hd in range(num_heads):                       # static unroll, lane-axis head split
                q = qkv[:, hd * dh:(hd + 1) * dh]
                k = qkv[:, d + hd * dh:d + (hd + 1) * dh]
                v = qkv[:, 2 * d + hd * dh:2 * d + (hd + 1) * dh]
                sc = jax.lax.dot_general(
                    q, k, (((1,), (1,)), ((), ())),
                    preferred_element_type=jnp.float32) * scale        # (s, s)
                m = jnp.max(sc, axis=-1, keepdims=True)
                p = jnp.exp(sc - m)
                p = p * pl.reciprocal(jnp.sum(p, axis=-1, keepdims=True), approx=True)
                o_h = jnp.dot(p, v, preferred_element_type=jnp.float32)          # (s, dh)
                # concat-free head merge:
                #   concat_h(o_h) @ w_proj == sum_h  o_h @ w_proj[h*dh:(h+1)*dh]
                attn = attn + jnp.dot(o_h, w_proj[hd * dh:(hd + 1) * dh, :],
                                      preferred_element_type=jnp.float32)
            x = x + attn + rd(bp["b_proj"])
            h = layer_norm(x, rd(bp["ln2_g"]), rd(bp["ln2_b"]))
            h = (jnp.dot(h, rd(bp["w_fc1"]), preferred_element_type=jnp.float32)
                 + rd(bp["b_fc1"]))
            # TODO(synk): nn.GELU defaults to exact erf; tanh approx kept for a
            # guaranteed Mosaic lowering (~1e-3 difference).
            h = jax.nn.gelu(h, approximate=True)
            return x + (jnp.dot(h, rd(bp["w_fc2"]), preferred_element_type=jnp.float32)
                        + rd(bp["b_fc2"]))

        # ------------------------------ encoder ------------------------------
        enc = idx["enc"]
        patches = refs[d_idx["patches_vis"]][0]               # (K, PD) conv-layout patches
        pos_vis = refs[d_idx["pos_vis"]][0]                   # (K, D)  gathered pos embed
        x = (jnp.dot(patches, rd(enc["w_pe"]), preferred_element_type=jnp.float32)
             + rd(enc["b_pe"]) + pos_vis)
        for bp in enc["blocks"]:
            x = vit_block(x, bp)
        x = layer_norm(x, rd(enc["ln_g"]), rd(enc["ln_b"]))   # (K, D)

        # ------------------------------ decoder ------------------------------
        dec = idx["dec"]
        x = (jnp.dot(x, rd(dec["w_embed"]), preferred_element_type=jnp.float32)
             + rd(dec["b_embed"]))                            # (K, DD)
        unshuf = refs[d_idx["unshuffle"]][0]                  # (L, K) one-hot gather matrix
        msk = refs[d_idx["mask"]][0]                          # (L, 1), 1 = masked position
        x = (jnp.dot(unshuf, x, preferred_element_type=jnp.float32)
             + msk * rd(dec["mask_token"])
             + rd(dec["pos_embed"]))                          # (L, DD)
        for bp in dec["blocks"]:
            x = vit_block(x, bp)
        x = layer_norm(x, rd(dec["ln_g"]), rd(dec["ln_b"]))
        pred = (jnp.dot(x, rd(dec["w_pred"]), preferred_element_type=jnp.float32)
                + rd(dec["b_pred"]))                          # (L, PD)

        # ---------------------- MAE loss (per-patch, masked) -----------------
        tgt = refs[d_idx["target"]][0]                        # (L, PD)
        mean = jnp.mean(tgt, axis=-1, keepdims=True)
        # torch.var defaults to the unbiased estimator (divide by d - 1)
        var = jnp.sum((tgt - mean) ** 2, axis=-1, keepdims=True) / (patch_dim - 1)
        tgt_n = (tgt - mean) * jax.lax.rsqrt(var + 1e-6)
        per_patch = jnp.mean((pred - tgt_n) ** 2, axis=-1, keepdims=True)   # (L, 1)
        o_ref[0] = per_patch * msk

    return kernel


# ---------------------------------------------------------------------------
# BlockSpec index maps
# ---------------------------------------------------------------------------
def _batch_index(i, *, rank):
    return (i,) + (0,) * (rank - 1)


def _full_index(i, *, rank):
    return (0,) * rank


# ---------------------------------------------------------------------------
# Flatten params + per-sample data into one positional argument list
# ---------------------------------------------------------------------------
def _pack_inputs(params, data):
    arrays = []

    def add(a):
        arrays.append(jnp.asarray(a, jnp.float32))
        return len(arrays) - 1

    def row(a):   # 1-D parameter -> (1, n) lane vector, loaded once into VMEM
        return jnp.reshape(a, (1, -1))

    data_idx = {name: add(a) for name, a in data}

    def add_block(bp):
        return dict(
            ln1_g=add(row(bp["ln1_g"])), ln1_b=add(row(bp["ln1_b"])),
            w_qkv=add(bp["w_qkv"]), b_qkv=add(row(bp["b_qkv"])),
            w_proj=add(bp["w_proj"]), b_proj=add(row(bp["b_proj"])),
            ln2_g=add(row(bp["ln2_g"])), ln2_b=add(row(bp["ln2_b"])),
            w_fc1=add(bp["w_fc1"]), b_fc1=add(row(bp["b_fc1"])),
            w_fc2=add(bp["w_fc2"]), b_fc2=add(row(bp["b_fc2"])),
        )

    enc, dec = params["encoder"], params["decoder"]
    idx = dict(
        data=data_idx,
        enc=dict(
            w_pe=add(enc["w_pe"]), b_pe=add(row(enc["b_pe"])),
            blocks=[add_block(b) for b in enc["blocks"]],
            ln_g=add(row(enc["ln_g"])), ln_b=add(row(enc["ln_b"])),
        ),
        dec=dict(
            w_embed=add(dec["w_embed"]), b_embed=add(row(dec["b_embed"])),
            mask_token=add(jnp.reshape(dec["mask_token"], (1, DEC_DIM))),
            pos_embed=add(jnp.reshape(dec["pos_embed"], (NUM_PATCHES, DEC_DIM))),
            blocks=[add_block(b) for b in dec["blocks"]],
            ln_g=add(row(dec["ln_g"])), ln_b=add(row(dec["ln_b"])),
            w_pred=add(dec["w_pred"]), b_pred=add(row(dec["b_pred"])),
        ),
    )
    return arrays, idx, len(data)


# ---------------------------------------------------------------------------
# Plain-JAX glue (patchify, masking, module wiring)
# ---------------------------------------------------------------------------
def patchify_pqc(imgs, p):
    """MAE target layout: (N, L, p*p*C), inner order (row, col, channel)."""
    n, c, hh, _ = imgs.shape
    h = w = hh // p
    x = imgs.reshape(n, c, h, p, w, p)
    x = jnp.einsum("nchpwq->nhwpqc", x)
    return x.reshape(n, h * w, p * p * c)


def patchify_cij(imgs, p):
    """Conv-compatible layout: inner order (channel, row, col)."""
    n, c, hh, _ = imgs.shape
    h = w = hh // p
    x = imgs.reshape(n, c, h, p, w, p)
    x = jnp.einsum("nchpwq->nhwcpq", x)
    return x.reshape(n, h * w, c * p * p)


def random_masking(key, batch, num_patches, mask_ratio):
    len_keep = int(num_patches * (1 - mask_ratio))
    noise = jax.random.uniform(key, (batch, num_patches))
    ids_shuffle = jnp.argsort(noise, axis=1)
    ids_restore = jnp.argsort(ids_shuffle, axis=1)
    ids_keep = ids_shuffle[:, :len_keep]
    mask = jnp.ones((batch, num_patches), jnp.float32)
    mask = mask.at[:, :len_keep].set(0.0)
    mask = jnp.take_along_axis(mask, ids_restore, axis=1)
    return mask, ids_restore, ids_keep


def mae_forward(params, imgs, key):
    b = imgs.shape[0]
    mask, ids_restore, ids_keep = random_masking(key, b, NUM_PATCHES, MASK_RATIO)

    patches = patchify_cij(imgs, PATCH)                   # (B, L, C*p*p) for patch embed
    target = patchify_pqc(imgs, PATCH)                    # (B, L, p*p*C) loss target
    patches_vis = jnp.take_along_axis(patches, ids_keep[..., None], axis=1)     # (B, K, PD)
    pos = jnp.broadcast_to(params["encoder"]["pos_embed"], (b, NUM_PATCHES, EMBED_DIM))
    pos_vis = jnp.take_along_axis(pos, ids_keep[..., None], axis=1)             # (B, K, D)
    # One-hot unshuffle matrix: row i selects encoder token ids_restore[b, i]
    # when it is a kept token (< LEN_KEEP); rows for masked positions are all
    # zero and receive the mask token instead (mask == 1 exactly there).
    unshuf = (ids_restore[..., None] == jnp.arange(LEN_KEEP)[None, None, :]).astype(jnp.float32)
    mask3 = mask[..., None]                               # (B, L, 1)

    data = [("patches_vis", patches_vis), ("pos_vis", pos_vis),
            ("unshuffle", unshuf), ("mask", mask3), ("target", target)]
    arrays, idx, num_data = _pack_inputs(params, data)

    in_specs = []
    for i, a in enumerate(arrays):
        r = a.ndim
        if i < num_data:   # per-sample block, selected by the batch grid index
            in_specs.append(pl.BlockSpec((1,) + tuple(a.shape[1:]),
                                         functools.partial(_batch_index, rank=r)))
        else:              # grid-invariant whole-array weight block (fetched once)
            in_specs.append(pl.BlockSpec(tuple(a.shape),
                                         functools.partial(_full_index, rank=r)))

    kernel = _make_fused_kernel(idx, NUM_HEADS, PATCH_DIM)
    per_patch = pl.pallas_call(
        kernel,
        grid=(b,),
        in_specs=in_specs,
        out_specs=pl.BlockSpec((1, NUM_PATCHES, 1),
                               functools.partial(_batch_index, rank=3)),
        out_shape=jax.ShapeDtypeStruct((b, NUM_PATCHES, 1), jnp.float32),
        compiler_params=pltpu.CompilerParams(dimension_semantics=("parallel",)),
    )(*arrays)

    return jnp.sum(per_patch) / jnp.sum(mask)


# ---------------------------------------------------------------------------
# Deterministic parameter init (synthetic weights)
# ---------------------------------------------------------------------------
def _init_block(key, dim, mlp_ratio):
    ks = jax.random.split(key, 4)
    hid = dim * mlp_ratio
    n = lambda k, s: (0.02 * jax.random.normal(k, s)).astype(jnp.float32)
    z = lambda s: jnp.zeros(s, jnp.float32)
    return dict(
        ln1_g=jnp.ones((dim,), jnp.float32), ln1_b=z((dim,)),
        w_qkv=n(ks[0], (dim, 3 * dim)), b_qkv=z((3 * dim,)),
        w_proj=n(ks[1], (dim, dim)), b_proj=z((dim,)),
        ln2_g=jnp.ones((dim,), jnp.float32), ln2_b=z((dim,)),
        w_fc1=n(ks[2], (dim, hid)), b_fc1=z((hid,)),
        w_fc2=n(ks[3], (hid, dim)), b_fc2=z((dim,)),
    )


def init_params(key):
    keys = jax.random.split(key, 16)
    n = lambda k, s: (0.02 * jax.random.normal(k, s)).astype(jnp.float32)
    z = lambda s: jnp.zeros(s, jnp.float32)
    encoder = dict(
        w_pe=n(keys[0], (PATCH_DIM, EMBED_DIM)), b_pe=z((EMBED_DIM,)),
        pos_embed=n(keys[1], (1, NUM_PATCHES, EMBED_DIM)),
        blocks=[_init_block(keys[4 + i], EMBED_DIM, MLP_RATIO) for i in range(DEPTH)],
        ln_g=jnp.ones((EMBED_DIM,), jnp.float32), ln_b=z((EMBED_DIM,)),
    )
    decoder = dict(
        w_embed=n(keys[2], (EMBED_DIM, DEC_DIM)), b_embed=z((DEC_DIM,)),
        mask_token=n(keys[3], (1, 1, DEC_DIM)),
        pos_embed=n(keys[12], (1, NUM_PATCHES, DEC_DIM)),
        blocks=[_init_block(keys[8 + i], DEC_DIM, MLP_RATIO) for i in range(DEC_DEPTH)],
        ln_g=jnp.ones((DEC_DIM,), jnp.float32), ln_b=z((DEC_DIM,)),
        w_pred=n(keys[13], (DEC_DIM, PATCH_DIM)), b_pred=z((PATCH_DIM,)),
    )
    return dict(encoder=encoder, decoder=decoder)


if __name__ == "__main__":
    root = jax.random.PRNGKey(0)
    k_img, k_mask, k_params = jax.random.split(root, 3)
    imgs = jax.random.normal(k_img, (2, IN_CHANS, IMG, IMG), jnp.float32)
    params = init_params(k_params)
    loss = jax.jit(mae_forward)(params, imgs, k_mask)
    jax.block_until_ready(loss)
    assert loss.shape == () and jnp.isfinite(loss)
    print("KERNEL_OK")
</pallas_src>

<mosaic_0001>
module attributes {stable_mosaic.version = 11 : i64} {
  func.func @kernel(%arg0: i32, %arg1: memref<1x4x108xf32, #tpu.memory_space<vmem>>, %arg2: memref<1x4x32xf32, #tpu.memory_space<vmem>>, %arg3: memref<1x16x4xf32, #tpu.memory_space<vmem>>, %arg4: memref<1x16x1xf32, #tpu.memory_space<vmem>>, %arg5: memref<1x16x108xf32, #tpu.memory_space<vmem>>, %arg6: memref<108x32xf32, #tpu.memory_space<vmem>>, %arg7: memref<1x32xf32, #tpu.memory_space<vmem>>, %arg8: memref<1x32xf32, #tpu.memory_space<vmem>>, %arg9: memref<1x32xf32, #tpu.memory_space<vmem>>, %arg10: memref<32x96xf32, #tpu.memory_space<vmem>>, %arg11: memref<1x96xf32, #tpu.memory_space<vmem>>, %arg12: memref<32x32xf32, #tpu.memory_space<vmem>>, %arg13: memref<1x32xf32, #tpu.memory_space<vmem>>, %arg14: memref<1x32xf32, #tpu.memory_space<vmem>>, %arg15: memref<1x32xf32, #tpu.memory_space<vmem>>, %arg16: memref<32x128xf32, #tpu.memory_space<vmem>>, %arg17: memref<1x128xf32, #tpu.memory_space<vmem>>, %arg18: memref<128x32xf32, #tpu.memory_space<vmem>>, %arg19: memref<1x32xf32, #tpu.memory_space<vmem>>, %arg20: memref<1x32xf32, #tpu.memory_space<vmem>>, %arg21: memref<1x32xf32, #tpu.memory_space<vmem>>, %arg22: memref<32x96xf32, #tpu.memory_space<vmem>>, %arg23: memref<1x96xf32, #tpu.memory_space<vmem>>, %arg24: memref<32x32xf32, #tpu.memory_space<vmem>>, %arg25: memref<1x32xf32, #tpu.memory_space<vmem>>, %arg26: memref<1x32xf32, #tpu.memory_space<vmem>>, %arg27: memref<1x32xf32, #tpu.memory_space<vmem>>, %arg28: memref<32x128xf32, #tpu.memory_space<vmem>>, %arg29: memref<1x128xf32, #tpu.memory_space<vmem>>, %arg30: memref<128x32xf32, #tpu.memory_space<vmem>>, %arg31: memref<1x32xf32, #tpu.memory_space<vmem>>, %arg32: memref<1x32xf32, #tpu.memory_space<vmem>>, %arg33: memref<1x32xf32, #tpu.memory_space<vmem>>, %arg34: memref<32x16xf32, #tpu.memory_space<vmem>>, %arg35: memref<1x16xf32, #tpu.memory_space<vmem>>, %arg36: memref<1x16xf32, #tpu.memory_space<vmem>>, %arg37: memref<16x16xf32, #tpu.memory_space<vmem>>, %arg38: memref<1x16xf32, #tpu.memory_space<vmem>>, %arg39: memref<1x16xf32, #tpu.memory_space<vmem>>, %arg40: memref<16x48xf32, #tpu.memory_space<vmem>>, %arg41: memref<1x48xf32, #tpu.memory_space<vmem>>, %arg42: memref<16x16xf32, #tpu.memory_space<vmem>>, %arg43: memref<1x16xf32, #tpu.memory_space<vmem>>, %arg44: memref<1x16xf32, #tpu.memory_space<vmem>>, %arg45: memref<1x16xf32, #tpu.memory_space<vmem>>, %arg46: memref<16x64xf32, #tpu.memory_space<vmem>>, %arg47: memref<1x64xf32, #tpu.memory_space<vmem>>, %arg48: memref<64x16xf32, #tpu.memory_space<vmem>>, %arg49: memref<1x16xf32, #tpu.memory_space<vmem>>, %arg50: memref<1x16xf32, #tpu.memory_space<vmem>>, %arg51: memref<1x16xf32, #tpu.memory_space<vmem>>, %arg52: memref<16x48xf32, #tpu.memory_space<vmem>>, %arg53: memref<1x48xf32, #tpu.memory_space<vmem>>, %arg54: memref<16x16xf32, #tpu.memory_space<vmem>>, %arg55: memref<1x16xf32, #tpu.memory_space<vmem>>, %arg56: memref<1x16xf32, #tpu.memory_space<vmem>>, %arg57: memref<1x16xf32, #tpu.memory_space<vmem>>, %arg58: memref<16x64xf32, #tpu.memory_space<vmem>>, %arg59: memref<1x64xf32, #tpu.memory_space<vmem>>, %arg60: memref<64x16xf32, #tpu.memory_space<vmem>>, %arg61: memref<1x16xf32, #tpu.memory_space<vmem>>, %arg62: memref<1x16xf32, #tpu.memory_space<vmem>>, %arg63: memref<1x16xf32, #tpu.memory_space<vmem>>, %arg64: memref<16x108xf32, #tpu.memory_space<vmem>>, %arg65: memref<1x108xf32, #tpu.memory_space<vmem>>, %arg66: memref<1x16x1xf32, #tpu.memory_space<vmem>>) attributes {dimension_semantics = [#tpu.dimension_semantics<parallel>], iteration_bounds = array<i64: 2>, scalar_prefetch = 0 : i64, scratch_operands = 0 : i64, tpu.core_type = #tpu.core_type<tc>, window_params = [{transform_indices = @transform_0, window_bounds = array<i64: 1, 4, 108>}, {transform_indices = @transform_1, window_bounds = array<i64: 1, 4, 32>}, {transform_indices = @transform_2, window_bounds = array<i64: 1, 16, 4>}, {transform_indices = @transform_3, window_bounds = array<i64: 1, 16, 1>}, {transform_indices = @transform_4, window_bounds = array<i64: 1, 16, 108>}, {pipeline_mode = #tpu.pipeline_mode<synchronous>, transform_indices = @transform_5, window_bounds = array<i64: 108, 32>}, {pipeline_mode = #tpu.pipeline_mode<synchronous>, transform_indices = @transform_6, window_bounds = array<i64: 1, 32>}, {pipeline_mode = #tpu.pipeline_mode<synchronous>, transform_indices = @transform_7, window_bounds = array<i64: 1, 32>}, {pipeline_mode = #tpu.pipeline_mode<synchronous>, transform_indices = @transform_8, window_bounds = array<i64: 1, 32>}, {pipeline_mode = #tpu.pipeline_mode<synchronous>, transform_indices = @transform_9, window_bounds = array<i64: 32, 96>}, {pipeline_mode = #tpu.pipeline_mode<synchronous>, transform_indices = @transform_10, window_bounds = array<i64: 1, 96>}, {pipeline_mode = #tpu.pipeline_mode<synchronous>, transform_indices = @transform_11, window_bounds = array<i64: 32, 32>}, {pipeline_mode = #tpu.pipeline_mode<synchronous>, transform_indices = @transform_12, window_bounds = array<i64: 1, 32>}, {pipeline_mode = #tpu.pipeline_mode<synchronous>, transform_indices = @transform_13, window_bounds = array<i64: 1, 32>}, {pipeline_mode = #tpu.pipeline_mode<synchronous>, transform_indices = @transform_14, window_bounds = array<i64: 1, 32>}, {pipeline_mode = #tpu.pipeline_mode<synchronous>, transform_indices = @transform_15, window_bounds = array<i64: 32, 128>}, {pipeline_mode = #tpu.pipeline_mode<synchronous>, transform_indices = @transform_16, window_bounds = array<i64: 1, 128>}, {pipeline_mode = #tpu.pipeline_mode<synchronous>, transform_indices = @transform_17, window_bounds = array<i64: 128, 32>}, {pipeline_mode = #tpu.pipeline_mode<synchronous>, transform_indices = @transform_18, window_bounds = array<i64: 1, 32>}, {pipeline_mode = #tpu.pipeline_mode<synchronous>, transform_indices = @transform_19, window_bounds = array<i64: 1, 32>}, {pipeline_mode = #tpu.pipeline_mode<synchronous>, transform_indices = @transform_20, window_bounds = array<i64: 1, 32>}, {pipeline_mode = #tpu.pipeline_mode<synchronous>, transform_indices = @transform_21, window_bounds = array<i64: 32, 96>}, {pipeline_mode = #tpu.pipeline_mode<synchronous>, transform_indices = @transform_22, window_bounds = array<i64: 1, 96>}, {pipeline_mode = #tpu.pipeline_mode<synchronous>, transform_indices = @transform_23, window_bounds = array<i64: 32, 32>}, {pipeline_mode = #tpu.pipeline_mode<synchronous>, transform_indices = @transform_24, window_bounds = array<i64: 1, 32>}, {pipeline_mode = #tpu.pipeline_mode<synchronous>, transform_indices = @transform_25, window_bounds = array<i64: 1, 32>}, {pipeline_mode = #tpu.pipeline_mode<synchronous>, transform_indices = @transform_26, window_bounds = array<i64: 1, 32>}, {pipeline_mode = #tpu.pipeline_mode<synchronous>, transform_indices = @transform_27, window_bounds = array<i64: 32, 128>}, {pipeline_mode = #tpu.pipeline_mode<synchronous>, transform_indices = @transform_28, window_bounds = array<i64: 1, 128>}, {pipeline_mode = #tpu.pipeline_mode<synchronous>, transform_indices = @transform_29, window_bounds = array<i64: 128, 32>}, {pipeline_mode = #tpu.pipeline_mode<synchronous>, transform_indices = @transform_30, window_bounds = array<i64: 1, 32>}, {pipeline_mode = #tpu.pipeline_mode<synchronous>, transform_indices = @transform_31, window_bounds = array<i64: 1, 32>}, {pipeline_mode = #tpu.pipeline_mode<synchronous>, transform_indices = @transform_32, window_bounds = array<i64: 1, 32>}, {pipeline_mode = #tpu.pipeline_mode<synchronous>, transform_indices = @transform_33, window_bounds = array<i64: 32, 16>}, {pipeline_mode = #tpu.pipeline_mode<synchronous>, transform_indices = @transform_34, window_bounds = array<i64: 1, 16>}, {pipeline_mode = #tpu.pipeline_mode<synchronous>, transform_indices = @transform_35, window_bounds = array<i64: 1, 16>}, {pipeline_mode = #tpu.pipeline_mode<synchronous>, transform_indices = @transform_36, window_bounds = array<i64: 16, 16>}, {pipeline_mode = #tpu.pipeline_mode<synchronous>, transform_indices = @transform_37, window_bounds = array<i64: 1, 16>}, {pipeline_mode = #tpu.pipeline_mode<synchronous>, transform_indices = @transform_38, window_bounds = array<i64: 1, 16>}, {pipeline_mode = #tpu.pipeline_mode<synchronous>, transform_indices = @transform_39, window_bounds = array<i64: 16, 48>}, {pipeline_mode = #tpu.pipeline_mode<synchronous>, transform_indices = @transform_40, window_bounds = array<i64: 1, 48>}, {pipeline_mode = #tpu.pipeline_mode<synchronous>, transform_indices = @transform_41, window_bounds = array<i64: 16, 16>}, {pipeline_mode = #tpu.pipeline_mode<synchronous>, transform_indices = @transform_42, window_bounds = array<i64: 1, 16>}, {pipeline_mode = #tpu.pipeline_mode<synchronous>, transform_indices = @transform_43, window_bounds = array<i64: 1, 16>}, {pipeline_mode = #tpu.pipeline_mode<synchronous>, transform_indices = @transform_44, window_bounds = array<i64: 1, 16>}, {pipeline_mode = #tpu.pipeline_mode<synchronous>, transform_indices = @transform_45, window_bounds = array<i64: 16, 64>}, {pipeline_mode = #tpu.pipeline_mode<synchronous>, transform_indices = @transform_46, window_bounds = array<i64: 1, 64>}, {pipeline_mode = #tpu.pipeline_mode<synchronous>, transform_indices = @transform_47, window_bounds = array<i64: 64, 16>}, {pipeline_mode = #tpu.pipeline_mode<synchronous>, transform_indices = @transform_48, window_bounds = array<i64: 1, 16>}, {pipeline_mode = #tpu.pipeline_mode<synchronous>, transform_indices = @transform_49, window_bounds = array<i64: 1, 16>}, {pipeline_mode = #tpu.pipeline_mode<synchronous>, transform_indices = @transform_50, window_bounds = array<i64: 1, 16>}, {pipeline_mode = #tpu.pipeline_mode<synchronous>, transform_indices = @transform_51, window_bounds = array<i64: 16, 48>}, {pipeline_mode = #tpu.pipeline_mode<synchronous>, transform_indices = @transform_52, window_bounds = array<i64: 1, 48>}, {pipeline_mode = #tpu.pipeline_mode<synchronous>, transform_indices = @transform_53, window_bounds = array<i64: 16, 16>}, {pipeline_mode = #tpu.pipeline_mode<synchronous>, transform_indices = @transform_54, window_bounds = array<i64: 1, 16>}, {pipeline_mode = #tpu.pipeline_mode<synchronous>, transform_indices = @transform_55, window_bounds = array<i64: 1, 16>}, {pipeline_mode = #tpu.pipeline_mode<synchronous>, transform_indices = @transform_56, window_bounds = array<i64: 1, 16>}, {pipeline_mode = #tpu.pipeline_mode<synchronous>, transform_indices = @transform_57, window_bounds = array<i64: 16, 64>}, {pipeline_mode = #tpu.pipeline_mode<synchronous>, transform_indices = @transform_58, window_bounds = array<i64: 1, 64>}, {pipeline_mode = #tpu.pipeline_mode<synchronous>, transform_indices = @transform_59, window_bounds = array<i64: 64, 16>}, {pipeline_mode = #tpu.pipeline_mode<synchronous>, transform_indices = @transform_60, window_bounds = array<i64: 1, 16>}, {pipeline_mode = #tpu.pipeline_mode<synchronous>, transform_indices = @transform_61, window_bounds = array<i64: 1, 16>}, {pipeline_mode = #tpu.pipeline_mode<synchronous>, transform_indices = @transform_62, window_bounds = array<i64: 1, 16>}, {pipeline_mode = #tpu.pipeline_mode<synchronous>, transform_indices = @transform_63, window_bounds = array<i64: 16, 108>}, {pipeline_mode = #tpu.pipeline_mode<synchronous>, transform_indices = @transform_64, window_bounds = array<i64: 1, 108>}, {transform_indices = @transform_65, window_bounds = array<i64: 1, 16, 1>}]} {
    %c0 = arith.constant 0 : index
    %c0_0 = arith.constant 0 : index
    %c0_1 = arith.constant 0 : index
    %0 = vector.load %arg1[%c0, %c0_0, %c0_1] : memref<1x4x108xf32, #tpu.memory_space<vmem>>, vector<1x4x108xf32>
    %1 = vector.shape_cast %0 : vector<1x4x108xf32> to vector<4x108xf32>
    %c0_2 = arith.constant 0 : index
    %c0_3 = arith.constant 0 : index
    %c0_4 = arith.constant 0 : index
    %2 = vector.load %arg2[%c0_2, %c0_3, %c0_4] : memref<1x4x32xf32, #tpu.memory_space<vmem>>, vector<1x4x32xf32>
    %3 = vector.shape_cast %2 : vector<1x4x32xf32> to vector<4x32xf32>
    %c0_5 = arith.constant 0 : index
    %c0_6 = arith.constant 0 : index
    %4 = vector.load %arg6[%c0_5, %c0_6] : memref<108x32xf32, #tpu.memory_space<vmem>>, vector<108x32xf32>
    %cst = arith.constant dense<0.000000e+00> : vector<4x32xf32>
    %5 = tpu.matmul %1, %4, %cst {dimension_numbers = #tpu.dot_dimension_numbers<[1], [0], [0], [1], [0, 0, 1, 1], [], []>} : vector<4x108xf32>, vector<108x32xf32>, vector<4x32xf32> -> vector<4x32xf32>
    %c0_7 = arith.constant 0 : index
    %c0_8 = arith.constant 0 : index
    %6 = vector.load %arg7[%c0_7, %c0_8] : memref<1x32xf32, #tpu.memory_space<vmem>>, vector<1x32xf32>
    %7 = vector.broadcast %6 : vector<1x32xf32> to vector<4x32xf32>
    %8 = arith.addf %5, %7 : vector<4x32xf32>
    %9 = arith.addf %8, %3 : vector<4x32xf32>
    %c0_9 = arith.constant 0 : index
    %c0_10 = arith.constant 0 : index
    %10 = vector.load %arg8[%c0_9, %c0_10] : memref<1x32xf32, #tpu.memory_space<vmem>>, vector<1x32xf32>
    %c0_11 = arith.constant 0 : index
    %c0_12 = arith.constant 0 : index
    %11 = vector.load %arg9[%c0_11, %c0_12] : memref<1x32xf32, #tpu.memory_space<vmem>>, vector<1x32xf32>
    %cst_13 = arith.constant dense<0.000000e+00> : vector<4xf32>
    %12 = vector.multi_reduction <add>, %9, %cst_13 [1] : vector<4x32xf32> to vector<4xf32>
    %13 = vector.shape_cast %12 : vector<4xf32> to vector<4x1xf32>
    %cst_14 = arith.constant 3.200000e+01 : f32
    %14 = vector.broadcast %cst_14 : f32 to vector<4x1xf32>
    %15 = arith.divf %13, %14 : vector<4x1xf32>
    %16 = vector.broadcast %15 : vector<4x1xf32> to vector<4x32xf32>
    %17 = arith.subf %9, %16 : vector<4x32xf32>
    %18 = arith.mulf %17, %17 : vector<4x32xf32>
    %cst_15 = arith.constant dense<0.000000e+00> : vector<4xf32>
    %19 = vector.multi_reduction <add>, %18, %cst_15 [1] : vector<4x32xf32> to vector<4xf32>
    %20 = vector.shape_cast %19 : vector<4xf32> to vector<4x1xf32>
    %cst_16 = arith.constant 3.200000e+01 : f32
    %21 = vector.broadcast %cst_16 : f32 to vector<4x1xf32>
    %22 = arith.divf %20, %21 : vector<4x1xf32>
    %cst_17 = arith.constant 9.99999997E-7 : f32
    %23 = vector.broadcast %cst_17 : f32 to vector<4x1xf32>
    %24 = arith.addf %22, %23 : vector<4x1xf32>
    %25 = math.rsqrt %24 : vector<4x1xf32>
    %26 = vector.broadcast %25 : vector<4x1xf32> to vector<4x32xf32>
    %27 = arith.mulf %17, %26 : vector<4x32xf32>
    %28 = vector.broadcast %10 : vector<1x32xf32> to vector<4x32xf32>
    %29 = arith.mulf %27, %28 : vector<4x32xf32>
    %30 = vector.broadcast %11 : vector<1x32xf32> to vector<4x32xf32>
    %31 = arith.addf %29, %30 : vector<4x32xf32>
    %c0_18 = arith.constant 0 : index
    %c0_19 = arith.constant 0 : index
    %32 = vector.load %arg10[%c0_18, %c0_19] : memref<32x96xf32, #tpu.memory_space<vmem>>, vector<32x96xf32>
    %cst_20 = arith.constant dense<0.000000e+00> : vector<4x96xf32>
    %33 = tpu.matmul %31, %32, %cst_20 {dimension_numbers = #tpu.dot_dimension_numbers<[1], [0], [0], [1], [0, 0, 1, 1], [], []>} : vector<4x32xf32>, vector<32x96xf32>, vector<4x96xf32> -> vector<4x96xf32>
    %c0_21 = arith.constant 0 : index
    %c0_22 = arith.constant 0 : index
    %34 = vector.load %arg11[%c0_21, %c0_22] : memref<1x96xf32, #tpu.memory_space<vmem>>, vector<1x96xf32>
    %35 = vector.broadcast %34 : vector<1x96xf32> to vector<4x96xf32>
    %36 = arith.addf %33, %35 : vector<4x96xf32>
    %c0_23 = arith.constant 0 : index
    %c0_24 = arith.constant 0 : index
    %37 = vector.load %arg12[%c0_23, %c0_24] : memref<32x32xf32, #tpu.memory_space<vmem>>, vector<32x32xf32>
    %cst_25 = arith.constant 0.000000e+00 : f32
    %38 = vector.broadcast %cst_25 : f32 to vector<4x32xf32>
    %39 = vector.extract_strided_slice %36 {offsets = [0, 0], sizes = [4, 16], strides = [1, 1]} : vector<4x96xf32> to vector<4x16xf32>
    %40 = vector.extract_strided_slice %36 {offsets = [0, 32], sizes = [4, 16], strides = [1, 1]} : vector<4x96xf32> to vector<4x16xf32>
    %41 = vector.extract_strided_slice %36 {offsets = [0, 64], sizes = [4, 16], strides = [1, 1]} : vector<4x96xf32> to vector<4x16xf32>
    %cst_26 = arith.constant dense<0.000000e+00> : vector<4x4xf32>
    %42 = tpu.matmul %39, %40, %cst_26 {dimension_numbers = #tpu.dot_dimension_numbers<[1], [1], [0], [0], [0, 0, 1, 0], [], []>} : vector<4x16xf32>, vector<4x16xf32>, vector<4x4xf32> -> vector<4x4xf32>
    %cst_27 = arith.constant 2.500000e-01 : f32
    %43 = vector.broadcast %cst_27 : f32 to vector<4x4xf32>
    %44 = arith.mulf %42, %43 : vector<4x4xf32>
    %cst_28 = arith.constant dense<0xFF800000> : vector<4xf32>
    %45 = vector.multi_reduction <maximumf>, %44, %cst_28 [1] : vector<4x4xf32> to vector<4xf32>
    %46 = vector.shape_cast %45 : vector<4xf32> to vector<4x1xf32>
    %47 = vector.broadcast %46 : vector<4x1xf32> to vector<4x4xf32>
    %48 = arith.subf %44, %47 : vector<4x4xf32>
    %49 = math.exp %48 : vector<4x4xf32>
    %cst_29 = arith.constant dense<0.000000e+00> : vector<4xf32>
    %50 = vector.multi_reduction <add>, %49, %cst_29 [1] : vector<4x4xf32> to vector<4xf32>
    %51 = vector.shape_cast %50 : vector<4xf32> to vector<4x1xf32>
    %52 = tpu.reciprocal %51 {approx = true} : vector<4x1xf32> -> vector<4x1xf32>
    %53 = vector.broadcast %52 : vector<4x1xf32> to vector<4x4xf32>
    %54 = arith.mulf %49, %53 : vector<4x4xf32>
    %cst_30 = arith.constant dense<0.000000e+00> : vector<4x16xf32>
    %55 = tpu.matmul %54, %41, %cst_30 {dimension_numbers = #tpu.dot_dimension_numbers<[1], [0], [0], [1], [0, 0, 1, 1], [], []>} : vector<4x4xf32>, vector<4x16xf32>, vector<4x16xf32> -> vector<4x16xf32>
    %56 = vector.extract_strided_slice %37 {offsets = [0, 0], sizes = [16, 32], strides = [1, 1]} : vector<32x32xf32> to vector<16x32xf32>
    %cst_31 = arith.constant dense<0.000000e+00> : vector<4x32xf32>
    %57 = tpu.matmul %55, %56, %cst_31 {dimension_numbers = #tpu.dot_dimension_numbers<[1], [0], [0], [1], [0, 0, 1, 1], [], []>} : vector<4x16xf32>, vector<16x32xf32>, vector<4x32xf32> -> vector<4x32xf32>
    %58 = arith.addf %38, %57 : vector<4x32xf32>
    %59 = vector.extract_strided_slice %36 {offsets = [0, 16], sizes = [4, 16], strides = [1, 1]} : vector<4x96xf32> to vector<4x16xf32>
    %60 = vector.extract_strided_slice %36 {offsets = [0, 48], sizes = [4, 16], strides = [1, 1]} : vector<4x96xf32> to vector<4x16xf32>
    %61 = vector.extract_strided_slice %36 {offsets = [0, 80], sizes = [4, 16], strides = [1, 1]} : vector<4x96xf32> to vector<4x16xf32>
    %cst_32 = arith.constant dense<0.000000e+00> : vector<4x4xf32>
    %62 = tpu.matmul %59, %60, %cst_32 {dimension_numbers = #tpu.dot_dimension_numbers<[1], [1], [0], [0], [0, 0, 1, 0], [], []>} : vector<4x16xf32>, vector<4x16xf32>, vector<4x4xf32> -> vector<4x4xf32>
    %cst_33 = arith.constant 2.500000e-01 : f32
    %63 = vector.broadcast %cst_33 : f32 to vector<4x4xf32>
    %64 = arith.mulf %62, %63 : vector<4x4xf32>
    %cst_34 = arith.constant dense<0xFF800000> : vector<4xf32>
    %65 = vector.multi_reduction <maximumf>, %64, %cst_34 [1] : vector<4x4xf32> to vector<4xf32>
    %66 = vector.shape_cast %65 : vector<4xf32> to vector<4x1xf32>
    %67 = vector.broadcast %66 : vector<4x1xf32> to vector<4x4xf32>
    %68 = arith.subf %64, %67 : vector<4x4xf32>
    %69 = math.exp %68 : vector<4x4xf32>
    %cst_35 = arith.constant dense<0.000000e+00> : vector<4xf32>
    %70 = vector.multi_reduction <add>, %69, %cst_35 [1] : vector<4x4xf32> to vector<4xf32>
    %71 = vector.shape_cast %70 : vector<4xf32> to vector<4x1xf32>
    %72 = tpu.reciprocal %71 {approx = true} : vector<4x1xf32> -> vector<4x1xf32>
    %73 = vector.broadcast %72 : vector<4x1xf32> to vector<4x4xf32>
    %74 = arith.mulf %69, %73 : vector<4x4xf32>
    %cst_36 = arith.constant dense<0.000000e+00> : vector<4x16xf32>
    %75 = tpu.matmul %74, %61, %cst_36 {dimension_numbers = #tpu.dot_dimension_numbers<[1], [0], [0], [1], [0, 0, 1, 1], [], []>} : vector<4x4xf32>, vector<4x16xf32>, vector<4x16xf32> -> vector<4x16xf32>
    %76 = vector.extract_strided_slice %37 {offsets = [16, 0], sizes = [16, 32], strides = [1, 1]} : vector<32x32xf32> to vector<16x32xf32>
    %cst_37 = arith.constant dense<0.000000e+00> : vector<4x32xf32>
    %77 = tpu.matmul %75, %76, %cst_37 {dimension_numbers = #tpu.dot_dimension_numbers<[1], [0], [0], [1], [0, 0, 1, 1], [], []>} : vector<4x16xf32>, vector<16x32xf32>, vector<4x32xf32> -> vector<4x32xf32>
    %78 = arith.addf %58, %77 : vector<4x32xf32>
    %79 = arith.addf %9, %78 : vector<4x32xf32>
    %c0_38 = arith.constant 0 : index
    %c0_39 = arith.constant 0 : index
    %80 = vector.load %arg13[%c0_38, %c0_39] : memref<1x32xf32, #tpu.memory_space<vmem>>, vector<1x32xf32>
    %81 = vector.broadcast %80 : vector<1x32xf32> to vector<4x32xf32>
    %82 = arith.addf %79, %81 : vector<4x32xf32>
    %c0_40 = arith.constant 0 : index
    %c0_41 = arith.constant 0 : index
    %83 = vector.load %arg14[%c0_40, %c0_41] : memref<1x32xf32, #tpu.memory_space<vmem>>, vector<1x32xf32>
    %c0_42 = arith.constant 0 : index
    %c0_43 = arith.constant 0 : index
    %84 = vector.load %arg15[%c0_42, %c0_43] : memref<1x32xf32, #tpu.memory_space<vmem>>, vector<1x32xf32>
    %cst_44 = arith.constant dense<0.000000e+00> : vector<4xf32>
    %85 = vector.multi_reduction <add>, %82, %cst_44 [1] : vector<4x32xf32> to vector<4xf32>
    %86 = vector.shape_cast %85 : vector<4xf32> to vector<4x1xf32>
    %cst_45 = arith.constant 3.200000e+01 : f32
    %87 = vector.broadcast %cst_45 : f32 to vector<4x1xf32>
    %88 = arith.divf %86, %87 : vector<4x1xf32>
    %89 = vector.broadcast %88 : vector<4x1xf32> to vector<4x32xf32>
    %90 = arith.subf %82, %89 : vector<4x32xf32>
    %91 = arith.mulf %90, %90 : vector<4x32xf32>
    %cst_46 = arith.constant dense<0.000000e+00> : vector<4xf32>
    %92 = vector.multi_reduction <add>, %91, %cst_46 [1] : vector<4x32xf32> to vector<4xf32>
    %93 = vector.shape_cast %92 : vector<4xf32> to vector<4x1xf32>
    %cst_47 = arith.constant 3.200000e+01 : f32
    %94 = vector.broadcast %cst_47 : f32 to vector<4x1xf32>
    %95 = arith.divf %93, %94 : vector<4x1xf32>
    %cst_48 = arith.constant 9.99999997E-7 : f32
    %96 = vector.broadcast %cst_48 : f32 to vector<4x1xf32>
    %97 = arith.addf %95, %96 : vector<4x1xf32>
    %98 = math.rsqrt %97 : vector<4x1xf32>
    %99 = vector.broadcast %98 : vector<4x1xf32> to vector<4x32xf32>
    %100 = arith.mulf %90, %99 : vector<4x32xf32>
    %101 = vector.broadcast %83 : vector<1x32xf32> to vector<4x32xf32>
    %102 = arith.mulf %100, %101 : vector<4x32xf32>
    %103 = vector.broadcast %84 : vector<1x32xf32> to vector<4x32xf32>
    %104 = arith.addf %102, %103 : vector<4x32xf32>
    %c0_49 = arith.constant 0 : index
    %c0_50 = arith.constant 0 : index
    %105 = vector.load %arg16[%c0_49, %c0_50] : memref<32x128xf32, #tpu.memory_space<vmem>>, vector<32x128xf32>
    %cst_51 = arith.constant dense<0.000000e+00> : vector<4x128xf32>
    %106 = tpu.matmul %104, %105, %cst_51 {dimension_numbers = #tpu.dot_dimension_numbers<[1], [0], [0], [1], [0, 0, 1, 1], [], []>} : vector<4x32xf32>, vector<32x128xf32>, vector<4x128xf32> -> vector<4x128xf32>
    %c0_52 = arith.constant 0 : index
    %c0_53 = arith.constant 0 : index
    %107 = vector.load %arg17[%c0_52, %c0_53] : memref<1x128xf32, #tpu.memory_space<vmem>>, vector<1x128xf32>
    %108 = vector.broadcast %107 : vector<1x128xf32> to vector<4x128xf32>
    %109 = arith.addf %106, %108 : vector<4x128xf32>
    %110 = arith.mulf %109, %109 : vector<4x128xf32>
    %111 = arith.mulf %109, %110 : vector<4x128xf32>
    %cst_54 = arith.constant 4.471500e-02 : f32
    %112 = vector.broadcast %cst_54 : f32 to vector<4x128xf32>
    %113 = arith.mulf %112, %111 : vector<4x128xf32>
    %114 = arith.addf %109, %113 : vector<4x128xf32>
    %cst_55 = arith.constant 0.797884583 : f32
    %115 = vector.broadcast %cst_55 : f32 to vector<4x128xf32>
    %116 = arith.mulf %115, %114 : vector<4x128xf32>
    %117 = math.tanh %116 : vector<4x128xf32>
    %cst_56 = arith.constant 1.000000e+00 : f32
    %118 = vector.broadcast %cst_56 : f32 to vector<4x128xf32>
    %119 = arith.addf %118, %117 : vector<4x128xf32>
    %cst_57 = arith.constant 5.000000e-01 : f32
    %120 = vector.broadcast %cst_57 : f32 to vector<4x128xf32>
    %121 = arith.mulf %120, %119 : vector<4x128xf32>
    %122 = arith.mulf %109, %121 : vector<4x128xf32>
    %c0_58 = arith.constant 0 : index
    %c0_59 = arith.constant 0 : index
    %123 = vector.load %arg18[%c0_58, %c0_59] : memref<128x32xf32, #tpu.memory_space<vmem>>, vector<128x32xf32>
    %cst_60 = arith.constant dense<0.000000e+00> : vector<4x32xf32>
    %124 = tpu.matmul %122, %123, %cst_60 {dimension_numbers = #tpu.dot_dimension_numbers<[1], [0], [0], [1], [0, 0, 1, 1], [], []>} : vector<4x128xf32>, vector<128x32xf32>, vector<4x32xf32> -> vector<4x32xf32>
    %c0_61 = arith.constant 0 : index
    %c0_62 = arith.constant 0 : index
    %125 = vector.load %arg19[%c0_61, %c0_62] : memref<1x32xf32, #tpu.memory_space<vmem>>, vector<1x32xf32>
    %126 = vector.broadcast %125 : vector<1x32xf32> to vector<4x32xf32>
    %127 = arith.addf %124, %126 : vector<4x32xf32>
    %128 = arith.addf %82, %127 : vector<4x32xf32>
    %c0_63 = arith.constant 0 : index
    %c0_64 = arith.constant 0 : index
    %129 = vector.load %arg20[%c0_63, %c0_64] : memref<1x32xf32, #tpu.memory_space<vmem>>, vector<1x32xf32>
    %c0_65 = arith.constant 0 : index
    %c0_66 = arith.constant 0 : index
    %130 = vector.load %arg21[%c0_65, %c0_66] : memref<1x32xf32, #tpu.memory_space<vmem>>, vector<1x32xf32>
    %cst_67 = arith.constant dense<0.000000e+00> : vector<4xf32>
    %131 = vector.multi_reduction <add>, %128, %cst_67 [1] : vector<4x32xf32> to vector<4xf32>
    %132 = vector.shape_cast %131 : vector<4xf32> to vector<4x1xf32>
    %cst_68 = arith.constant 3.200000e+01 : f32
    %133 = vector.broadcast %cst_68 : f32 to vector<4x1xf32>
    %134 = arith.divf %132, %133 : vector<4x1xf32>
    %135 = vector.broadcast %134 : vector<4x1xf32> to vector<4x32xf32>
    %136 = arith.subf %128, %135 : vector<4x32xf32>
    %137 = arith.mulf %136, %136 : vector<4x32xf32>
    %cst_69 = arith.constant dense<0.000000e+00> : vector<4xf32>
    %138 = vector.multi_reduction <add>, %137, %cst_69 [1] : vector<4x32xf32> to vector<4xf32>
    %139 = vector.shape_cast %138 : vector<4xf32> to vector<4x1xf32>
    %cst_70 = arith.constant 3.200000e+01 : f32
    %140 = vector.broadcast %cst_70 : f32 to vector<4x1xf32>
    %141 = arith.divf %139, %140 : vector<4x1xf32>
    %cst_71 = arith.constant 9.99999997E-7 : f32
    %142 = vector.broadcast %cst_71 : f32 to vector<4x1xf32>
    %143 = arith.addf %141, %142 : vector<4x1xf32>
    %144 = math.rsqrt %143 : vector<4x1xf32>
    %145 = vector.broadcast %144 : vector<4x1xf32> to vector<4x32xf32>
    %146 = arith.mulf %136, %145 : vector<4x32xf32>
    %147 = vector.broadcast %129 : vector<1x32xf32> to vector<4x32xf32>
    %148 = arith.mulf %146, %147 : vector<4x32xf32>
    %149 = vector.broadcast %130 : vector<1x32xf32> to vector<4x32xf32>
    %150 = arith.addf %148, %149 : vector<4x32xf32>
    %c0_72 = arith.constant 0 : index
    %c0_73 = arith.constant 0 : index
    %151 = vector.load %arg22[%c0_72, %c0_73] : memref<32x96xf32, #tpu.memory_space<vmem>>, vector<32x96xf32>
    %cst_74 = arith.constant dense<0.000000e+00> : vector<4x96xf32>
    %152 = tpu.matmul %150, %151, %cst_74 {dimension_numbers = #tpu.dot_dimension_numbers<[1], [0], [0], [1], [0, 0, 1, 1], [], []>} : vector<4x32xf32>, vector<32x96xf32>, vector<4x96xf32> -> vector<4x96xf32>
    %c0_75 = arith.constant 0 : index
    %c0_76 = arith.constant 0 : index
    %153 = vector.load %arg23[%c0_75, %c0_76] : memref<1x96xf32, #tpu.memory_space<vmem>>, vector<1x96xf32>
    %154 = vector.broadcast %153 : vector<1x96xf32> to vector<4x96xf32>
    %155 = arith.addf %152, %154 : vector<4x96xf32>
    %c0_77 = arith.constant 0 : index
    %c0_78 = arith.constant 0 : index
    %156 = vector.load %arg24[%c0_77, %c0_78] : memref<32x32xf32, #tpu.memory_space<vmem>>, vector<32x32xf32>
    %cst_79 = arith.constant 0.000000e+00 : f32
    %157 = vector.broadcast %cst_79 : f32 to vector<4x32xf32>
    %158 = vector.extract_strided_slice %155 {offsets = [0, 0], sizes = [4, 16], strides = [1, 1]} : vector<4x96xf32> to vector<4x16xf32>
    %159 = vector.extract_strided_slice %155 {offsets = [0, 32], sizes = [4, 16], strides = [1, 1]} : vector<4x96xf32> to vector<4x16xf32>
    %160 = vector.extract_strided_slice %155 {offsets = [0, 64], sizes = [4, 16], strides = [1, 1]} : vector<4x96xf32> to vector<4x16xf32>
    %cst_80 = arith.constant dense<0.000000e+00> : vector<4x4xf32>
    %161 = tpu.matmul %158, %159, %cst_80 {dimension_numbers = #tpu.dot_dimension_numbers<[1], [1], [0], [0], [0, 0, 1, 0], [], []>} : vector<4x16xf32>, vector<4x16xf32>, vector<4x4xf32> -> vector<4x4xf32>
    %cst_81 = arith.constant 2.500000e-01 : f32
    %162 = vector.broadcast %cst_81 : f32 to vector<4x4xf32>
    %163 = arith.mulf %161, %162 : vector<4x4xf32>
    %cst_82 = arith.constant dense<0xFF800000> : vector<4xf32>
    %164 = vector.multi_reduction <maximumf>, %163, %cst_82 [1] : vector<4x4xf32> to vector<4xf32>
    %165 = vector.shape_cast %164 : vector<4xf32> to vector<4x1xf32>
    %166 = vector.broadcast %165 : vector<4x1xf32> to vector<4x4xf32>
    %167 = arith.subf %163, %166 : vector<4x4xf32>
    %168 = math.exp %167 : vector<4x4xf32>
    %cst_83 = arith.constant dense<0.000000e+00> : vector<4xf32>
    %169 = vector.multi_reduction <add>, %168, %cst_83 [1] : vector<4x4xf32> to vector<4xf32>
    %170 = vector.shape_cast %169 : vector<4xf32> to vector<4x1xf32>
    %171 = tpu.reciprocal %170 {approx = true} : vector<4x1xf32> -> vector<4x1xf32>
    %172 = vector.broadcast %171 : vector<4x1xf32> to vector<4x4xf32>
    %173 = arith.mulf %168, %172 : vector<4x4xf32>
    %cst_84 = arith.constant dense<0.000000e+00> : vector<4x16xf32>
    %174 = tpu.matmul %173, %160, %cst_84 {dimension_numbers = #tpu.dot_dimension_numbers<[1], [0], [0], [1], [0, 0, 1, 1], [], []>} : vector<4x4xf32>, vector<4x16xf32>, vector<4x16xf32> -> vector<4x16xf32>
    %175 = vector.extract_strided_slice %156 {offsets = [0, 0], sizes = [16, 32], strides = [1, 1]} : vector<32x32xf32> to vector<16x32xf32>
    %cst_85 = arith.constant dense<0.000000e+00> : vector<4x32xf32>
    %176 = tpu.matmul %174, %175, %cst_85 {dimension_numbers = #tpu.dot_dimension_numbers<[1], [0], [0], [1], [0, 0, 1, 1], [], []>} : vector<4x16xf32>, vector<16x32xf32>, vector<4x32xf32> -> vector<4x32xf32>
    %177 = arith.addf %157, %176 : vector<4x32xf32>
    %178 = vector.extract_strided_slice %155 {offsets = [0, 16], sizes = [4, 16], strides = [1, 1]} : vector<4x96xf32> to vector<4x16xf32>
    %179 = vector.extract_strided_slice %155 {offsets = [0, 48], sizes = [4, 16], strides = [1, 1]} : vector<4x96xf32> to vector<4x16xf32>
    %180 = vector.extract_strided_slice %155 {offsets = [0, 80], sizes = [4, 16], strides = [1, 1]} : vector<4x96xf32> to vector<4x16xf32>
    %cst_86 = arith.constant dense<0.000000e+00> : vector<4x4xf32>
    %181 = tpu.matmul %178, %179, %cst_86 {dimension_numbers = #tpu.dot_dimension_numbers<[1], [1], [0], [0], [0, 0, 1, 0], [], []>} : vector<4x16xf32>, vector<4x16xf32>, vector<4x4xf32> -> vector<4x4xf32>
    %cst_87 = arith.constant 2.500000e-01 : f32
    %182 = vector.broadcast %cst_87 : f32 to vector<4x4xf32>
    %183 = arith.mulf %181, %182 : vector<4x4xf32>
    %cst_88 = arith.constant dense<0xFF800000> : vector<4xf32>
    %184 = vector.multi_reduction <maximumf>, %183, %cst_88 [1] : vector<4x4xf32> to vector<4xf32>
    %185 = vector.shape_cast %184 : vector<4xf32> to vector<4x1xf32>
    %186 = vector.broadcast %185 : vector<4x1xf32> to vector<4x4xf32>
    %187 = arith.subf %183, %186 : vector<4x4xf32>
    %188 = math.exp %187 : vector<4x4xf32>
    %cst_89 = arith.constant dense<0.000000e+00> : vector<4xf32>
    %189 = vector.multi_reduction <add>, %188, %cst_89 [1] : vector<4x4xf32> to vector<4xf32>
    %190 = vector.shape_cast %189 : vector<4xf32> to vector<4x1xf32>
    %191 = tpu.reciprocal %190 {approx = true} : vector<4x1xf32> -> vector<4x1xf32>
    %192 = vector.broadcast %191 : vector<4x1xf32> to vector<4x4xf32>
    %193 = arith.mulf %188, %192 : vector<4x4xf32>
    %cst_90 = arith.constant dense<0.000000e+00> : vector<4x16xf32>
    %194 = tpu.matmul %193, %180, %cst_90 {dimension_numbers = #tpu.dot_dimension_numbers<[1], [0], [0], [1], [0, 0, 1, 1], [], []>} : vector<4x4xf32>, vector<4x16xf32>, vector<4x16xf32> -> vector<4x16xf32>
    %195 = vector.extract_strided_slice %156 {offsets = [16, 0], sizes = [16, 32], strides = [1, 1]} : vector<32x32xf32> to vector<16x32xf32>
    %cst_91 = arith.constant dense<0.000000e+00> : vector<4x32xf32>
    %196 = tpu.matmul %194, %195, %cst_91 {dimension_numbers = #tpu.dot_dimension_numbers<[1], [0], [0], [1], [0, 0, 1, 1], [], []>} : vector<4x16xf32>, vector<16x32xf32>, vector<4x32xf32> -> vector<4x32xf32>
    %197 = arith.addf %177, %196 : vector<4x32xf32>
    %198 = arith.addf %128, %197 : vector<4x32xf32>
    %c0_92 = arith.constant 0 : index
    %c0_93 = arith.constant 0 : index
    %199 = vector.load %arg25[%c0_92, %c0_93] : memref<1x32xf32, #tpu.memory_space<vmem>>, vector<1x32xf32>
    %200 = vector.broadcast %199 : vector<1x32xf32> to vector<4x32xf32>
    %201 = arith.addf %198, %200 : vector<4x32xf32>
    %c0_94 = arith.constant 0 : index
    %c0_95 = arith.constant 0 : index
    %202 = vector.load %arg26[%c0_94, %c0_95] : memref<1x32xf32, #tpu.memory_space<vmem>>, vector<1x32xf32>
    %c0_96 = arith.constant 0 : index
    %c0_97 = arith.constant 0 : index
    %203 = vector.load %arg27[%c0_96, %c0_97] : memref<1x32xf32, #tpu.memory_space<vmem>>, vector<1x32xf32>
    %cst_98 = arith.constant dense<0.000000e+00> : vector<4xf32>
    %204 = vector.multi_reduction <add>, %201, %cst_98 [1] : vector<4x32xf32> to vector<4xf32>
    %205 = vector.shape_cast %204 : vector<4xf32> to vector<4x1xf32>
    %cst_99 = arith.constant 3.200000e+01 : f32
    %206 = vector.broadcast %cst_99 : f32 to vector<4x1xf32>
    %207 = arith.divf %205, %206 : vector<4x1xf32>
    %208 = vector.broadcast %207 : vector<4x1xf32> to vector<4x32xf32>
    %209 = arith.subf %201, %208 : vector<4x32xf32>
    %210 = arith.mulf %209, %209 : vector<4x32xf32>
    %cst_100 = arith.constant dense<0.000000e+00> : vector<4xf32>
    %211 = vector.multi_reduction <add>, %210, %cst_100 [1] : vector<4x32xf32> to vector<4xf32>
    %212 = vector.shape_cast %211 : vector<4xf32> to vector<4x1xf32>
    %cst_101 = arith.constant 3.200000e+01 : f32
    %213 = vector.broadcast %cst_101 : f32 to vector<4x1xf32>
    %214 = arith.divf %212, %213 : vector<4x1xf32>
    %cst_102 = arith.constant 9.99999997E-7 : f32
    %215 = vector.broadcast %cst_102 : f32 to vector<4x1xf32>
    %216 = arith.addf %214, %215 : vector<4x1xf32>
    %217 = math.rsqrt %216 : vector<4x1xf32>
    %218 = vector.broadcast %217 : vector<4x1xf32> to vector<4x32xf32>
    %219 = arith.mulf %209, %218 : vector<4x32xf32>
    %220 = vector.broadcast %202 : vector<1x32xf32> to vector<4x32xf32>
    %221 = arith.mulf %219, %220 : vector<4x32xf32>
    %222 = vector.broadcast %203 : vector<1x32xf32> to vector<4x32xf32>
    %223 = arith.addf %221, %222 : vector<4x32xf32>
    %c0_103 = arith.constant 0 : index
    %c0_104 = arith.constant 0 : index
    %224 = vector.load %arg28[%c0_103, %c0_104] : memref<32x128xf32, #tpu.memory_space<vmem>>, vector<32x128xf32>
    %cst_105 = arith.constant dense<0.000000e+00> : vector<4x128xf32>
    %225 = tpu.matmul %223, %224, %cst_105 {dimension_numbers = #tpu.dot_dimension_numbers<[1], [0], [0], [1], [0, 0, 1, 1], [], []>} : vector<4x32xf32>, vector<32x128xf32>, vector<4x128xf32> -> vector<4x128xf32>
    %c0_106 = arith.constant 0 : index
    %c0_107 = arith.constant 0 : index
    %226 = vector.load %arg29[%c0_106, %c0_107] : memref<1x128xf32, #tpu.memory_space<vmem>>, vector<1x128xf32>
    %227 = vector.broadcast %226 : vector<1x128xf32> to vector<4x128xf32>
    %228 = arith.addf %225, %227 : vector<4x128xf32>
    %229 = arith.mulf %228, %228 : vector<4x128xf32>
    %230 = arith.mulf %228, %229 : vector<4x128xf32>
    %cst_108 = arith.constant 4.471500e-02 : f32
    %231 = vector.broadcast %cst_108 : f32 to vector<4x128xf32>
    %232 = arith.mulf %231, %230 : vector<4x128xf32>
    %233 = arith.addf %228, %232 : vector<4x128xf32>
    %cst_109 = arith.constant 0.797884583 : f32
    %234 = vector.broadcast %cst_109 : f32 to vector<4x128xf32>
    %235 = arith.mulf %234, %233 : vector<4x128xf32>
    %236 = math.tanh %235 : vector<4x128xf32>
    %cst_110 = arith.constant 1.000000e+00 : f32
    %237 = vector.broadcast %cst_110 : f32 to vector<4x128xf32>
    %238 = arith.addf %237, %236 : vector<4x128xf32>
    %cst_111 = arith.constant 5.000000e-01 : f32
    %239 = vector.broadcast %cst_111 : f32 to vector<4x128xf32>
    %240 = arith.mulf %239, %238 : vector<4x128xf32>
    %241 = arith.mulf %228, %240 : vector<4x128xf32>
    %c0_112 = arith.constant 0 : index
    %c0_113 = arith.constant 0 : index
    %242 = vector.load %arg30[%c0_112, %c0_113] : memref<128x32xf32, #tpu.memory_space<vmem>>, vector<128x32xf32>
    %cst_114 = arith.constant dense<0.000000e+00> : vector<4x32xf32>
    %243 = tpu.matmul %241, %242, %cst_114 {dimension_numbers = #tpu.dot_dimension_numbers<[1], [0], [0], [1], [0, 0, 1, 1], [], []>} : vector<4x128xf32>, vector<128x32xf32>, vector<4x32xf32> -> vector<4x32xf32>
    %c0_115 = arith.constant 0 : index
    %c0_116 = arith.constant 0 : index
    %244 = vector.load %arg31[%c0_115, %c0_116] : memref<1x32xf32, #tpu.memory_space<vmem>>, vector<1x32xf32>
    %245 = vector.broadcast %244 : vector<1x32xf32> to vector<4x32xf32>
    %246 = arith.addf %243, %245 : vector<4x32xf32>
    %247 = arith.addf %201, %246 : vector<4x32xf32>
    %c0_117 = arith.constant 0 : index
    %c0_118 = arith.constant 0 : index
    %248 = vector.load %arg32[%c0_117, %c0_118] : memref<1x32xf32, #tpu.memory_space<vmem>>, vector<1x32xf32>
    %c0_119 = arith.constant 0 : index
    %c0_120 = arith.constant 0 : index
    %249 = vector.load %arg33[%c0_119, %c0_120] : memref<1x32xf32, #tpu.memory_space<vmem>>, vector<1x32xf32>
    %cst_121 = arith.constant dense<0.000000e+00> : vector<4xf32>
    %250 = vector.multi_reduction <add>, %247, %cst_121 [1] : vector<4x32xf32> to vector<4xf32>
    %251 = vector.shape_cast %250 : vector<4xf32> to vector<4x1xf32>
    %cst_122 = arith.constant 3.200000e+01 : f32
    %252 = vector.broadcast %cst_122 : f32 to vector<4x1xf32>
    %253 = arith.divf %251, %252 : vector<4x1xf32>
    %254 = vector.broadcast %253 : vector<4x1xf32> to vector<4x32xf32>
    %255 = arith.subf %247, %254 : vector<4x32xf32>
    %256 = arith.mulf %255, %255 : vector<4x32xf32>
    %cst_123 = arith.constant dense<0.000000e+00> : vector<4xf32>
    %257 = vector.multi_reduction <add>, %256, %cst_123 [1] : vector<4x32xf32> to vector<4xf32>
    %258 = vector.shape_cast %257 : vector<4xf32> to vector<4x1xf32>
    %cst_124 = arith.constant 3.200000e+01 : f32
    %259 = vector.broadcast %cst_124 : f32 to vector<4x1xf32>
    %260 = arith.divf %258, %259 : vector<4x1xf32>
    %cst_125 = arith.constant 9.99999997E-7 : f32
    %261 = vector.broadcast %cst_125 : f32 to vector<4x1xf32>
    %262 = arith.addf %260, %261 : vector<4x1xf32>
    %263 = math.rsqrt %262 : vector<4x1xf32>
    %264 = vector.broadcast %263 : vector<4x1xf32> to vector<4x32xf32>
    %265 = arith.mulf %255, %264 : vector<4x32xf32>
    %266 = vector.broadcast %248 : vector<1x32xf32> to vector<4x32xf32>
    %267 = arith.mulf %265, %266 : vector<4x32xf32>
    %268 = vector.broadcast %249 : vector<1x32xf32> to vector<4x32xf32>
    %269 = arith.addf %267, %268 : vector<4x32xf32>
    %c0_126 = arith.constant 0 : index
    %c0_127 = arith.constant 0 : index
    %270 = vector.load %arg34[%c0_126, %c0_127] : memref<32x16xf32, #tpu.memory_space<vmem>>, vector<32x16xf32>
    %cst_128 = arith.constant dense<0.000000e+00> : vector<4x16xf32>
    %271 = tpu.matmul %269, %270, %cst_128 {dimension_numbers = #tpu.dot_dimension_numbers<[1], [0], [0], [1], [0, 0, 1, 1], [], []>} : vector<4x32xf32>, vector<32x16xf32>, vector<4x16xf32> -> vector<4x16xf32>
    %c0_129 = arith.constant 0 : index
    %c0_130 = arith.constant 0 : index
    %272 = vector.load %arg35[%c0_129, %c0_130] : memref<1x16xf32, #tpu.memory_space<vmem>>, vector<1x16xf32>
    %273 = vector.broadcast %272 : vector<1x16xf32> to vector<4x16xf32>
    %274 = arith.addf %271, %273 : vector<4x16xf32>
    %c0_131 = arith.constant 0 : index
    %c0_132 = arith.constant 0 : index
    %c0_133 = arith.constant 0 : index
    %275 = vector.load %arg3[%c0_131, %c0_132, %c0_133] : memref<1x16x4xf32, #tpu.memory_space<vmem>>, vector<1x16x4xf32>
    %276 = vector.shape_cast %275 : vector<1x16x4xf32> to vector<16x4xf32>
    %c0_134 = arith.constant 0 : index
    %c0_135 = arith.constant 0 : index
    %c0_136 = arith.constant 0 : index
    %277 = vector.load %arg4[%c0_134, %c0_135, %c0_136] : memref<1x16x1xf32, #tpu.memory_space<vmem>>, vector<1x16x1xf32>
    %278 = vector.shape_cast %277 : vector<1x16x1xf32> to vector<16x1xf32>
    %cst_137 = arith.constant dense<0.000000e+00> : vector<16x16xf32>
    %279 = tpu.matmul %276, %274, %cst_137 {dimension_numbers = #tpu.dot_dimension_numbers<[1], [0], [0], [1], [0, 0, 1, 1], [], []>} : vector<16x4xf32>, vector<4x16xf32>, vector<16x16xf32> -> vector<16x16xf32>
    %c0_138 = arith.constant 0 : index
    %c0_139 = arith.constant 0 : index
    %280 = vector.load %arg36[%c0_138, %c0_139] : memref<1x16xf32, #tpu.memory_space<vmem>>, vector<1x16xf32>
    %281 = vector.broadcast %278 : vector<16x1xf32> to vector<16x16xf32>
    %282 = vector.broadcast %280 : vector<1x16xf32> to vector<16x16xf32>
    %283 = arith.mulf %281, %282 : vector<16x16xf32>
    %284 = arith.addf %279, %283 : vector<16x16xf32>
    %c0_140 = arith.constant 0 : index
    %c0_141 = arith.constant 0 : index
    %285 = vector.load %arg37[%c0_140, %c0_141] : memref<16x16xf32, #tpu.memory_space<vmem>>, vector<16x16xf32>
    %286 = arith.addf %284, %285 : vector<16x16xf32>
    %c0_142 = arith.constant 0 : index
    %c0_143 = arith.constant 0 : index
    %287 = vector.load %arg38[%c0_142, %c0_143] : memref<1x16xf32, #tpu.memory_space<vmem>>, vector<1x16xf32>
    %c0_144 = arith.constant 0 : index
    %c0_145 = arith.constant 0 : index
    %288 = vector.load %arg39[%c0_144, %c0_145] : memref<1x16xf32, #tpu.memory_space<vmem>>, vector<1x16xf32>
    %cst_146 = arith.constant dense<0.000000e+00> : vector<16xf32>
    %289 = vector.multi_reduction <add>, %286, %cst_146 [1] : vector<16x16xf32> to vector<16xf32>
    %290 = vector.shape_cast %289 : vector<16xf32> to vector<16x1xf32>
    %cst_147 = arith.constant 1.600000e+01 : f32
    %291 = vector.broadcast %cst_147 : f32 to vector<16x1xf32>
    %292 = arith.divf %290, %291 : vector<16x1xf32>
    %293 = vector.broadcast %292 : vector<16x1xf32> to vector<16x16xf32>
    %294 = arith.subf %286, %293 : vector<16x16xf32>
    %295 = arith.mulf %294, %294 : vector<16x16xf32>
    %cst_148 = arith.constant dense<0.000000e+00> : vector<16xf32>
    %296 = vector.multi_reduction <add>, %295, %cst_148 [1] : vector<16x16xf32> to vector<16xf32>
    %297 = vector.shape_cast %296 : vector<16xf32> to vector<16x1xf32>
    %cst_149 = arith.constant 1.600000e+01 : f32
    %298 = vector.broadcast %cst_149 : f32 to vector<16x1xf32>
    %299 = arith.divf %297, %298 : vector<16x1xf32>
    %cst_150 = arith.constant 9.99999997E-7 : f32
    %300 = vector.broadcast %cst_150 : f32 to vector<16x1xf32>
    %301 = arith.addf %299, %300 : vector<16x1xf32>
    %302 = math.rsqrt %301 : vector<16x1xf32>
    %303 = vector.broadcast %302 : vector<16x1xf32> to vector<16x16xf32>
    %304 = arith.mulf %294, %303 : vector<16x16xf32>
    %305 = vector.broadcast %287 : vector<1x16xf32> to vector<16x16xf32>
    %306 = arith.mulf %304, %305 : vector<16x16xf32>
    %307 = vector.broadcast %288 : vector<1x16xf32> to vector<16x16xf32>
    %308 = arith.addf %306, %307 : vector<16x16xf32>
    %c0_151 = arith.constant 0 : index
    %c0_152 = arith.constant 0 : index
    %309 = vector.load %arg40[%c0_151, %c0_152] : memref<16x48xf32, #tpu.memory_space<vmem>>, vector<16x48xf32>
    %cst_153 = arith.constant dense<0.000000e+00> : vector<16x48xf32>
    %310 = tpu.matmul %308, %309, %cst_153 {dimension_numbers = #tpu.dot_dimension_numbers<[1], [0], [0], [1], [0, 0, 1, 1], [], []>} : vector<16x16xf32>, vector<16x48xf32>, vector<16x48xf32> -> vector<16x48xf32>
    %c0_154 = arith.constant 0 : index
    %c0_155 = arith.constant 0 : index
    %311 = vector.load %arg41[%c0_154, %c0_155] : memref<1x48xf32, #tpu.memory_space<vmem>>, vector<1x48xf32>
    %312 = vector.broadcast %311 : vector<1x48xf32> to vector<16x48xf32>
    %313 = arith.addf %310, %312 : vector<16x48xf32>
    %c0_156 = arith.constant 0 : index
    %c0_157 = arith.constant 0 : index
    %314 = vector.load %arg42[%c0_156, %c0_157] : memref<16x16xf32, #tpu.memory_space<vmem>>, vector<16x16xf32>
    %cst_158 = arith.constant 0.000000e+00 : f32
    %315 = vector.broadcast %cst_158 : f32 to vector<16x16xf32>
    %316 = vector.extract_strided_slice %313 {offsets = [0, 0], sizes = [16, 8], strides = [1, 1]} : vector<16x48xf32> to vector<16x8xf32>
    %317 = vector.extract_strided_slice %313 {offsets = [0, 16], sizes = [16, 8], strides = [1, 1]} : vector<16x48xf32> to vector<16x8xf32>
    %318 = vector.extract_strided_slice %313 {offsets = [0, 32], sizes = [16, 8], strides = [1, 1]} : vector<16x48xf32> to vector<16x8xf32>
    %cst_159 = arith.constant dense<0.000000e+00> : vector<16x16xf32>
    %319 = tpu.matmul %316, %317, %cst_159 {dimension_numbers = #tpu.dot_dimension_numbers<[1], [1], [0], [0], [0, 0, 1, 0], [], []>} : vector<16x8xf32>, vector<16x8xf32>, vector<16x16xf32> -> vector<16x16xf32>
    %cst_160 = arith.constant 0.353553385 : f32
    %320 = vector.broadcast %cst_160 : f32 to vector<16x16xf32>
    %321 = arith.mulf %319, %320 : vector<16x16xf32>
    %cst_161 = arith.constant dense<0xFF800000> : vector<16xf32>
    %322 = vector.multi_reduction <maximumf>, %321, %cst_161 [1] : vector<16x16xf32> to vector<16xf32>
    %323 = vector.shape_cast %322 : vector<16xf32> to vector<16x1xf32>
    %324 = vector.broadcast %323 : vector<16x1xf32> to vector<16x16xf32>
    %325 = arith.subf %321, %324 : vector<16x16xf32>
    %326 = math.exp %325 : vector<16x16xf32>
    %cst_162 = arith.constant dense<0.000000e+00> : vector<16xf32>
    %327 = vector.multi_reduction <add>, %326, %cst_162 [1] : vector<16x16xf32> to vector<16xf32>
    %328 = vector.shape_cast %327 : vector<16xf32> to vector<16x1xf32>
    %329 = tpu.reciprocal %328 {approx = true} : vector<16x1xf32> -> vector<16x1xf32>
    %330 = vector.broadcast %329 : vector<16x1xf32> to vector<16x16xf32>
    %331 = arith.mulf %326, %330 : vector<16x16xf32>
    %cst_163 = arith.constant dense<0.000000e+00> : vector<16x8xf32>
    %332 = tpu.matmul %331, %318, %cst_163 {dimension_numbers = #tpu.dot_dimension_numbers<[1], [0], [0], [1], [0, 0, 1, 1], [], []>} : vector<16x16xf32>, vector<16x8xf32>, vector<16x8xf32> -> vector<16x8xf32>
    %333 = vector.extract_strided_slice %314 {offsets = [0, 0], sizes = [8, 16], strides = [1, 1]} : vector<16x16xf32> to vector<8x16xf32>
    %cst_164 = arith.constant dense<0.000000e+00> : vector<16x16xf32>
    %334 = tpu.matmul %332, %333, %cst_164 {dimension_numbers = #tpu.dot_dimension_numbers<[1], [0], [0], [1], [0, 0, 1, 1], [], []>} : vector<16x8xf32>, vector<8x16xf32>, vector<16x16xf32> -> vector<16x16xf32>
    %335 = arith.addf %315, %334 : vector<16x16xf32>
    %336 = vector.extract_strided_slice %313 {offsets = [0, 8], sizes = [16, 8], strides = [1, 1]} : vector<16x48xf32> to vector<16x8xf32>
    %337 = vector.extract_strided_slice %313 {offsets = [0, 24], sizes = [16, 8], strides = [1, 1]} : vector<16x48xf32> to vector<16x8xf32>
    %338 = vector.extract_strided_slice %313 {offsets = [0, 40], sizes = [16, 8], strides = [1, 1]} : vector<16x48xf32> to vector<16x8xf32>
    %cst_165 = arith.constant dense<0.000000e+00> : vector<16x16xf32>
    %339 = tpu.matmul %336, %337, %cst_165 {dimension_numbers = #tpu.dot_dimension_numbers<[1], [1], [0], [0], [0, 0, 1, 0], [], []>} : vector<16x8xf32>, vector<16x8xf32>, vector<16x16xf32> -> vector<16x16xf32>
    %cst_166 = arith.constant 0.353553385 : f32
    %340 = vector.broadcast %cst_166 : f32 to vector<16x16xf32>
    %341 = arith.mulf %339, %340 : vector<16x16xf32>
    %cst_167 = arith.constant dense<0xFF800000> : vector<16xf32>
    %342 = vector.multi_reduction <maximumf>, %341, %cst_167 [1] : vector<16x16xf32> to vector<16xf32>
    %343 = vector.shape_cast %342 : vector<16xf32> to vector<16x1xf32>
    %344 = vector.broadcast %343 : vector<16x1xf32> to vector<16x16xf32>
    %345 = arith.subf %341, %344 : vector<16x16xf32>
    %346 = math.exp %345 : vector<16x16xf32>
    %cst_168 = arith.constant dense<0.000000e+00> : vector<16xf32>
    %347 = vector.multi_reduction <add>, %346, %cst_168 [1] : vector<16x16xf32> to vector<16xf32>
    %348 = vector.shape_cast %347 : vector<16xf32> to vector<16x1xf32>
    %349 = tpu.reciprocal %348 {approx = true} : vector<16x1xf32> -> vector<16x1xf32>
    %350 = vector.broadcast %349 : vector<16x1xf32> to vector<16x16xf32>
    %351 = arith.mulf %346, %350 : vector<16x16xf32>
    %cst_169 = arith.constant dense<0.000000e+00> : vector<16x8xf32>
    %352 = tpu.matmul %351, %338, %cst_169 {dimension_numbers = #tpu.dot_dimension_numbers<[1], [0], [0], [1], [0, 0, 1, 1], [], []>} : vector<16x16xf32>, vector<16x8xf32>, vector<16x8xf32> -> vector<16x8xf32>
    %353 = vector.extract_strided_slice %314 {offsets = [8, 0], sizes = [8, 16], strides = [1, 1]} : vector<16x16xf32> to vector<8x16xf32>
    %cst_170 = arith.constant dense<0.000000e+00> : vector<16x16xf32>
    %354 = tpu.matmul %352, %353, %cst_170 {dimension_numbers = #tpu.dot_dimension_numbers<[1], [0], [0], [1], [0, 0, 1, 1], [], []>} : vector<16x8xf32>, vector<8x16xf32>, vector<16x16xf32> -> vector<16x16xf32>
    %355 = arith.addf %335, %354 : vector<16x16xf32>
    %356 = arith.addf %286, %355 : vector<16x16xf32>
    %c0_171 = arith.constant 0 : index
    %c0_172 = arith.constant 0 : index
    %357 = vector.load %arg43[%c0_171, %c0_172] : memref<1x16xf32, #tpu.memory_space<vmem>>, vector<1x16xf32>
    %358 = vector.broadcast %357 : vector<1x16xf32> to vector<16x16xf32>
    %359 = arith.addf %356, %358 : vector<16x16xf32>
    %c0_173 = arith.constant 0 : index
    %c0_174 = arith.constant 0 : index
    %360 = vector.load %arg44[%c0_173, %c0_174] : memref<1x16xf32, #tpu.memory_space<vmem>>, vector<1x16xf32>
    %c0_175 = arith.constant 0 : index
    %c0_176 = arith.constant 0 : index
    %361 = vector.load %arg45[%c0_175, %c0_176] : memref<1x16xf32, #tpu.memory_space<vmem>>, vector<1x16xf32>
    %cst_177 = arith.constant dense<0.000000e+00> : vector<16xf32>
    %362 = vector.multi_reduction <add>, %359, %cst_177 [1] : vector<16x16xf32> to vector<16xf32>
    %363 = vector.shape_cast %362 : vector<16xf32> to vector<16x1xf32>
    %cst_178 = arith.constant 1.600000e+01 : f32
    %364 = vector.broadcast %cst_178 : f32 to vector<16x1xf32>
    %365 = arith.divf %363, %364 : vector<16x1xf32>
    %366 = vector.broadcast %365 : vector<16x1xf32> to vector<16x16xf32>
    %367 = arith.subf %359, %366 : vector<16x16xf32>
    %368 = arith.mulf %367, %367 : vector<16x16xf32>
    %cst_179 = arith.constant dense<0.000000e+00> : vector<16xf32>
    %369 = vector.multi_reduction <add>, %368, %cst_179 [1] : vector<16x16xf32> to vector<16xf32>
    %370 = vector.shape_cast %369 : vector<16xf32> to vector<16x1xf32>
    %cst_180 = arith.constant 1.600000e+01 : f32
    %371 = vector.broadcast %cst_180 : f32 to vector<16x1xf32>
    %372 = arith.divf %370, %371 : vector<16x1xf32>
    %cst_181 = arith.constant 9.99999997E-7 : f32
    %373 = vector.broadcast %cst_181 : f32 to vector<16x1xf32>
    %374 = arith.addf %372, %373 : vector<16x1xf32>
    %375 = math.rsqrt %374 : vector<16x1xf32>
    %376 = vector.broadcast %375 : vector<16x1xf32> to vector<16x16xf32>
    %377 = arith.mulf %367, %376 : vector<16x16xf32>
    %378 = vector.broadcast %360 : vector<1x16xf32> to vector<16x16xf32>
    %379 = arith.mulf %377, %378 : vector<16x16xf32>
    %380 = vector.broadcast %361 : vector<1x16xf32> to vector<16x16xf32>
    %381 = arith.addf %379, %380 : vector<16x16xf32>
    %c0_182 = arith.constant 0 : index
    %c0_183 = arith.constant 0 : index
    %382 = vector.load %arg46[%c0_182, %c0_183] : memref<16x64xf32, #tpu.memory_space<vmem>>, vector<16x64xf32>
    %cst_184 = arith.constant dense<0.000000e+00> : vector<16x64xf32>
    %383 = tpu.matmul %381, %382, %cst_184 {dimension_numbers = #tpu.dot_dimension_numbers<[1], [0], [0], [1], [0, 0, 1, 1], [], []>} : vector<16x16xf32>, vector<16x64xf32>, vector<16x64xf32> -> vector<16x64xf32>
    %c0_185 = arith.constant 0 : index
    %c0_186 = arith.constant 0 : index
    %384 = vector.load %arg47[%c0_185, %c0_186] : memref<1x64xf32, #tpu.memory_space<vmem>>, vector<1x64xf32>
    %385 = vector.broadcast %384 : vector<1x64xf32> to vector<16x64xf32>
    %386 = arith.addf %383, %385 : vector<16x64xf32>
    %387 = arith.mulf %386, %386 : vector<16x64xf32>
    %388 = arith.mulf %386, %387 : vector<16x64xf32>
    %cst_187 = arith.constant 4.471500e-02 : f32
    %389 = vector.broadcast %cst_187 : f32 to vector<16x64xf32>
    %390 = arith.mulf %389, %388 : vector<16x64xf32>
    %391 = arith.addf %386, %390 : vector<16x64xf32>
    %cst_188 = arith.constant 0.797884583 : f32
    %392 = vector.broadcast %cst_188 : f32 to vector<16x64xf32>
    %393 = arith.mulf %392, %391 : vector<16x64xf32>
    %394 = math.tanh %393 : vector<16x64xf32>
    %cst_189 = arith.constant 1.000000e+00 : f32
    %395 = vector.broadcast %cst_189 : f32 to vector<16x64xf32>
    %396 = arith.addf %395, %394 : vector<16x64xf32>
    %cst_190 = arith.constant 5.000000e-01 : f32
    %397 = vector.broadcast %cst_190 : f32 to vector<16x64xf32>
    %398 = arith.mulf %397, %396 : vector<16x64xf32>
    %399 = arith.mulf %386, %398 : vector<16x64xf32>
    %c0_191 = arith.constant 0 : index
    %c0_192 = arith.constant 0 : index
    %400 = vector.load %arg48[%c0_191, %c0_192] : memref<64x16xf32, #tpu.memory_space<vmem>>, vector<64x16xf32>
    %cst_193 = arith.constant dense<0.000000e+00> : vector<16x16xf32>
    %401 = tpu.matmul %399, %400, %cst_193 {dimension_numbers = #tpu.dot_dimension_numbers<[1], [0], [0], [1], [0, 0, 1, 1], [], []>} : vector<16x64xf32>, vector<64x16xf32>, vector<16x16xf32> -> vector<16x16xf32>
    %c0_194 = arith.constant 0 : index
    %c0_195 = arith.constant 0 : index
    %402 = vector.load %arg49[%c0_194, %c0_195] : memref<1x16xf32, #tpu.memory_space<vmem>>, vector<1x16xf32>
    %403 = vector.broadcast %402 : vector<1x16xf32> to vector<16x16xf32>
    %404 = arith.addf %401, %403 : vector<16x16xf32>
    %405 = arith.addf %359, %404 : vector<16x16xf32>
    %c0_196 = arith.constant 0 : index
    %c0_197 = arith.constant 0 : index
    %406 = vector.load %arg50[%c0_196, %c0_197] : memref<1x16xf32, #tpu.memory_space<vmem>>, vector<1x16xf32>
    %c0_198 = arith.constant 0 : index
    %c0_199 = arith.constant 0 : index
    %407 = vector.load %arg51[%c0_198, %c0_199] : memref<1x16xf32, #tpu.memory_space<vmem>>, vector<1x16xf32>
    %cst_200 = arith.constant dense<0.000000e+00> : vector<16xf32>
    %408 = vector.multi_reduction <add>, %405, %cst_200 [1] : vector<16x16xf32> to vector<16xf32>
    %409 = vector.shape_cast %408 : vector<16xf32> to vector<16x1xf32>
    %cst_201 = arith.constant 1.600000e+01 : f32
    %410 = vector.broadcast %cst_201 : f32 to vector<16x1xf32>
    %411 = arith.divf %409, %410 : vector<16x1xf32>
    %412 = vector.broadcast %411 : vector<16x1xf32> to vector<16x16xf32>
    %413 = arith.subf %405, %412 : vector<16x16xf32>
    %414 = arith.mulf %413, %413 : vector<16x16xf32>
    %cst_202 = arith.constant dense<0.000000e+00> : vector<16xf32>
    %415 = vector.multi_reduction <add>, %414, %cst_202 [1] : vector<16x16xf32> to vector<16xf32>
    %416 = vector.shape_cast %415 : vector<16xf32> to vector<16x1xf32>
    %cst_203 = arith.constant 1.600000e+01 : f32
    %417 = vector.broadcast %cst_203 : f32 to vector<16x1xf32>
    %418 = arith.divf %416, %417 : vector<16x1xf32>
    %cst_204 = arith.constant 9.99999997E-7 : f32
    %419 = vector.broadcast %cst_204 : f32 to vector<16x1xf32>
    %420 = arith.addf %418, %419 : vector<16x1xf32>
    %421 = math.rsqrt %420 : vector<16x1xf32>
    %422 = vector.broadcast %421 : vector<16x1xf32> to vector<16x16xf32>
    %423 = arith.mulf %413, %422 : vector<16x16xf32>
    %424 = vector.broadcast %406 : vector<1x16xf32> to vector<16x16xf32>
    %425 = arith.mulf %423, %424 : vector<16x16xf32>
    %426 = vector.broadcast %407 : vector<1x16xf32> to vector<16x16xf32>
    %427 = arith.addf %425, %426 : vector<16x16xf32>
    %c0_205 = arith.constant 0 : index
    %c0_206 = arith.constant 0 : index
    %428 = vector.load %arg52[%c0_205, %c0_206] : memref<16x48xf32, #tpu.memory_space<vmem>>, vector<16x48xf32>
    %cst_207 = arith.constant dense<0.000000e+00> : vector<16x48xf32>
    %429 = tpu.matmul %427, %428, %cst_207 {dimension_numbers = #tpu.dot_dimension_numbers<[1], [0], [0], [1], [0, 0, 1, 1], [], []>} : vector<16x16xf32>, vector<16x48xf32>, vector<16x48xf32> -> vector<16x48xf32>
    %c0_208 = arith.constant 0 : index
    %c0_209 = arith.constant 0 : index
    %430 = vector.load %arg53[%c0_208, %c0_209] : memref<1x48xf32, #tpu.memory_space<vmem>>, vector<1x48xf32>
    %431 = vector.broadcast %430 : vector<1x48xf32> to vector<16x48xf32>
    %432 = arith.addf %429, %431 : vector<16x48xf32>
    %c0_210 = arith.constant 0 : index
    %c0_211 = arith.constant 0 : index
    %433 = vector.load %arg54[%c0_210, %c0_211] : memref<16x16xf32, #tpu.memory_space<vmem>>, vector<16x16xf32>
    %cst_212 = arith.constant 0.000000e+00 : f32
    %434 = vector.broadcast %cst_212 : f32 to vector<16x16xf32>
    %435 = vector.extract_strided_slice %432 {offsets = [0, 0], sizes = [16, 8], strides = [1, 1]} : vector<16x48xf32> to vector<16x8xf32>
    %436 = vector.extract_strided_slice %432 {offsets = [0, 16], sizes = [16, 8], strides = [1, 1]} : vector<16x48xf32> to vector<16x8xf32>
    %437 = vector.extract_strided_slice %432 {offsets = [0, 32], sizes = [16, 8], strides = [1, 1]} : vector<16x48xf32> to vector<16x8xf32>
    %cst_213 = arith.constant dense<0.000000e+00> : vector<16x16xf32>
    %438 = tpu.matmul %435, %436, %cst_213 {dimension_numbers = #tpu.dot_dimension_numbers<[1], [1], [0], [0], [0, 0, 1, 0], [], []>} : vector<16x8xf32>, vector<16x8xf32>, vector<16x16xf32> -> vector<16x16xf32>
    %cst_214 = arith.constant 0.353553385 : f32
    %439 = vector.broadcast %cst_214 : f32 to vector<16x16xf32>
    %440 = arith.mulf %438, %439 : vector<16x16xf32>
    %cst_215 = arith.constant dense<0xFF800000> : vector<16xf32>
    %441 = vector.multi_reduction <maximumf>, %440, %cst_215 [1] : vector<16x16xf32> to vector<16xf32>
    %442 = vector.shape_cast %441 : vector<16xf32> to vector<16x1xf32>
    %443 = vector.broadcast %442 : vector<16x1xf32> to vector<16x16xf32>
    %444 = arith.subf %440, %443 : vector<16x16xf32>
    %445 = math.exp %444 : vector<16x16xf32>
    %cst_216 = arith.constant dense<0.000000e+00> : vector<16xf32>
    %446 = vector.multi_reduction <add>, %445, %cst_216 [1] : vector<16x16xf32> to vector<16xf32>
    %447 = vector.shape_cast %446 : vector<16xf32> to vector<16x1xf32>
    %448 = tpu.reciprocal %447 {approx = true} : vector<16x1xf32> -> vector<16x1xf32>
    %449 = vector.broadcast %448 : vector<16x1xf32> to vector<16x16xf32>
    %450 = arith.mulf %445, %449 : vector<16x16xf32>
    %cst_217 = arith.constant dense<0.000000e+00> : vector<16x8xf32>
    %451 = tpu.matmul %450, %437, %cst_217 {dimension_numbers = #tpu.dot_dimension_numbers<[1], [0], [0], [1], [0, 0, 1, 1], [], []>} : vector<16x16xf32>, vector<16x8xf32>, vector<16x8xf32> -> vector<16x8xf32>
    %452 = vector.extract_strided_slice %433 {offsets = [0, 0], sizes = [8, 16], strides = [1, 1]} : vector<16x16xf32> to vector<8x16xf32>
    %cst_218 = arith.constant dense<0.000000e+00> : vector<16x16xf32>
    %453 = tpu.matmul %451, %452, %cst_218 {dimension_numbers = #tpu.dot_dimension_numbers<[1], [0], [0], [1], [0, 0, 1, 1], [], []>} : vector<16x8xf32>, vector<8x16xf32>, vector<16x16xf32> -> vector<16x16xf32>
    %454 = arith.addf %434, %453 : vector<16x16xf32>
    %455 = vector.extract_strided_slice %432 {offsets = [0, 8], sizes = [16, 8], strides = [1, 1]} : vector<16x48xf32> to vector<16x8xf32>
    %456 = vector.extract_strided_slice %432 {offsets = [0, 24], sizes = [16, 8], strides = [1, 1]} : vector<16x48xf32> to vector<16x8xf32>
    %457 = vector.extract_strided_slice %432 {offsets = [0, 40], sizes = [16, 8], strides = [1, 1]} : vector<16x48xf32> to vector<16x8xf32>
    %cst_219 = arith.constant dense<0.000000e+00> : vector<16x16xf32>
    %458 = tpu.matmul %455, %456, %cst_219 {dimension_numbers = #tpu.dot_dimension_numbers<[1], [1], [0], [0], [0, 0, 1, 0], [], []>} : vector<16x8xf32>, vector<16x8xf32>, vector<16x16xf32> -> vector<16x16xf32>
    %cst_220 = arith.constant 0.353553385 : f32
    %459 = vector.broadcast %cst_220 : f32 to vector<16x16xf32>
    %460 = arith.mulf %458, %459 : vector<16x16xf32>
    %cst_221 = arith.constant dense<0xFF800000> : vector<16xf32>
    %461 = vector.multi_reduction <maximumf>, %460, %cst_221 [1] : vector<16x16xf32> to vector<16xf32>
    %462 = vector.shape_cast %461 : vector<16xf32> to vector<16x1xf32>
    %463 = vector.broadcast %462 : vector<16x1xf32> to vector<16x16xf32>
    %464 = arith.subf %460, %463 : vector<16x16xf32>
    %465 = math.exp %464 : vector<16x16xf32>
    %cst_222 = arith.constant dense<0.000000e+00> : vector<16xf32>
    %466 = vector.multi_reduction <add>, %465, %cst_222 [1] : vector<16x16xf32> to vector<16xf32>
    %467 = vector.shape_cast %466 : vector<16xf32> to vector<16x1xf32>
    %468 = tpu.reciprocal %467 {approx = true} : vector<16x1xf32> -> vector<16x1xf32>
    %469 = vector.broadcast %468 : vector<16x1xf32> to vector<16x16xf32>
    %470 = arith.mulf %465, %469 : vector<16x16xf32>
    %cst_223 = arith.constant dense<0.000000e+00> : vector<16x8xf32>
    %471 = tpu.matmul %470, %457, %cst_223 {dimension_numbers = #tpu.dot_dimension_numbers<[1], [0], [0], [1], [0, 0, 1, 1], [], []>} : vector<16x16xf32>, vector<16x8xf32>, vector<16x8xf32> -> vector<16x8xf32>
    %472 = vector.extract_strided_slice %433 {offsets = [8, 0], sizes = [8, 16], strides = [1, 1]} : vector<16x16xf32> to vector<8x16xf32>
    %cst_224 = arith.constant dense<0.000000e+00> : vector<16x16xf32>
    %473 = tpu.matmul %471, %472, %cst_224 {dimension_numbers = #tpu.dot_dimension_numbers<[1], [0], [0], [1], [0, 0, 1, 1], [], []>} : vector<16x8xf32>, vector<8x16xf32>, vector<16x16xf32> -> vector<16x16xf32>
    %474 = arith.addf %454, %473 : vector<16x16xf32>
    %475 = arith.addf %405, %474 : vector<16x16xf32>
    %c0_225 = arith.constant 0 : index
    %c0_226 = arith.constant 0 : index
    %476 = vector.load %arg55[%c0_225, %c0_226] : memref<1x16xf32, #tpu.memory_space<vmem>>, vector<1x16xf32>
    %477 = vector.broadcast %476 : vector<1x16xf32> to vector<16x16xf32>
    %478 = arith.addf %475, %477 : vector<16x16xf32>
    %c0_227 = arith.constant 0 : index
    %c0_228 = arith.constant 0 : index
    %479 = vector.load %arg56[%c0_227, %c0_228] : memref<1x16xf32, #tpu.memory_space<vmem>>, vector<1x16xf32>
    %c0_229 = arith.constant 0 : index
    %c0_230 = arith.constant 0 : index
    %480 = vector.load %arg57[%c0_229, %c0_230] : memref<1x16xf32, #tpu.memory_space<vmem>>, vector<1x16xf32>
    %cst_231 = arith.constant dense<0.000000e+00> : vector<16xf32>
    %481 = vector.multi_reduction <add>, %478, %cst_231 [1] : vector<16x16xf32> to vector<16xf32>
    %482 = vector.shape_cast %481 : vector<16xf32> to vector<16x1xf32>
    %cst_232 = arith.constant 1.600000e+01 : f32
    %483 = vector.broadcast %cst_232 : f32 to vector<16x1xf32>
    %484 = arith.divf %482, %483 : vector<16x1xf32>
    %485 = vector.broadcast %484 : vector<16x1xf32> to vector<16x16xf32>
    %486 = arith.subf %478, %485 : vector<16x16xf32>
    %487 = arith.mulf %486, %486 : vector<16x16xf32>
    %cst_233 = arith.constant dense<0.000000e+00> : vector<16xf32>
    %488 = vector.multi_reduction <add>, %487, %cst_233 [1] : vector<16x16xf32> to vector<16xf32>
    %489 = vector.shape_cast %488 : vector<16xf32> to vector<16x1xf32>
    %cst_234 = arith.constant 1.600000e+01 : f32
    %490 = vector.broadcast %cst_234 : f32 to vector<16x1xf32>
    %491 = arith.divf %489, %490 : vector<16x1xf32>
    %cst_235 = arith.constant 9.99999997E-7 : f32
    %492 = vector.broadcast %cst_235 : f32 to vector<16x1xf32>
    %493 = arith.addf %491, %492 : vector<16x1xf32>
    %494 = math.rsqrt %493 : vector<16x1xf32>
    %495 = vector.broadcast %494 : vector<16x1xf32> to vector<16x16xf32>
    %496 = arith.mulf %486, %495 : vector<16x16xf32>
    %497 = vector.broadcast %479 : vector<1x16xf32> to vector<16x16xf32>
    %498 = arith.mulf %496, %497 : vector<16x16xf32>
    %499 = vector.broadcast %480 : vector<1x16xf32> to vector<16x16xf32>
    %500 = arith.addf %498, %499 : vector<16x16xf32>
    %c0_236 = arith.constant 0 : index
    %c0_237 = arith.constant 0 : index
    %501 = vector.load %arg58[%c0_236, %c0_237] : memref<16x64xf32, #tpu.memory_space<vmem>>, vector<16x64xf32>
    %cst_238 = arith.constant dense<0.000000e+00> : vector<16x64xf32>
    %502 = tpu.matmul %500, %501, %cst_238 {dimension_numbers = #tpu.dot_dimension_numbers<[1], [0], [0], [1], [0, 0, 1, 1], [], []>} : vector<16x16xf32>, vector<16x64xf32>, vector<16x64xf32> -> vector<16x64xf32>
    %c0_239 = arith.constant 0 : index
    %c0_240 = arith.constant 0 : index
    %503 = vector.load %arg59[%c0_239, %c0_240] : memref<1x64xf32, #tpu.memory_space<vmem>>, vector<1x64xf32>
    %504 = vector.broadcast %503 : vector<1x64xf32> to vector<16x64xf32>
    %505 = arith.addf %502, %504 : vector<16x64xf32>
    %506 = arith.mulf %505, %505 : vector<16x64xf32>
    %507 = arith.mulf %505, %506 : vector<16x64xf32>
    %cst_241 = arith.constant 4.471500e-02 : f32
    %508 = vector.broadcast %cst_241 : f32 to vector<16x64xf32>
    %509 = arith.mulf %508, %507 : vector<16x64xf32>
    %510 = arith.addf %505, %509 : vector<16x64xf32>
    %cst_242 = arith.constant 0.797884583 : f32
    %511 = vector.broadcast %cst_242 : f32 to vector<16x64xf32>
    %512 = arith.mulf %511, %510 : vector<16x64xf32>
    %513 = math.tanh %512 : vector<16x64xf32>
    %cst_243 = arith.constant 1.000000e+00 : f32
    %514 = vector.broadcast %cst_243 : f32 to vector<16x64xf32>
    %515 = arith.addf %514, %513 : vector<16x64xf32>
    %cst_244 = arith.constant 5.000000e-01 : f32
    %516 = vector.broadcast %cst_244 : f32 to vector<16x64xf32>
    %517 = arith.mulf %516, %515 : vector<16x64xf32>
    %518 = arith.mulf %505, %517 : vector<16x64xf32>
    %c0_245 = arith.constant 0 : index
    %c0_246 = arith.constant 0 : index
    %519 = vector.load %arg60[%c0_245, %c0_246] : memref<64x16xf32, #tpu.memory_space<vmem>>, vector<64x16xf32>
    %cst_247 = arith.constant dense<0.000000e+00> : vector<16x16xf32>
    %520 = tpu.matmul %518, %519, %cst_247 {dimension_numbers = #tpu.dot_dimension_numbers<[1], [0], [0], [1], [0, 0, 1, 1], [], []>} : vector<16x64xf32>, vector<64x16xf32>, vector<16x16xf32> -> vector<16x16xf32>
    %c0_248 = arith.constant 0 : index
    %c0_249 = arith.constant 0 : index
    %521 = vector.load %arg61[%c0_248, %c0_249] : memref<1x16xf32, #tpu.memory_space<vmem>>, vector<1x16xf32>
    %522 = vector.broadcast %521 : vector<1x16xf32> to vector<16x16xf32>
    %523 = arith.addf %520, %522 : vector<16x16xf32>
    %524 = arith.addf %478, %523 : vector<16x16xf32>
    %c0_250 = arith.constant 0 : index
    %c0_251 = arith.constant 0 : index
    %525 = vector.load %arg62[%c0_250, %c0_251] : memref<1x16xf32, #tpu.memory_space<vmem>>, vector<1x16xf32>
    %c0_252 = arith.constant 0 : index
    %c0_253 = arith.constant 0 : index
    %526 = vector.load %arg63[%c0_252, %c0_253] : memref<1x16xf32, #tpu.memory_space<vmem>>, vector<1x16xf32>
    %cst_254 = arith.constant dense<0.000000e+00> : vector<16xf32>
    %527 = vector.multi_reduction <add>, %524, %cst_254 [1] : vector<16x16xf32> to vector<16xf32>
    %528 = vector.shape_cast %527 : vector<16xf32> to vector<16x1xf32>
    %cst_255 = arith.constant 1.600000e+01 : f32
    %529 = vector.broadcast %cst_255 : f32 to vector<16x1xf32>
    %530 = arith.divf %528, %529 : vector<16x1xf32>
    %531 = vector.broadcast %530 : vector<16x1xf32> to vector<16x16xf32>
    %532 = arith.subf %524, %531 : vector<16x16xf32>
    %533 = arith.mulf %532, %532 : vector<16x16xf32>
    %cst_256 = arith.constant dense<0.000000e+00> : vector<16xf32>
    %534 = vector.multi_reduction <add>, %533, %cst_256 [1] : vector<16x16xf32> to vector<16xf32>
    %535 = vector.shape_cast %534 : vector<16xf32> to vector<16x1xf32>
    %cst_257 = arith.constant 1.600000e+01 : f32
    %536 = vector.broadcast %cst_257 : f32 to vector<16x1xf32>
    %537 = arith.divf %535, %536 : vector<16x1xf32>
    %cst_258 = arith.constant 9.99999997E-7 : f32
    %538 = vector.broadcast %cst_258 : f32 to vector<16x1xf32>
    %539 = arith.addf %537, %538 : vector<16x1xf32>
    %540 = math.rsqrt %539 : vector<16x1xf32>
    %541 = vector.broadcast %540 : vector<16x1xf32> to vector<16x16xf32>
    %542 = arith.mulf %532, %541 : vector<16x16xf32>
    %543 = vector.broadcast %525 : vector<1x16xf32> to vector<16x16xf32>
    %544 = arith.mulf %542, %543 : vector<16x16xf32>
    %545 = vector.broadcast %526 : vector<1x16xf32> to vector<16x16xf32>
    %546 = arith.addf %544, %545 : vector<16x16xf32>
    %c0_259 = arith.constant 0 : index
    %c0_260 = arith.constant 0 : index
    %547 = vector.load %arg64[%c0_259, %c0_260] : memref<16x108xf32, #tpu.memory_space<vmem>>, vector<16x108xf32>
    %cst_261 = arith.constant dense<0.000000e+00> : vector<16x108xf32>
    %548 = tpu.matmul %546, %547, %cst_261 {dimension_numbers = #tpu.dot_dimension_numbers<[1], [0], [0], [1], [0, 0, 1, 1], [], []>} : vector<16x16xf32>, vector<16x108xf32>, vector<16x108xf32> -> vector<16x108xf32>
    %c0_262 = arith.constant 0 : index
    %c0_263 = arith.constant 0 : index
    %549 = vector.load %arg65[%c0_262, %c0_263] : memref<1x108xf32, #tpu.memory_space<vmem>>, vector<1x108xf32>
    %550 = vector.broadcast %549 : vector<1x108xf32> to vector<16x108xf32>
    %551 = arith.addf %548, %550 : vector<16x108xf32>
    %c0_264 = arith.constant 0 : index
    %c0_265 = arith.constant 0 : index
    %c0_266 = arith.constant 0 : index
    %552 = vector.load %arg5[%c0_264, %c0_265, %c0_266] : memref<1x16x108xf32, #tpu.memory_space<vmem>>, vector<1x16x108xf32>
    %553 = vector.shape_cast %552 : vector<1x16x108xf32> to vector<16x108xf32>
    %cst_267 = arith.constant dense<0.000000e+00> : vector<16xf32>
    %554 = vector.multi_reduction <add>, %553, %cst_267 [1] : vector<16x108xf32> to vector<16xf32>
    %555 = vector.shape_cast %554 : vector<16xf32> to vector<16x1xf32>
    %cst_268 = arith.constant 1.080000e+02 : f32
    %556 = vector.broadcast %cst_268 : f32 to vector<16x1xf32>
    %557 = arith.divf %555, %556 : vector<16x1xf32>
    %558 = vector.broadcast %557 : vector<16x1xf32> to vector<16x108xf32>
    %559 = arith.subf %553, %558 : vector<16x108xf32>
    %560 = arith.mulf %559, %559 : vector<16x108xf32>
    %cst_269 = arith.constant dense<0.000000e+00> : vector<16xf32>
    %561 = vector.multi_reduction <add>, %560, %cst_269 [1] : vector<16x108xf32> to vector<16xf32>
    %562 = vector.shape_cast %561 : vector<16xf32> to vector<16x1xf32>
    %cst_270 = arith.constant 1.070000e+02 : f32
    %563 = vector.broadcast %cst_270 : f32 to vector<16x1xf32>
    %564 = arith.divf %562, %563 : vector<16x1xf32>
    %565 = vector.broadcast %557 : vector<16x1xf32> to vector<16x108xf32>
    %566 = arith.subf %553, %565 : vector<16x108xf32>
    %cst_271 = arith.constant 9.99999997E-7 : f32
    %567 = vector.broadcast %cst_271 : f32 to vector<16x1xf32>
    %568 = arith.addf %564, %567 : vector<16x1xf32>
    %569 = math.rsqrt %568 : vector<16x1xf32>
    %570 = vector.broadcast %569 : vector<16x1xf32> to vector<16x108xf32>
    %571 = arith.mulf %566, %570 : vector<16x108xf32>
    %572 = arith.subf %551, %571 : vector<16x108xf32>
    %573 = arith.mulf %572, %572 : vector<16x108xf32>
    %cst_272 = arith.constant dense<0.000000e+00> : vector<16xf32>
    %574 = vector.multi_reduction <add>, %573, %cst_272 [1] : vector<16x108xf32> to vector<16xf32>
    %575 = vector.shape_cast %574 : vector<16xf32> to vector<16x1xf32>
    %cst_273 = arith.constant 1.080000e+02 : f32
    %576 = vector.broadcast %cst_273 : f32 to vector<16x1xf32>
    %577 = arith.divf %575, %576 : vector<16x1xf32>
    %578 = arith.mulf %577, %278 : vector<16x1xf32>
    %c0_274 = arith.constant 0 : index
    %c0_275 = arith.constant 0 : index
    %c0_276 = arith.constant 0 : index
    %579 = vector.load %arg66[%c0_274, %c0_275, %c0_276] : memref<1x16x1xf32, #tpu.memory_space<vmem>>, vector<1x16x1xf32>
    %580 = vector.shape_cast %579 : vector<1x16x1xf32> to vector<16x1xf32>
    %581 = vector.shape_cast %578 : vector<16x1xf32> to vector<1x16x1xf32>
    tpu.vector_store %arg66[%c0_274, %c0_275, %c0_276], %581 {strides = array<i32>} : memref<1x16x1xf32, #tpu.memory_space<vmem>>, vector<1x16x1xf32>,
    return
  }
  func.func @transform_0(%arg0: i32) -> (i32, i32, i32) {
    %c0_i32 = arith.constant 0 : i32
    %c0_i32_0 = arith.constant 0 : i32
    %c0_i32_1 = arith.constant 0 : i32
    return %arg0, %c0_i32, %c0_i32_0 : i32, i32, i32
  }
  func.func @transform_1(%arg0: i32) -> (i32, i32, i32) {
    %c0_i32 = arith.constant 0 : i32
    %c0_i32_0 = arith.constant 0 : i32
    %c0_i32_1 = arith.constant 0 : i32
    return %arg0, %c0_i32, %c0_i32_0 : i32, i32, i32
  }
  func.func @transform_2(%arg0: i32) -> (i32, i32, i32) {
    %c0_i32 = arith.constant 0 : i32
    %c0_i32_0 = arith.constant 0 : i32
    %c0_i32_1 = arith.constant 0 : i32
    return %arg0, %c0_i32, %c0_i32_0 : i32, i32, i32
  }
  func.func @transform_3(%arg0: i32) -> (i32, i32, i32) {
    %c0_i32 = arith.constant 0 : i32
    %c0_i32_0 = arith.constant 0 : i32
    %c0_i32_1 = arith.constant 0 : i32
    return %arg0, %c0_i32, %c0_i32_0 : i32, i32, i32
  }
  func.func @transform_4(%arg0: i32) -> (i32, i32, i32) {
    %c0_i32 = arith.constant 0 : i32
    %c0_i32_0 = arith.constant 0 : i32
    %c0_i32_1 = arith.constant 0 : i32
    return %arg0, %c0_i32, %c0_i32_0 : i32, i32, i32
  }
  func.func @transform_5(%arg0: i32) -> (i32, i32) {
    %c0_i32 = arith.constant 0 : i32
    %c0_i32_0 = arith.constant 0 : i32
    %c0_i32_1 = arith.constant 0 : i32
    return %c0_i32, %c0_i32_0 : i32, i32
  }
  func.func @transform_6(%arg0: i32) -> (i32, i32) {
    %c0_i32 = arith.constant 0 : i32
    %c0_i32_0 = arith.constant 0 : i32
    %c0_i32_1 = arith.constant 0 : i32
    return %c0_i32, %c0_i32_0 : i32, i32
  }
  func.func @transform_7(%arg0: i32) -> (i32, i32) {
    %c0_i32 = arith.constant 0 : i32
    %c0_i32_0 = arith.constant 0 : i32
    %c0_i32_1 = arith.constant 0 : i32
    return %c0_i32, %c0_i32_0 : i32, i32
  }
  func.func @transform_8(%arg0: i32) -> (i32, i32) {
    %c0_i32 = arith.constant 0 : i32
    %c0_i32_0 = arith.constant 0 : i32
    %c0_i32_1 = arith.constant 0 : i32
    return %c0_i32, %c0_i32_0 : i32, i32
  }
  func.func @transform_9(%arg0: i32) -> (i32, i32) {
    %c0_i32 = arith.constant 0 : i32
    %c0_i32_0 = arith.constant 0 : i32
    %c0_i32_1 = arith.constant 0 : i32
    return %c0_i32, %c0_i32_0 : i32, i32
  }
  func.func @transform_10(%arg0: i32) -> (i32, i32) {
    %c0_i32 = arith.constant 0 : i32
    %c0_i32_0 = arith.constant 0 : i32
    %c0_i32_1 = arith.constant 0 : i32
    return %c0_i32, %c0_i32_0 : i32, i32
  }
  func.func @transform_11(%arg0: i32) -> (i32, i32) {
    %c0_i32 = arith.constant 0 : i32
    %c0_i32_0 = arith.constant 0 : i32
    %c0_i32_1 = arith.constant 0 : i32
    return %c0_i32, %c0_i32_0 : i32, i32
  }
  func.func @transform_12(%arg0: i32) -> (i32, i32) {
    %c0_i32 = arith.constant 0 : i32
    %c0_i32_0 = arith.constant 0 : i32
    %c0_i32_1 = arith.constant 0 : i32
    return %c0_i32, %c0_i32_0 : i32, i32
  }
  func.func @transform_13(%arg0: i32) -> (i32, i32) {
    %c0_i32 = arith.constant 0 : i32
    %c0_i32_0 = arith.constant 0 : i32
    %c0_i32_1 = arith.constant 0 : i32
    return %c0_i32, %c0_i32_0 : i32, i32
  }
  func.func @transform_14(%arg0: i32) -> (i32, i32) {
    %c0_i32 = arith.constant 0 : i32
    %c0_i32_0 = arith.constant 0 : i32
    %c0_i32_1 = arith.constant 0 : i32
    return %c0_i32, %c0_i32_0 : i32, i32
  }
  func.func @transform_15(%arg0: i32) -> (i32, i32) {
    %c0_i32 = arith.constant 0 : i32
    %c0_i32_0 = arith.constant 0 : i32
    %c0_i32_1 = arith.constant 0 : i32
    return %c0_i32, %c0_i32_0 : i32, i32
  }
  func.func @transform_16(%arg0: i32) -> (i32, i32) {
    %c0_i32 = arith.constant 0 : i32
    %c0_i32_0 = arith.constant 0 : i32
    %c0_i32_1 = arith.constant 0 : i32
    return %c0_i32, %c0_i32_0 : i32, i32
  }
  func.func @transform_17(%arg0: i32) -> (i32, i32) {
    %c0_i32 = arith.constant 0 : i32
    %c0_i32_0 = arith.constant 0 : i32
    %c0_i32_1 = arith.constant 0 : i32
    return %c0_i32, %c0_i32_0 : i32, i32
  }
  func.func @transform_18(%arg0: i32) -> (i32, i32) {
    %c0_i32 = arith.constant 0 : i32
    %c0_i32_0 = arith.constant 0 : i32
    %c0_i32_1 = arith.constant 0 : i32
    return %c0_i32, %c0_i32_0 : i32, i32
  }
  func.func @transform_19(%arg0: i32) -> (i32, i32) {
    %c0_i32 = arith.constant 0 : i32
    %c0_i32_0 = arith.constant 0 : i32
    %c0_i32_1 = arith.constant 0 : i32
    return %c0_i32, %c0_i32_0 : i32, i32
  }
  func.func @transform_20(%arg0: i32) -> (i32, i32) {
    %c0_i32 = arith.constant 0 : i32
    %c0_i32_0 = arith.constant 0 : i32
    %c0_i32_1 = arith.constant 0 : i32
    return %c0_i32, %c0_i32_0 : i32, i32
  }
  func.func @transform_21(%arg0: i32) -> (i32, i32) {
    %c0_i32 = arith.constant 0 : i32
    %c0_i32_0 = arith.constant 0 : i32
    %c0_i32_1 = arith.constant 0 : i32
    return %c0_i32, %c0_i32_0 : i32, i32
  }
  func.func @transform_22(%arg0: i32) -> (i32, i32) {
    %c0_i32 = arith.constant 0 : i32
    %c0_i32_0 = arith.constant 0 : i32
    %c0_i32_1 = arith.constant 0 : i32
    return %c0_i32, %c0_i32_0 : i32, i32
  }
  func.func @transform_23(%arg0: i32) -> (i32, i32) {
    %c0_i32 = arith.constant 0 : i32
    %c0_i32_0 = arith.constant 0 : i32
    %c0_i32_1 = arith.constant 0 : i32
    return %c0_i32, %c0_i32_0 : i32, i32
  }
  func.func @transform_24(%arg0: i32) -> (i32, i32) {
    %c0_i32 = arith.constant 0 : i32
    %c0_i32_0 = arith.constant 0 : i32
    %c0_i32_1 = arith.constant 0 : i32
    return %c0_i32, %c0_i32_0 : i32, i32
  }
  func.func @transform_25(%arg0: i32) -> (i32, i32) {
    %c0_i32 = arith.constant 0 : i32
    %c0_i32_0 = arith.constant 0 : i32
    %c0_i32_1 = arith.constant 0 : i32
    return %c0_i32, %c0_i32_0 : i32, i32
  }
  func.func @transform_26(%arg0: i32) -> (i32, i32) {
    %c0_i32 = arith.constant 0 : i32
    %c0_i32_0 = arith.constant 0 : i32
    %c0_i32_1 = arith.constant 0 : i32
    return %c0_i32, %c0_i32_0 : i32, i32
  }
  func.func @transform_27(%arg0: i32) -> (i32, i32) {
    %c0_i32 = arith.constant 0 : i32
    %c0_i32_0 = arith.constant 0 : i32
    %c0_i32_1 = arith.constant 0 : i32
    return %c0_i32, %c0_i32_0 : i32, i32
  }
  func.func @transform_28(%arg0: i32) -> (i32, i32) {
    %c0_i32 = arith.constant 0 : i32
    %c0_i32_0 = arith.constant 0 : i32
    %c0_i32_1 = arith.constant 0 : i32
    return %c0_i32, %c0_i32_0 : i32, i32
  }
  func.func @transform_29(%arg0: i32) -> (i32, i32) {
    %c0_i32 = arith.constant 0 : i32
    %c0_i32_0 = arith.constant 0 : i32
    %c0_i32_1 = arith.constant 0 : i32
    return %c0_i32, %c0_i32_0 : i32, i32
  }
  func.func @transform_30(%arg0: i32) -> (i32, i32) {
    %c0_i32 = arith.constant 0 : i32
    %c0_i32_0 = arith.constant 0 : i32
    %c0_i32_1 = arith.constant 0 : i32
    return %c0_i32, %c0_i32_0 : i32, i32
  }
  func.func @transform_31(%arg0: i32) -> (i32, i32) {
    %c0_i32 = arith.constant 0 : i32
    %c0_i32_0 = arith.constant 0 : i32
    %c0_i32_1 = arith.constant 0 : i32
    return %c0_i32, %c0_i32_0 : i32, i32
  }
  func.func @transform_32(%arg0: i32) -> (i32, i32) {
    %c0_i32 = arith.constant 0 : i32
    %c0_i32_0 = arith.constant 0 : i32
    %c0_i32_1 = arith.constant 0 : i32
    return %c0_i32, %c0_i32_0 : i32, i32
  }
  func.func @transform_33(%arg0: i32) -> (i32, i32) {
    %c0_i32 = arith.constant 0 : i32
    %c0_i32_0 = arith.constant 0 : i32
    %c0_i32_1 = arith.constant 0 : i32
    return %c0_i32, %c0_i32_0 : i32, i32
  }
  func.func @transform_34(%arg0: i32) -> (i32, i32) {
    %c0_i32 = arith.constant 0 : i32
    %c0_i32_0 = arith.constant 0 : i32
    %c0_i32_1 = arith.constant 0 : i32
    return %c0_i32, %c0_i32_0 : i32, i32
  }
  func.func @transform_35(%arg0: i32) -> (i32, i32) {
    %c0_i32 = arith.constant 0 : i32
    %c0_i32_0 = arith.constant 0 : i32
    %c0_i32_1 = arith.constant 0 : i32
    return %c0_i32, %c0_i32_0 : i32, i32
  }
  func.func @transform_36(%arg0: i32) -> (i32, i32) {
    %c0_i32 = arith.constant 0 : i32
    %c0_i32_0 = arith.constant 0 : i32
    %c0_i32_1 = arith.constant 0 : i32
    return %c0_i32, %c0_i32_0 : i32, i32
  }
  func.func @transform_37(%arg0: i32) -> (i32, i32) {
    %c0_i32 = arith.constant 0 : i32
    %c0_i32_0 = arith.constant 0 : i32
    %c0_i32_1 = arith.constant 0 : i32
    return %c0_i32, %c0_i32_0 : i32, i32
  }
  func.func @transform_38(%arg0: i32) -> (i32, i32) {
    %c0_i32 = arith.constant 0 : i32
    %c0_i32_0 = arith.constant 0 : i32
    %c0_i32_1 = arith.constant 0 : i32
    return %c0_i32, %c0_i32_0 : i32, i32
  }
  func.func @transform_39(%arg0: i32) -> (i32, i32) {
    %c0_i32 = arith.constant 0 : i32
    %c0_i32_0 = arith.constant 0 : i32
    %c0_i32_1 = arith.constant 0 : i32
    return %c0_i32, %c0_i32_0 : i32, i32
  }
  func.func @transform_40(%arg0: i32) -> (i32, i32) {
    %c0_i32 = arith.constant 0 : i32
    %c0_i32_0 = arith.constant 0 : i32
    %c0_i32_1 = arith.constant 0 : i32
    return %c0_i32, %c0_i32_0 : i32, i32
  }
  func.func @transform_41(%arg0: i32) -> (i32, i32) {
    %c0_i32 = arith.constant 0 : i32
    %c0_i32_0 = arith.constant 0 : i32
    %c0_i32_1 = arith.constant 0 : i32
    return %c0_i32, %c0_i32_0 : i32, i32
  }
  func.func @transform_42(%arg0: i32) -> (i32, i32) {
    %c0_i32 = arith.constant 0 : i32
    %c0_i32_0 = arith.constant 0 : i32
    %c0_i32_1 = arith.constant 0 : i32
    return %c0_i32, %c0_i32_0 : i32, i32
  }
  func.func @transform_43(%arg0: i32) -> (i32, i32) {
    %c0_i32 = arith.constant 0 : i32
    %c0_i32_0 = arith.constant 0 : i32
    %c0_i32_1 = arith.constant 0 : i32
    return %c0_i32, %c0_i32_0 : i32, i32
  }
  func.func @transform_44(%arg0: i32) -> (i32, i32) {
    %c0_i32 = arith.constant 0 : i32
    %c0_i32_0 = arith.constant 0 : i32
    %c0_i32_1 = arith.constant 0 : i32
    return %c0_i32, %c0_i32_0 : i32, i32
  }
  func.func @transform_45(%arg0: i32) -> (i32, i32) {
    %c0_i32 = arith.constant 0 : i32
    %c0_i32_0 = arith.constant 0 : i32
    %c0_i32_1 = arith.constant 0 : i32
    return %c0_i32, %c0_i32_0 : i32, i32
  }
  func.func @transform_46(%arg0: i32) -> (i32, i32) {
    %c0_i32 = arith.constant 0 : i32
    %c0_i32_0 = arith.constant 0 : i32
    %c0_i32_1 = arith.constant 0 : i32
    return %c0_i32, %c0_i32_0 : i32, i32
  }
  func.func @transform_47(%arg0: i32) -> (i32, i32) {
    %c0_i32 = arith.constant 0 : i32
    %c0_i32_0 = arith.constant 0 : i32
    %c0_i32_1 = arith.constant 0 : i32
    return %c0_i32, %c0_i32_0 : i32, i32
  }
  func.func @transform_48(%arg0: i32) -> (i32, i32) {
    %c0_i32 = arith.constant 0 : i32
    %c0_i32_0 = arith.constant 0 : i32
    %c0_i32_1 = arith.constant 0 : i32
    return %c0_i32, %c0_i32_0 : i32, i32
  }
  func.func @transform_49(%arg0: i32) -> (i32, i32) {
    %c0_i32 = arith.constant 0 : i32
    %c0_i32_0 = arith.constant 0 : i32
    %c0_i32_1 = arith.constant 0 : i32
    return %c0_i32, %c0_i32_0 : i32, i32
  }
  func.func @transform_50(%arg0: i32) -> (i32, i32) {
    %c0_i32 = arith.constant 0 : i32
    %c0_i32_0 = arith.constant 0 : i32
    %c0_i32_1 = arith.constant 0 : i32
    return %c0_i32, %c0_i32_0 : i32, i32
  }
  func.func @transform_51(%arg0: i32) -> (i32, i32) {
    %c0_i32 = arith.constant 0 : i32
    %c0_i32_0 = arith.constant 0 : i32
    %c0_i32_1 = arith.constant 0 : i32
    return %c0_i32, %c0_i32_0 : i32, i32
  }
  func.func @transform_52(%arg0: i32) -> (i32, i32) {
    %c0_i32 = arith.constant 0 : i32
    %c0_i32_0 = arith.constant 0 : i32
    %c0_i32_1 = arith.constant 0 : i32
    return %c0_i32, %c0_i32_0 : i32, i32
  }
  func.func @transform_53(%arg0: i32) -> (i32, i32) {
    %c0_i32 = arith.constant 0 : i32
    %c0_i32_0 = arith.constant 0 : i32
    %c0_i32_1 = arith.constant 0 : i32
    return %c0_i32, %c0_i32_0 : i32, i32
  }
  func.func @transform_54(%arg0: i32) -> (i32, i32) {
    %c0_i32 = arith.constant 0 : i32
    %c0_i32_0 = arith.constant 0 : i32
    %c0_i32_1 = arith.constant 0 : i32
    return %c0_i32, %c0_i32_0 : i32, i32
  }
  func.func @transform_55(%arg0: i32) -> (i32, i32) {
    %c0_i32 = arith.constant 0 : i32
    %c0_i32_0 = arith.constant 0 : i32
    %c0_i32_1 = arith.constant 0 : i32
    return %c0_i32, %c0_i32_0 : i32, i32
  }
  func.func @transform_56(%arg0: i32) -> (i32, i32) {
    %c0_i32 = arith.constant 0 : i32
    %c0_i32_0 = arith.constant 0 : i32
    %c0_i32_1 = arith.constant 0 : i32
    return %c0_i32, %c0_i32_0 : i32, i32
  }
  func.func @transform_57(%arg0: i32) -> (i32, i32) {
    %c0_i32 = arith.constant 0 : i32
    %c0_i32_0 = arith.constant 0 : i32
    %c0_i32_1 = arith.constant 0 : i32
    return %c0_i32, %c0_i32_0 : i32, i32
  }
  func.func @transform_58(%arg0: i32) -> (i32, i32) {
    %c0_i32 = arith.constant 0 : i32
    %c0_i32_0 = arith.constant 0 : i32
    %c0_i32_1 = arith.constant 0 : i32
    return %c0_i32, %c0_i32_0 : i32, i32
  }
  func.func @transform_59(%arg0: i32) -> (i32, i32) {
    %c0_i32 = arith.constant 0 : i32
    %c0_i32_0 = arith.constant 0 : i32
    %c0_i32_1 = arith.constant 0 : i32
    return %c0_i32, %c0_i32_0 : i32, i32
  }
  func.func @transform_60(%arg0: i32) -> (i32, i32) {
    %c0_i32 = arith.constant 0 : i32
    %c0_i32_0 = arith.constant 0 : i32
    %c0_i32_1 = arith.constant 0 : i32
    return %c0_i32, %c0_i32_0 : i32, i32
  }
  func.func @transform_61(%arg0: i32) -> (i32, i32) {
    %c0_i32 = arith.constant 0 : i32
    %c0_i32_0 = arith.constant 0 : i32
    %c0_i32_1 = arith.constant 0 : i32
    return %c0_i32, %c0_i32_0 : i32, i32
  }
  func.func @transform_62(%arg0: i32) -> (i32, i32) {
    %c0_i32 = arith.constant 0 : i32
    %c0_i32_0 = arith.constant 0 : i32
    %c0_i32_1 = arith.constant 0 : i32
    return %c0_i32, %c0_i32_0 : i32, i32
  }
  func.func @transform_63(%arg0: i32) -> (i32, i32) {
    %c0_i32 = arith.constant 0 : i32
    %c0_i32_0 = arith.constant 0 : i32
    %c0_i32_1 = arith.constant 0 : i32
    return %c0_i32, %c0_i32_0 : i32, i32
  }
  func.func @transform_64(%arg0: i32) -> (i32, i32) {
    %c0_i32 = arith.constant 0 : i32
    %c0_i32_0 = arith.constant 0 : i32
    %c0_i32_1 = arith.constant 0 : i32
    return %c0_i32, %c0_i32_0 : i32, i32
  }
  func.func @transform_65(%arg0: i32) -> (i32, i32, i32) {
    %c0_i32 = arith.constant 0 : i32
    %c0_i32_0 = arith.constant 0 : i32
    %c0_i32_1 = arith.constant 0 : i32
    return %arg0, %c0_i32, %c0_i32_0 : i32, i32, i32
  }
}

</mosaic_0001>

<bundles_post_ra>
// kernel: mae_forward.1
= control target key start
LH: loop header
LB: loop body
LE: loop exit
PB: predicated region body
PF: predicated region fallthrough
CT: control target
= control target key end

     0   :  { %s8538_s6 = smov 1   ;;  %s8539_s10 = smov 2   ;;  %s9737_s0 = inlined_call_operand.smem [shape: u32[66], index: -1, kind: input, shape index: {}] }
   0x1   :  { %s8642_s5 = sld [smem:[%s9737_s0]]   ;;  %s8540_s14 = smov 3  }
   0x2   :  { %s8647_s9 = sld [smem:[%s9737_s0 + %s8538_s6]]   ;;  %s8541_s18 = smov 4  }
   0x3   :  { %s8652_s13 = sld [smem:[%s9737_s0 + %s8539_s10]]   ;;  %s8542_s22 = smov 5  }
   0x4   :  { %s8657_s17 = sld [smem:[%s9737_s0 + %s8540_s14]]   ;;  %s8543_s26 = smov 6  }
   0x5   :  { %s8662_s21 = sld [smem:[%s9737_s0 + %s8541_s18]]   ;;  %s8544_s30 = smov 7  }
   0x6   :  { %s8667_s25 = sld [smem:[%s9737_s0 + %s8542_s22]]   ;;  %s8545_s4 = smov 8  }
   0x7   :  { %9784 = sst [smem:[#allocation40_spill]] %s8642_s5  ;;  %s8546_s10 = smov 9  }
   0x8   :  { %9785 = sst [smem:[#allocation41_spill]] %s8647_s9  ;;  %s8547_s15 = smov 10  }
   0x9   :  { %9786 = sst [smem:[#allocation42_spill]] %s8652_s13  ;;  %s8548_s20 = smov 11  }
   0xa   :  { %9787 = sst [smem:[#allocation43_spill]] %s8657_s17  ;;  %s8550_s1 = smov 13  }
   0xb   :  { %9788 = sst [smem:[#allocation44_spill]] %s8662_s21  ;;  %s8551_s7 = smov 14  }
   0xc   :  { %9789 = sst [smem:[#allocation45_spill]] %s8667_s25  ;;  %s8553_s22 = smov 16  }
   0xd   :  { %s8672_s29 = sld [smem:[%s9737_s0 + %s8543_s26]]   ;;  %s8549_s26 = smov 12  }
   0xe   :  { %s8677_s3 = sld [smem:[%s9737_s0 + %s8544_s30]]   ;;  %s8554_s28 = smov 17  }
   0xf   :  { %s8682_s8 = sld [smem:[%s9737_s0 + %s8545_s4]]  }
  0x10   :  { %s8687_s14 = sld [smem:[%s9737_s0 + %s8546_s10]]  }
  0x11   :  { %s8692_s19 = sld [smem:[%s9737_s0 + %s8547_s15]]   ;;  %s8552_s15 = smov 15  }
  0x12   :  { %s8697_s24 = sld [smem:[%s9737_s0 + %s8548_s20]]  }
  0x13   :  { %9790 = sst [smem:[#allocation46_spill]] %s8672_s29 }
  0x14   :  { %9791 = sst [smem:[#allocation47_spill]] %s8677_s3 }
  0x15   :  { %9792 = sst [smem:[#allocation48_spill]] %s8682_s8 }
  0x16   :  { %9793 = sst [smem:[#allocation49_spill]] %s8687_s14 }
  0x17   :  { %9794 = sst [smem:[#allocation50_spill]] %s8692_s19 }
  0x18   :  { %9795 = sst [smem:[#allocation51_spill]] %s8697_s24 }
  0x19   :  { %s8702_s30 = sld [smem:[%s9737_s0 + %s8549_s26]]  }
  0x1a   :  { %s8707_s6 = sld [smem:[%s9737_s0 + %s8550_s1]]  }
  0x1b   :  { %s8712_s12 = sld [smem:[%s9737_s0 + %s8551_s7]]   ;;  %s8555_s7 = smov 18  }
  0x1c   :  { %s8717_s20 = sld [smem:[%s9737_s0 + %s8552_s15]]   ;;  %s8556_s15 = smov 19  }
  0x1d   :  { %s8722_s27 = sld [smem:[%s9737_s0 + %s8553_s22]]   ;;  %s8557_s22 = smov 20  }
  0x1e   :  { %s8727_s4 = sld [smem:[%s9737_s0 + %s8554_s28]]   ;;  %s8558_s28 = smov 21  }
  0x1f   :  { %9796 = sst [smem:[#allocation52_spill]] %s8702_s30 }
  0x20   :  { %9797 = sst [smem:[#allocation53_spill]] %s8707_s6 }
  0x21   :  { %9798 = sst [smem:[#allocation54_spill]] %s8712_s12 }
  0x22   :  { %9799 = sst [smem:[#allocation55_spill]] %s8717_s20 }
  0x23   :  { %9800 = sst [smem:[#allocation56_spill]] %s8722_s27 }
  0x24   :  { %9801 = sst [smem:[#allocation57_spill]] %s8727_s4 }
  0x25   :  { %s8732_s21 = sld [smem:[%s9737_s0 + %s8555_s7]]   ;;  %s8559_s7 = smov 22  }
  0x26   :  { %s8737_s17 = sld [smem:[%s9737_s0 + %s8556_s15]]   ;;  %s8560_s15 = smov 23  }
  0x27   :  { %s8742_s13 = sld [smem:[%s9737_s0 + %s8557_s22]]   ;;  %s8561_s22 = smov 24  }
  0x28   :  { %s8747_s27 = sld [smem:[%s9737_s0 + %s8558_s28]]   ;;  %s8562_s28 = smov 25  }
  0x2b   :  { %9802 = sst [smem:[#allocation58_spill]] %s8732_s21 }
  0x2c   :  { %9803 = sst [smem:[#allocation59_spill]] %s8737_s17 }
  0x2d   :  { %9804 = sst [smem:[#allocation60_spill]] %s8742_s13 }
  0x2e   :  { %9805 = sst [smem:[#allocation61_spill]] %s8747_s27 }
  0x2f   :  { %s8752_s21 = sld [smem:[%s9737_s0 + %s8559_s7]]   ;;  %s8563_s7 = smov 26  }
  0x30   :  { %s8757_s17 = sld [smem:[%s9737_s0 + %s8560_s15]]   ;;  %s8564_s15 = smov 27  }
  0x31   :  { %s8762_s13 = sld [smem:[%s9737_s0 + %s8561_s22]]   ;;  %s8565_s22 = smov 28  }
  0x32   :  { %s8767_s27 = sld [smem:[%s9737_s0 + %s8562_s28]]   ;;  %s8566_s28 = smov 29  }
  0x35   :  { %9806 = sst [smem:[#allocation62_spill]] %s8752_s21 }
  0x36   :  { %9807 = sst [smem:[#allocation63_spill]] %s8757_s17 }
  0x37   :  { %9808 = sst [smem:[#allocation64_spill]] %s8762_s13 }
  0x38   :  { %9809 = sst [smem:[#allocation65_spill]] %s8767_s27 }
  0x39   :  { %s8772_s21 = sld [smem:[%s9737_s0 + %s8563_s7]]   ;;  %s8567_s7 = smov 30  }
  0x3a   :  { %s8777_s17 = sld [smem:[%s9737_s0 + %s8564_s15]]   ;;  %s8568_s15 = smov 31  }
  0x3b   :  { %s8782_s13 = sld [smem:[%s9737_s0 + %s8565_s22]]   ;;  %s8569_s22 = smov 32  }
  0x3c   :  { %s8787_s27 = sld [smem:[%s9737_s0 + %s8566_s28]]   ;;  %s8570_s28 = smov 33  }
  0x3f   :  { %9810 = sst [smem:[#allocation66_spill]] %s8772_s21 }
  0x40   :  { %9811 = sst [smem:[#allocation67_spill]] %s8777_s17 }
  0x41   :  { %9812 = sst [smem:[#allocation68_spill]] %s8782_s13 }
  0x42   :  { %9813 = sst [smem:[#allocation69_spill]] %s8787_s27 }
  0x43   :  { %s8792_s21 = sld [smem:[%s9737_s0 + %s8567_s7]]   ;;  %s8571_s7 = smov 34  }
  0x44   :  { %s8797_s17 = sld [smem:[%s9737_s0 + %s8568_s15]]   ;;  %s8572_s15 = smov 35  }
  0x45   :  { %s8802_s13 = sld [smem:[%s9737_s0 + %s8569_s22]]   ;;  %s8573_s22 = smov 36  }
  0x46   :  { %s8807_s27 = sld [smem:[%s9737_s0 + %s8570_s28]]   ;;  %s8574_s28 = smov 37  }
  0x49   :  { %9814 = sst [smem:[#allocation70_spill]] %s8792_s21 }
  0x4a   :  { %9815 = sst [smem:[#allocation71_spill]] %s8797_s17 }
  0x4b   :  { %9816 = sst [smem:[#allocation72_spill]] %s8802_s13 }
  0x4c   :  { %9817 = sst [smem:[#allocation73_spill]] %s8807_s27 }
  0x4d   :  { %s8812_s21 = sld [smem:[%s9737_s0 + %s8571_s7]]   ;;  %s8575_s7 = smov 38  }
  0x4e   :  { %s8817_s17 = sld [smem:[%s9737_s0 + %s8572_s15]]   ;;  %s8576_s15 = smov 39  }
  0x4f   :  { %s8822_s13 = sld [smem:[%s9737_s0 + %s8573_s22]]   ;;  %s8577_s22 = smov 40  }
  0x50   :  { %s8827_s27 = sld [smem:[%s9737_s0 + %s8574_s28]]   ;;  %s8578_s28 = smov 41  }
  0x53   :  { %9818 = sst [smem:[#allocation74_spill]] %s8812_s21 }
  0x54   :  { %9819 = sst [smem:[#allocation75_spill]] %s8817_s17 }
  0x55   :  { %9820 = sst [smem:[#allocation76_spill]] %s8822_s13 }
  0x56   :  { %9821 = sst [smem:[#allocation77_spill]] %s8827_s27 }
  0x57   :  { %s8832_s21 = sld [smem:[%s9737_s0 + %s8575_s7]]   ;;  %s8579_s7 = smov 42  }
  0x58   :  { %s8837_s17 = sld [smem:[%s9737_s0 + %s8576_s15]]   ;;  %s8580_s15 = smov 43  }
  0x59   :  { %s8842_s13 = sld [smem:[%s9737_s0 + %s8577_s22]]   ;;  %s8581_s22 = smov 44  }
  0x5a   :  { %s8847_s27 = sld [smem:[%s9737_s0 + %s8578_s28]]   ;;  %s8582_s28 = smov 45  }
  0x5b   :  { %s8852_s12 = sld [smem:[%s9737_s0 + %s8579_s7]]   ;;  %s8583_s7 = smov 46  }
  0x5c   :  { %s8862_s6 = sld [smem:[%s9737_s0 + %s8581_s22]]   ;;  %s8585_s22 = smov 48  }
  0x5d   :  { %s8872_s4 = sld [smem:[%s9737_s0 + %s8583_s7]]   ;;  %s8587_s7 = smov 50  }
  0x5e   :  { %9822 = sst [smem:[#allocation78_spill]] %s8837_s17 }
  0x5f   :  { %s8857_s17 = sld [smem:[%s9737_s0 + %s8580_s15]]   ;;  %s8584_s15 = smov 47  }
  0x60   :  { %9823 = sst [smem:[#allocation79_spill]] %s8847_s27 }
  0x61   :  { %s8867_s27 = sld [smem:[%s9737_s0 + %s8582_s28]]   ;;  %s8586_s28 = smov 49  }
  0x62   :  { %9824 = sst [smem:[#allocation80_spill]] %s8862_s6 }
  0x63   :  { %9826 = sst [smem:[#allocation82_spill]] %s8872_s4 }
  0x64   :  { %s8877_s20 = sld [smem:[%s9737_s0 + %s8584_s15]]   ;;  %s8588_s15 = smov 51  }
  0x65   :  { %s8882_s30 = sld [smem:[%s9737_s0 + %s8585_s22]]   ;;  %s8589_s22 = smov 52  }
  0x66   :  { %s8892_s24 = sld [smem:[%s9737_s0 + %s8587_s7]]   ;;  %s8591_s7 = smov 54  }
  0x67   :  { %9825 = sst [smem:[#allocation81_spill]] %s8867_s27 }
  0x68   :  { %s8887_s27 = sld [smem:[%s9737_s0 + %s8586_s28]]   ;;  %s8590_s28 = smov 53  }
  0x69   :  { %s8902_s19 = sld [smem:[%s9737_s0 + %s8589_s22]]   ;;  %s8593_s22 = smov 56  }
  0x6a   :  { %9827 = sst [smem:[#allocation83_spill]] %s8877_s20 }
  0x6b   :  { %s8897_s20 = sld [smem:[%s9737_s0 + %s8588_s15]]   ;;  %s8592_s15 = smov 55  }
  0x6c   :  { %s8907_s8 = sld [smem:[%s9737_s0 + %s8590_s28]]   ;;  %s8594_s28 = smov 57  }
  0x6d   :  { %s8912_s3 = sld [smem:[%s9737_s0 + %s8591_s7]]   ;;  %s8595_s7 = smov 58  }
  0x6e   :  { %s8922_s14 = sld [smem:[%s9737_s0 + %s8593_s22]]   ;;  %s8597_s22 = smov 60  }
  0x6f   :  { %s8932_s29 = sld [smem:[%s9737_s0 + %s8595_s7]]   ;;  %s8599_s7 = smov 62  }
  0x70   :  { %s8942_s5 = sld [smem:[%s9737_s0 + %s8597_s22]]   ;;  %s8601_s22 = smov 64  }
  0x71   :  { %9828 = sst [smem:[#allocation84_spill]] %s8897_s20 }
  0x72   :  { %9829 = sst [smem:[#allocation85_spill]] %s8907_s8 }
  0x73   :  { %9830 = sst [smem:[#allocation86_spill]] %s8912_s3 }
  0x74   :  { %s8917_s20 = sld [smem:[%s9737_s0 + %s8592_s15]]   ;;  %s8596_s15 = smov 59  }
  0x75   :  { %9831 = sst [smem:[#allocation87_spill]] %s8922_s14 }
  0x76   :  { %s8927_s8 = sld [smem:[%s9737_s0 + %s8594_s28]]   ;;  %s8598_s28 = smov 61  }
  0x77   :  { %s8937_s9 = sld [smem:[%s9737_s0 + %s8596_s15]]   ;;  %s8600_s15 = smov 63  }
  0x78   :  { %9834 = sst [smem:[#allocation90_spill]] %s8942_s5 }
  0x79   :  { %s8952_s25 = sld [smem:[%s9737_s0 + %s8599_s7]]  }
  0x7a   :  { %s8962_s5 = sld [smem:[%s9737_s0 + %s8601_s22]]  }
  0x7c   :  { %9832 = sst [smem:[#allocation88_spill]] %s8927_s8 }
  0x7d   :  { %9833 = sst [smem:[#allocation89_spill]] %s8937_s9 }
  0x7e   :  { %s8947_s8 = sld [smem:[%s9737_s0 + %s8598_s28]]   ;;  %s8602_s28 = smov 65  }
  0x7f   :  { %s8957_s9 = sld [smem:[%s9737_s0 + %s8600_s15]]  }
  0x80   :  { %9836 = sst [smem:[#allocation92_spill]] %s8962_s5 }
  0x81   :  { %s8967_s14 = sld [smem:[%s9737_s0 + %s8602_s28]]  }
  0x84   :  { %9835 = sst [smem:[#allocation91_spill]] %s8947_s8 }
  0x85   :  { %136 = vsyncpa [#allocation3], 0 }
  0x86   :  { %137 = vsyncpa [#allocation5], 0 }
  0x87   :  { %138 = vsyncpa [#allocation8], 0 }
  0x88   :  { %139 = vsyncpa [#allocation11], 0 }
  0x89   :  { %140 = vsyncpa [#allocation14], 0 }
  0x8a   :  { %141 = vsyncpa [#allocation17], 0 }
  0x8b   :  { %142 = vsyncpa [#allocation20], 0 }
  0x8c   :  { %143 = vsyncpa [#allocation23], 0 }
  0x8d   :  { %144 = vsyncpa [#allocation26], 0 }
  0x8e   :  { %145 = vsyncpa [#allocation29], 0  ;;  %s8969_s7 = smov 0  }
  0x8f LB: > { %s9837_s8 = sld [smem:[#allocation91_spill]]  ;;  %s9838_s6 = sld [smem:[#allocation80_spill]]  ;;  %s8536_s7 = sphi %s8969_s7, %s151_s7  }
  0x90   : > { %s9839_s5 = sld [smem:[#allocation92_spill]]  ;;  %s9840_s3 = sld [smem:[#allocation86_spill]] }
  0x91   : > { %s9841_s4 = sld [smem:[#allocation82_spill]]  ;;  %s8603_s0 = smov [#allocation4]  }
  0x92   : > { %s1698_s10 = sshll.u32 %s8603_s0, 4  ;;  %s8975_s11 = sadd.s32 4294967295, %s8536_s7   ;;  %s8980_s10 = int_to_ptr.vmem [resolvable:$true] %s1698_s10 }
  0x93   : > { %p6635_p0 = scmp.ge.s32.totalorder %s8536_s7, 1  ;;  %p1572_p1 = scmp.lt.s32.totalorder %s8536_s7, 3 }
  0x94   : > { %p9759_p2 = scmp.eq.s32.totalorder %s8975_s11, 0  ;;  %s8604_s16 = smov [#allocation7]  }
  0x95   : > { %p8982_p3 = pnand %p6635_p0, %p1572_p1  ;;  %s1723_s18 = sshll.u32 %s8604_s16, 4  ;;  %s8988_s18 = int_to_ptr.vmem [resolvable:$true] %s1723_s18 }
  0x96   : > { %s8605_s22 = smov [#allocation10]   ;;  %s8606_s28 = smov [#allocation13]  }
  0x97   : > { %s9842_s15 = scalar_select %p8982_p3, 1, 0 }
  0x98   : > { %p7653_p4 = pneg %p8982_p3  ;;  %s1748_s23 = sshll.u32 %s8605_s22, 4  ;;  %s8996_s23 = int_to_ptr.vmem [resolvable:$true] %s1748_s23 }
  0x99   : > { %s1773_s1 = sshll.u32 %s8606_s28, 4  ;;  %s7986_s2 = scalar_lea.hbm %s8842_s13, 16  ;;  %s8998_s1 = int_to_ptr.vmem [resolvable:$true] %s1773_s1 }
  0x9a   : > { %p8992_p5 = pnand %p9759_p2, %p7653_p4  ;;  %p7987_p6 = scmp.ne.s32.totalorder %s8842_s13, %s7986_s2 }
  0x9b   : > { %p7993_p10 = scmp.lt.u32.totalorder %s7986_s2, %s8842_s13 }
  0x9c   : > { %p9004_p7 = pneg %p8992_p5 }
  0x9e   : > { %p7989_p8 = pnand %p9004_p7, %p7987_p6 }
  0xa0   : > { %p7990_p9 = pneg %p7989_p8 }
  0xa2   : > { %p7995_p11 = pnand %p7993_p10, %p7990_p9 }
  0xa4   : > { %7998 = shalt.err (!%p7995_p11)
}
  0xa5   : > { %s7999_s16 = scalar_lea.vmem %s8980_s10, 16  ;;  %s8006_s22 = scalar_lea.vmem %s8980_s10, 32 }
  0xa6   : > { %p8000_p12 = scmp.ne.s32.totalorder %s8980_s10, %s7999_s16  ;;  %p8007_p1 = scmp.lt.s32.totalorder %s8980_s10, %s8980_s10 }
  0xa7   : > { %p8008_p4 = scmp.lt.s32.totalorder %s8006_s22, %s7999_s16 }
  0xa8   : > { %p8002_p13 = pnand %p8000_p12, %p9004_p7 }
  0xa9   : > { %p8009_p2 = por %p8008_p4, %p8007_p1 }
  0xaa   : > { %p8003_p0 = pneg %p8002_p13 }
  0xac   : > { %p8010_p6 = pnand %p8009_p2, %p8003_p0 }
  0xae   : > { %8013 = shalt.err (!%p8010_p6)
}
  0xaf   : > { %7659 = dma.hbm_to_vmem [thread:$0]  (!%p8992_p5), %s8842_s13, 16, %s8980_s10, [#allocation5]  }
  0xb0   : > { %s8014_s28 = scalar_lea.hbm %s8857_s17, 16 }
  0xb1   : > { %p8015_p8 = scmp.ne.s32.totalorder %s8857_s17, %s8014_s28  ;;  %p8021_p11 = scmp.lt.u32.totalorder %s8014_s28, %s8857_s17 }
  0xb3   : > { %p8017_p9 = pnand %p8015_p8, %p9004_p7 }
  0xb5   : > { %p8018_p10 = pneg %p8017_p9 }
  0xb7   : > { %p8023_p12 = pnand %p8021_p11, %p8018_p10 }
  0xb9   : > { %8026 = shalt.err (!%p8023_p12)
}
  0xba   : > { %s8027_s2 = scalar_lea.vmem %s8988_s18, 16  ;;  %s8034_s16 = scalar_lea.vmem %s8988_s18, 32 }
  0xbb   : > { %p8028_p2 = scmp.ne.s32.totalorder %s8988_s18, %s8027_s2  ;;  %p8035_p1 = scmp.lt.s32.totalorder %s8988_s18, %s8988_s18 }
  0xbc   : > { %p8036_p4 = scmp.lt.s32.totalorder %s8034_s16, %s8027_s2 }
  0xbd   : > { %p8030_p13 = pnand %p8028_p2, %p9004_p7 }
  0xbe   : > { %p8037_p6 = por %p8036_p4, %p8035_p1 }
  0xbf   : > { %p8031_p0 = pneg %p8030_p13 }
  0xc1   : > { %p8038_p8 = pnand %p8037_p6, %p8031_p0 }
  0xc3   : > { %8041 = shalt.err (!%p8038_p8)
}
  0xc4   : > { %7665 = dma.hbm_to_vmem [thread:$0]  (!%p8992_p5), %s8857_s17, 16, %s8988_s18, [#allocation8]  }
  0xc5   : > { %s8042_s10 = scalar_lea.hbm %s9841_s4, 16 }
  0xc6   : > { %p8043_p9 = scmp.ne.s32.totalorder %s9841_s4, %s8042_s10  ;;  %p8049_p12 = scmp.lt.u32.totalorder %s8042_s10, %s9841_s4 }
  0xc8   : > { %p8045_p10 = pnand %p8043_p9, %p9004_p7 }
  0xca   : > { %p8046_p11 = pneg %p8045_p10 }
  0xcc   : > { %p8051_p2 = pnand %p8049_p12, %p8046_p11 }
  0xce   : > { %8054 = shalt.err (!%p8051_p2)
}
  0xcf   : > { %s8055_s22 = scalar_lea.vmem %s8996_s23, 16  ;;  %s8062_s28 = scalar_lea.vmem %s8996_s23, 32 }
  0xd0   : > { %p8056_p13 = scmp.ne.s32.totalorder %s8996_s23, %s8055_s22  ;;  %p8063_p4 = scmp.lt.s32.totalorder %s8996_s23, %s8996_s23 }
  0xd1   : > { %p8064_p6 = scmp.lt.s32.totalorder %s8062_s28, %s8055_s22 }
  0xd2   : > { %p8058_p0 = pnand %p8056_p13, %p9004_p7 }
  0xd3   : > { %p8065_p8 = por %p8064_p6, %p8063_p4 }
  0xd4   : > { %p8059_p1 = pneg %p8058_p0 }
  0xd6   : > { %p8066_p9 = pnand %p8065_p8, %p8059_p1 }
  0xd8   : > { %8069 = shalt.err (!%p8066_p9)
}
  0xd9   : > { %7671 = dma.hbm_to_vmem [thread:$0]  (!%p8992_p5), %s9841_s4, 16, %s8996_s23, [#allocation11]  }
  0xda   : > { %s8070_s18 = scalar_lea.hbm %s8887_s27, 16 }
  0xdb   : > { %p8071_p10 = scmp.ne.s32.totalorder %s8887_s27, %s8070_s18  ;;  %p8077_p2 = scmp.lt.u32.totalorder %s8070_s18, %s8887_s27 }
  0xdd   : > { %p8073_p11 = pnand %p8071_p10, %p9004_p7 }
  0xdf   : > { %p8074_p12 = pneg %p8073_p11 }
  0xe1   : > { %p8079_p13 = pnand %p8077_p2, %p8074_p12 }
  0xe3   : > { %8082 = shalt.err (!%p8079_p13)
}
  0xe4   : > { %s8083_s2 = scalar_lea.vmem %s8998_s1, 16  ;;  %s8090_s16 = scalar_lea.vmem %s8998_s1, 32 }
  0xe5   : > { %p8084_p0 = scmp.ne.s32.totalorder %s8998_s1, %s8083_s2  ;;  %p8091_p6 = scmp.lt.s32.totalorder %s8998_s1, %s8998_s1 }
  0xe6   : > { %p8092_p8 = scmp.lt.s32.totalorder %s8090_s16, %s8083_s2 }
  0xe7   : > { %p8086_p1 = pnand %p8084_p0, %p9004_p7 }
  0xe8   : > { %p8093_p9 = por %p8092_p8, %p8091_p6 }
  0xe9   : > { %p8087_p4 = pneg %p8086_p1 }
  0xeb   : > { %p8094_p10 = pnand %p8093_p9, %p8087_p4 }
  0xed   : > { %8097 = shalt.err (!%p8094_p10)
}
  0xee   : > { %7677 = dma.hbm_to_vmem [thread:$0]  (!%p8992_p5), %s8887_s27, 16, %s8998_s1, [#allocation14]  }
  0xef   : > { %s8607_s23 = smov [#allocation16]   ;;  %s8608_s22 = smov [#allocation19]  }
  0xf0   : > { %s1798_s10 = sshll.u32 %s8607_s23, 4  ;;  %s1823_s28 = sshll.u32 %s8608_s22, 4  ;;  %s1799_s10 = int_to_ptr.vmem [resolvable:$true] %s1798_s10  ;;  %s1824_s28 = int_to_ptr.vmem [resolvable:$true] %s1823_s28 }
  0xf1   : > { %s8098_s18 = scalar_lea.hbm %s8902_s19, 16 }
  0xf2   : > { %p8099_p11 = scmp.ne.s32.totalorder %s8902_s19, %s8098_s18  ;;  %p8105_p13 = scmp.lt.u32.totalorder %s8098_s18, %s8902_s19 }
  0xf4   : > { %p8101_p12 = pnand %p8099_p11, %p9004_p7 }
  0xf6   : > { %p8102_p2 = pneg %p8101_p12 }
  0xf8   : > { %p8107_p0 = pnand %p8105_p13, %p8102_p2 }
  0xfa   : > { %8110 = shalt.err (!%p8107_p0)
}
  0xfb   : > { %s8111_s2 = scalar_lea.vmem %s1799_s10, 16  ;;  %s8118_s1 = scalar_lea.vmem %s1799_s10, 32 }
  0xfc   : > { %p8112_p1 = scmp.ne.s32.totalorder %s1799_s10, %s8111_s2  ;;  %p8119_p8 = scmp.lt.s32.totalorder %s1799_s10, %s1799_s10 }
  0xfd   : > { %p8120_p9 = scmp.lt.s32.totalorder %s8118_s1, %s8111_s2 }
  0xfe   : > { %p8114_p4 = pnand %p8112_p1, %p9004_p7 }
  0xff   : > { %p8121_p10 = por %p8120_p9, %p8119_p8 }
 0x100   : > { %p8115_p6 = pneg %p8114_p4 }
 0x102   : > { %p8122_p3 = pnand %p8121_p10, %p8115_p6 }
 0x104   : > { %8125 = shalt.err (!%p8122_p3)
}
 0x105   : > { %7683 = dma.hbm_to_vmem [thread:$0]  (!%p8992_p5), %s8902_s19, 16, %s1799_s10, [#allocation17]  }
 0x106   : > { %s8126_s16 = scalar_lea.hbm %s8917_s20, 16 }
 0x107   : > { %p8127_p11 = scmp.ne.s32.totalorder %s8917_s20, %s8126_s16  ;;  %p8133_p13 = scmp.lt.u32.totalorder %s8126_s16, %s8917_s20 }
 0x109   : > { %p8129_p12 = pnand %p8127_p11, %p9004_p7 }
 0x10b   : > { %p8130_p2 = pneg %p8129_p12 }
 0x10d   : > { %p8135_p0 = pnand %p8133_p13, %p8130_p2 }
 0x10f   : > { %8138 = shalt.err (!%p8135_p0)
}
 0x110   : > { %s8139_s23 = scalar_lea.vmem %s1824_s28, 16  ;;  %s8146_s22 = scalar_lea.vmem %s1824_s28, 32 }
 0x111   : > { %p8140_p3 = scmp.ne.s32.totalorder %s1824_s28, %s8139_s23  ;;  %p8147_p6 = scmp.lt.s32.totalorder %s1824_s28, %s1824_s28 }
 0x112   : > { %p8148_p8 = scmp.lt.s32.totalorder %s8146_s22, %s8139_s23 }
 0x113   : > { %p8142_p1 = pnand %p8140_p3, %p9004_p7 }
 0x114   : > { %p8149_p9 = por %p8148_p8, %p8147_p6 }
 0x115   : > { %p8143_p4 = pneg %p8142_p1 }
 0x117   : > { %p8150_p10 = pnand %p8149_p9, %p8143_p4 }
 0x119   : > { %8153 = shalt.err (!%p8150_p10)
}
 0x11a   : > { %7689 = dma.hbm_to_vmem [thread:$0]  (!%p8992_p5), %s8917_s20, 16, %s1824_s28, [#allocation20]  }
 0x11b   : > { %s8609_s10 = smov [#allocation22]   ;;  %s8610_s2 = smov [#allocation25]  }
 0x11c   : > { %s1848_s18 = sshll.u32 %s8609_s10, 4  ;;  %s1873_s1 = sshll.u32 %s8610_s2, 4  ;;  %s1849_s18 = int_to_ptr.vmem [resolvable:$true] %s1848_s18  ;;  %s1874_s1 = int_to_ptr.vmem [resolvable:$true] %s1873_s1 }
 0x11d   : > { %s8154_s16 = scalar_lea.hbm %s8932_s29, 16 }
 0x11e   : > { %p8155_p11 = scmp.ne.s32.totalorder %s8932_s29, %s8154_s16  ;;  %p8161_p13 = scmp.lt.u32.totalorder %s8154_s16, %s8932_s29 }
 0x120   : > { %p8157_p12 = pnand %p8155_p11, %p9004_p7 }
 0x122   : > { %p8158_p2 = pneg %p8157_p12 }
 0x124   : > { %p8163_p0 = pnand %p8161_p13, %p8158_p2 }
 0x126   : > { %8166 = shalt.err (!%p8163_p0)
}
 0x127   : > { %s8167_s23 = scalar_lea.vmem %s1849_s18, 16  ;;  %s8174_s28 = scalar_lea.vmem %s1849_s18, 32 }
 0x128   : > { %p8168_p3 = scmp.ne.s32.totalorder %s1849_s18, %s8167_s23  ;;  %p8175_p6 = scmp.lt.s32.totalorder %s1849_s18, %s1849_s18 }
 0x129   : > { %p8176_p8 = scmp.lt.s32.totalorder %s8174_s28, %s8167_s23 }
 0x12a   : > { %p8170_p1 = pnand %p8168_p3, %p9004_p7 }
 0x12b   : > { %p8177_p9 = por %p8176_p8, %p8175_p6 }
 0x12c   : > { %p8171_p4 = pneg %p8170_p1 }
 0x12e   : > { %p8178_p10 = pnand %p8177_p9, %p8171_p4 }
 0x130   : > { %8181 = shalt.err (!%p8178_p10)
}
 0x131   : > { %7695 = dma.hbm_to_vmem [thread:$0]  (!%p8992_p5), %s8932_s29, 16, %s1849_s18, [#allocation23]  }
 0x132   : > { %s8182_s22 = scalar_lea.hbm %s9837_s8, 16 }
 0x133   : > { %p8183_p11 = scmp.ne.s32.totalorder %s9837_s8, %s8182_s22  ;;  %p8189_p13 = scmp.lt.u32.totalorder %s8182_s22, %s9837_s8 }
 0x135   : > { %p8185_p12 = pnand %p8183_p11, %p9004_p7 }
 0x137   : > { %p8186_p2 = pneg %p8185_p12 }
 0x139   : > { %p8191_p0 = pnand %p8189_p13, %p8186_p2 }
 0x13b   : > { %8194 = shalt.err (!%p8191_p0)
}
 0x13c   : > { %s8195_s10 = scalar_lea.vmem %s1874_s1, 16  ;;  %s8202_s2 = scalar_lea.vmem %s1874_s1, 32 }
 0x13d   : > { %p8196_p3 = scmp.ne.s32.totalorder %s1874_s1, %s8195_s10  ;;  %p8203_p6 = scmp.lt.s32.totalorder %s1874_s1, %s1874_s1 }
 0x13e   : > { %p8204_p8 = scmp.lt.s32.totalorder %s8202_s2, %s8195_s10 }
 0x13f   : > { %p8198_p1 = pnand %p8196_p3, %p9004_p7 }
 0x140   : > { %p8205_p9 = por %p8204_p8, %p8203_p6 }
 0x141   : > { %p8199_p4 = pneg %p8198_p1 }
 0x143   : > { %p8206_p10 = pnand %p8205_p9, %p8199_p4 }
 0x145   : > { %8209 = shalt.err (!%p8206_p10)
}
 0x146   : > { %7701 = dma.hbm_to_vmem [thread:$0]  (!%p8992_p5), %s9837_s8, 16, %s1874_s1, [#allocation26]  }
 0x147   : > { %s8611_s18 = smov [#allocation2]   ;;  %s8612_s23 = smov [#allocation6]  }
 0x148   : > { %s1684_s16 = sshll.u32 %s8611_s18, 4  ;;  %s1712_s28 = sshll.u32 %s8612_s23, 4  ;;  %s1685_s16 = int_to_ptr.vmem [resolvable:$true] %s1684_s16  ;;  %s1713_s28 = int_to_ptr.vmem [resolvable:$true] %s1712_s28 }
 0x149   : > { %s8210_s22 = scalar_lea.hbm %s8832_s21, 16 }
 0x14a   : > { %p8211_p11 = scmp.ne.s32.totalorder %s8832_s21, %s8210_s22  ;;  %p8217_p13 = scmp.lt.u32.totalorder %s8210_s22, %s8832_s21 }
 0x14c   : > { %p8213_p12 = pnand %p8211_p11, %p9004_p7 }
 0x14e   : > { %p8214_p2 = pneg %p8213_p12 }
 0x150   : > { %p8219_p0 = pnand %p8217_p13, %p8214_p2 }
 0x152   : > { %8222 = shalt.err (!%p8219_p0)
}
 0x153   : > { %s8223_s10 = scalar_lea.vmem %s1685_s16, 16  ;;  %s8230_s1 = scalar_lea.vmem %s1685_s16, 32 }
 0x154   : > { %p8224_p3 = scmp.ne.s32.totalorder %s1685_s16, %s8223_s10  ;;  %p8231_p6 = scmp.lt.s32.totalorder %s1685_s16, %s1685_s16 }
 0x155   : > { %p8232_p8 = scmp.lt.s32.totalorder %s8230_s1, %s8223_s10 }
 0x156   : > { %p8226_p1 = pnand %p8224_p3, %p9004_p7 }
 0x157   : > { %p8233_p9 = por %p8232_p8, %p8231_p6 }
 0x158   : > { %p8227_p4 = pneg %p8226_p1 }
 0x15a   : > { %p8234_p10 = pnand %p8233_p9, %p8227_p4 }
 0x15c   : > { %8237 = shalt.err (!%p8234_p10)
}
 0x15d   : > { %7656 = dma.hbm_to_vmem [thread:$0]  (!%p8992_p5), %s8832_s21, 16, %s1685_s16, [#allocation3]  }
 0x15e   : > { %s8238_s2 = scalar_lea.hbm %s8852_s12, 16 }
 0x15f   : > { %p8239_p11 = scmp.ne.s32.totalorder %s8852_s12, %s8238_s2  ;;  %p8245_p13 = scmp.lt.u32.totalorder %s8238_s2, %s8852_s12 }
 0x161   : > { %p8241_p12 = pnand %p8239_p11, %p9004_p7 }
 0x163   : > { %p8242_p2 = pneg %p8241_p12 }
 0x165   : > { %p8247_p0 = pnand %p8245_p13, %p8242_p2 }
 0x167   : > { %8250 = shalt.err (!%p8247_p0)
}
 0x168   : > { %s8251_s18 = scalar_lea.vmem %s1713_s28, 16  ;;  %s8258_s23 = scalar_lea.vmem %s1713_s28, 32 }
 0x169   : > { %p8252_p3 = scmp.ne.s32.totalorder %s1713_s28, %s8251_s18  ;;  %p8259_p6 = scmp.lt.s32.totalorder %s1713_s28, %s1713_s28 }
 0x16a   : > { %p8260_p8 = scmp.lt.s32.totalorder %s8258_s23, %s8251_s18 }
 0x16b   : > { %p8254_p1 = pnand %p8252_p3, %p9004_p7 }
 0x16c   : > { %p8261_p9 = por %p8260_p8, %p8259_p6 }
 0x16d   : > { %p8255_p4 = pneg %p8254_p1 }
 0x16f   : > { %p8262_p10 = pnand %p8261_p9, %p8255_p4 }
 0x171   : > { %8265 = shalt.err (!%p8262_p10)
}
 0x172   : > { %7662 = dma.hbm_to_vmem [thread:$0]  (!%p8992_p5), %s8852_s12, 16, %s1713_s28, [#allocation5]  }
 0x173   : > { %s8613_s16 = smov [#allocation9]   ;;  %s8614_s10 = smov [#allocation12]  }
 0x174   : > { %s1734_s22 = sshll.u32 %s8613_s16, 4  ;;  %s1762_s1 = sshll.u32 %s8614_s10, 4  ;;  %s1735_s22 = int_to_ptr.vmem [resolvable:$true] %s1734_s22  ;;  %s1763_s1 = int_to_ptr.vmem [resolvable:$true] %s1762_s1 }
 0x175   : > { %s8266_s2 = scalar_lea.hbm %s9838_s6, 16 }
 0x176   : > { %p8267_p11 = scmp.ne.s32.totalorder %s9838_s6, %s8266_s2  ;;  %p8273_p13 = scmp.lt.u32.totalorder %s8266_s2, %s9838_s6 }
 0x178   : > { %p8269_p12 = pnand %p8267_p11, %p9004_p7 }
 0x17a   : > { %p8270_p2 = pneg %p8269_p12 }
 0x17c   : > { %p8275_p0 = pnand %p8273_p13, %p8270_p2 }
 0x17e   : > { %8278 = shalt.err (!%p8275_p0)
}
 0x17f   : > { %s8279_s18 = scalar_lea.vmem %s1735_s22, 16  ;;  %s8286_s28 = scalar_lea.vmem %s1735_s22, 32 }
 0x180   : > { %p8280_p3 = scmp.ne.s32.totalorder %s1735_s22, %s8279_s18  ;;  %p8287_p6 = scmp.lt.s32.totalorder %s1735_s22, %s1735_s22 }
 0x181   : > { %p8288_p8 = scmp.lt.s32.totalorder %s8286_s28, %s8279_s18 }
 0x182   : > { %p8282_p1 = pnand %p8280_p3, %p9004_p7 }
 0x183   : > { %p8289_p9 = por %p8288_p8, %p8287_p6 }
 0x184   : > { %p8283_p4 = pneg %p8282_p1 }
 0x186   : > { %p8290_p10 = pnand %p8289_p9, %p8283_p4 }
 0x188   : > { %8293 = shalt.err (!%p8290_p10)
}
 0x189   : > { %7668 = dma.hbm_to_vmem [thread:$0]  (!%p8992_p5), %s9838_s6, 16, %s1735_s22, [#allocation8]  }
 0x18a   : > { %s8294_s23 = scalar_lea.hbm %s8882_s30, 16 }
 0x18b   : > { %p8295_p11 = scmp.ne.s32.totalorder %s8882_s30, %s8294_s23  ;;  %p8301_p13 = scmp.lt.u32.totalorder %s8294_s23, %s8882_s30 }
 0x18d   : > { %p8297_p12 = pnand %p8295_p11, %p9004_p7 }
 0x18f   : > { %p8298_p2 = pneg %p8297_p12 }
 0x191   : > { %p8303_p0 = pnand %p8301_p13, %p8298_p2 }
 0x193   : > { %8306 = shalt.err (!%p8303_p0)
}
 0x194   : > { %s8307_s16 = scalar_lea.vmem %s1763_s1, 16  ;;  %s8314_s10 = scalar_lea.vmem %s1763_s1, 32 }
 0x195   : > { %p8308_p3 = scmp.ne.s32.totalorder %s1763_s1, %s8307_s16  ;;  %p8315_p6 = scmp.lt.s32.totalorder %s1763_s1, %s1763_s1 }
 0x196   : > { %p8316_p8 = scmp.lt.s32.totalorder %s8314_s10, %s8307_s16 }
 0x197   : > { %p8310_p1 = pnand %p8308_p3, %p9004_p7 }
 0x198   : > { %p8317_p9 = por %p8316_p8, %p8315_p6 }
 0x199   : > { %p8311_p4 = pneg %p8310_p1 }
 0x19b   : > { %p8318_p10 = pnand %p8317_p9, %p8311_p4 }
 0x19d   : > { %8321 = shalt.err (!%p8318_p10)
}
 0x19e   : > { %7674 = dma.hbm_to_vmem [thread:$0]  (!%p8992_p5), %s8882_s30, 16, %s1763_s1, [#allocation11]  }
 0x19f   : > { %s8615_s22 = smov [#allocation15]   ;;  %s8616_s18 = smov [#allocation18]  }
 0x1a0   : > { %s1784_s2 = sshll.u32 %s8615_s22, 4  ;;  %s1812_s28 = sshll.u32 %s8616_s18, 4  ;;  %s1785_s2 = int_to_ptr.vmem [resolvable:$true] %s1784_s2  ;;  %s1813_s28 = int_to_ptr.vmem [resolvable:$true] %s1812_s28 }
 0x1a1   : > { %s8322_s23 = scalar_lea.hbm %s8892_s24, 16 }
 0x1a2   : > { %p8323_p11 = scmp.ne.s32.totalorder %s8892_s24, %s8322_s23  ;;  %p8329_p13 = scmp.lt.u32.totalorder %s8322_s23, %s8892_s24 }
 0x1a4   : > { %p8325_p12 = pnand %p8323_p11, %p9004_p7 }
 0x1a6   : > { %p8326_p2 = pneg %p8325_p12 }
 0x1a8   : > { %p8331_p0 = pnand %p8329_p13, %p8326_p2 }
 0x1aa   : > { %8334 = shalt.err (!%p8331_p0)
}
 0x1ab   : > { %s8335_s16 = scalar_lea.vmem %s1785_s2, 16  ;;  %s8342_s1 = scalar_lea.vmem %s1785_s2, 32 }
 0x1ac   : > { %p8336_p3 = scmp.ne.s32.totalorder %s1785_s2, %s8335_s16  ;;  %p8343_p6 = scmp.lt.s32.totalorder %s1785_s2, %s1785_s2 }
 0x1ad   : > { %p8344_p8 = scmp.lt.s32.totalorder %s8342_s1, %s8335_s16 }
 0x1ae   : > { %p8338_p1 = pnand %p8336_p3, %p9004_p7 }
 0x1af   : > { %p8345_p9 = por %p8344_p8, %p8343_p6 }
 0x1b0   : > { %p8339_p4 = pneg %p8338_p1 }
 0x1b2   : > { %p8346_p10 = pnand %p8345_p9, %p8339_p4 }
 0x1b4   : > { %8349 = shalt.err (!%p8346_p10)
}
 0x1b5   : > { %7680 = dma.hbm_to_vmem [thread:$0]  (!%p8992_p5), %s8892_s24, 16, %s1785_s2, [#allocation14]  }
 0x1b6   : > { %s8350_s10 = scalar_lea.hbm %s9840_s3, 16 }
 0x1b7   : > { %p8351_p11 = scmp.ne.s32.totalorder %s9840_s3, %s8350_s10  ;;  %p8357_p13 = scmp.lt.u32.totalorder %s8350_s10, %s9840_s3 }
 0x1b9   : > { %p8353_p12 = pnand %p8351_p11, %p9004_p7 }
 0x1bb   : > { %p8354_p2 = pneg %p8353_p12 }
 0x1bd   : > { %p8359_p0 = pnand %p8357_p13, %p8354_p2 }
 0x1bf   : > { %8362 = shalt.err (!%p8359_p0)
}
 0x1c0   : > { %s8363_s22 = scalar_lea.vmem %s1813_s28, 16  ;;  %s8370_s18 = scalar_lea.vmem %s1813_s28, 32 }
 0x1c1   : > { %p8364_p3 = scmp.ne.s32.totalorder %s1813_s28, %s8363_s22  ;;  %p8371_p6 = scmp.lt.s32.totalorder %s1813_s28, %s1813_s28 }
 0x1c2   : > { %p8372_p8 = scmp.lt.s32.totalorder %s8370_s18, %s8363_s22 }
 0x1c3   : > { %p8366_p1 = pnand %p8364_p3, %p9004_p7 }
 0x1c4   : > { %p8373_p9 = por %p8372_p8, %p8371_p6 }
 0x1c5   : > { %p8367_p4 = pneg %p8366_p1 }
 0x1c7   : > { %p8374_p10 = pnand %p8373_p9, %p8367_p4 }
 0x1c9   : > { %8377 = shalt.err (!%p8374_p10)
}
 0x1ca   : > { %s9845_s2 = sld [smem:[#allocation87_spill]]  ;;  %s8617_s23 = smov [#allocation21]  }
 0x1cb   : > { %7686 = dma.hbm_to_vmem [thread:$0]  (!%p8992_p5), %s9840_s3, 16, %s1813_s28, [#allocation17]  }
 0x1cc   : > { %s1834_s16 = sshll.u32 %s8617_s23, 4  ;;  %s8618_s1 = smov [#allocation24]   ;;  %s1835_s16 = int_to_ptr.vmem [resolvable:$true] %s1834_s16 }
 0x1cd   : > { %s1862_s10 = sshll.u32 %s8618_s1, 4  ;;  %s1863_s10 = int_to_ptr.vmem [resolvable:$true] %s1862_s10 }
 0x1d0   : > { %s8378_s4 = scalar_lea.hbm %s9845_s2, 16 }
 0x1d1   : > { %p8379_p11 = scmp.ne.s32.totalorder %s9845_s2, %s8378_s4  ;;  %p8385_p13 = scmp.lt.u32.totalorder %s8378_s4, %s9845_s2 }
 0x1d3   : > { %p8381_p12 = pnand %p8379_p11, %p9004_p7 }
 0x1d5   : > { %p8382_p2 = pneg %p8381_p12 }
 0x1d7   : > { %p8387_p0 = pnand %p8385_p13, %p8382_p2 }
 0x1d9   : > { %8390 = shalt.err (!%p8387_p0)
}
 0x1da   : > { %s8391_s22 = scalar_lea.vmem %s1835_s16, 16  ;;  %s8398_s28 = scalar_lea.vmem %s1835_s16, 32 }
 0x1db   : > { %p8392_p3 = scmp.ne.s32.totalorder %s1835_s16, %s8391_s22  ;;  %p8399_p6 = scmp.lt.s32.totalorder %s1835_s16, %s1835_s16 }
 0x1dc   : > { %p8400_p8 = scmp.lt.s32.totalorder %s8398_s28, %s8391_s22 }
 0x1dd   : > { %p8394_p1 = pnand %p8392_p3, %p9004_p7 }
 0x1de   : > { %p8401_p9 = por %p8400_p8, %p8399_p6 }
 0x1df   : > { %p8395_p4 = pneg %p8394_p1 }
 0x1e1   : > { %p8402_p10 = pnand %p8401_p9, %p8395_p4 }
 0x1e3   : > { %8405 = shalt.err (!%p8402_p10)
}
 0x1e4   : > { %s9846_s18 = sld [smem:[#allocation90_spill]] }
 0x1e5   : > { %7692 = dma.hbm_to_vmem [thread:$0]  (!%p8992_p5), %s9845_s2, 16, %s1835_s16, [#allocation20]  }
 0x1ea   : > { %s8406_s4 = scalar_lea.hbm %s9846_s18, 16 }
 0x1eb   : > { %p8407_p11 = scmp.ne.s32.totalorder %s9846_s18, %s8406_s4  ;;  %p8413_p13 = scmp.lt.u32.totalorder %s8406_s4, %s9846_s18 }
 0x1ed   : > { %p8409_p12 = pnand %p8407_p11, %p9004_p7 }
 0x1ef   : > { %p8410_p2 = pneg %p8409_p12 }
 0x1f1   : > { %p8415_p0 = pnand %p8413_p13, %p8410_p2 }
 0x1f3   : > { %8418 = shalt.err (!%p8415_p0)
}
 0x1f4   : > { %s8419_s23 = scalar_lea.vmem %s1863_s10, 16  ;;  %s8426_s1 = scalar_lea.vmem %s1863_s10, 32 }
 0x1f5   : > { %p8420_p3 = scmp.ne.s32.totalorder %s1863_s10, %s8419_s23  ;;  %p8427_p6 = scmp.lt.s32.totalorder %s1863_s10, %s1863_s10 }
 0x1f6   : > { %p8428_p8 = scmp.lt.s32.totalorder %s8426_s1, %s8419_s23 }
 0x1f7   : > { %p8422_p1 = pnand %p8420_p3, %p9004_p7 }
 0x1f8   : > { %p8429_p9 = por %p8428_p8, %p8427_p6 }
 0x1f9   : > { %p8423_p4 = pneg %p8422_p1 }
 0x1fb   : > { %p8430_p10 = pnand %p8429_p9, %p8423_p4 }
 0x1fd   : > { %8433 = shalt.err (!%p8430_p10)
}
 0x1fe   : > { %7698 = dma.hbm_to_vmem [thread:$0]  (!%p8992_p5), %s9846_s18, 16, %s1863_s10, [#allocation23]  }
 0x1ff   : > { %s8619_s16 = smov [#allocation27]   ;;  %s8620_s28 = smov [#allocation28]  }
 0x200   : > { %s1884_s22 = sshll.u32 %s8619_s16, 4  ;;  %s1898_s4 = sshll.u32 %s8620_s28, 4  ;;  %s1885_s22 = int_to_ptr.vmem [resolvable:$true] %s1884_s22  ;;  %s1899_s4 = int_to_ptr.vmem [resolvable:$true] %s1898_s4 }
 0x201   : > { %s8434_s2 = scalar_lea.hbm %s8952_s25, 16 }
 0x202   : > { %p8435_p11 = scmp.ne.s32.totalorder %s8952_s25, %s8434_s2  ;;  %p8441_p13 = scmp.lt.u32.totalorder %s8434_s2, %s8952_s25 }
 0x204   : > { %p8437_p12 = pnand %p8435_p11, %p9004_p7 }
 0x206   : > { %p8438_p2 = pneg %p8437_p12 }
 0x208   : > { %p8443_p0 = pnand %p8441_p13, %p8438_p2 }
 0x20a   : > { %8446 = shalt.err (!%p8443_p0)
}
 0x20b   : > { %s8447_s23 = scalar_lea.vmem %s1885_s22, 16  ;;  %s8454_s10 = scalar_lea.vmem %s1885_s22, 32 }
 0x20c   : > { %p8448_p3 = scmp.ne.s32.totalorder %s1885_s22, %s8447_s23  ;;  %p8455_p6 = scmp.lt.s32.totalorder %s1885_s22, %s1885_s22 }
 0x20d   : > { %p8456_p8 = scmp.lt.s32.totalorder %s8454_s10, %s8447_s23 }
 0x20e   : > { %p8450_p1 = pnand %p8448_p3, %p9004_p7 }
 0x20f   : > { %p8457_p9 = por %p8456_p8, %p8455_p6 }
 0x210   : > { %p8451_p4 = pneg %p8450_p1 }
 0x212   : > { %p8458_p10 = pnand %p8457_p9, %p8451_p4 }
 0x214   : > { %8461 = shalt.err (!%p8458_p10)
}
 0x215   : > { %7704 = dma.hbm_to_vmem [thread:$0]  (!%p8992_p5), %s8952_s25, 16, %s1885_s22, [#allocation26]  }
 0x216   : > { %s8462_s2 = scalar_lea.hbm %s9839_s5, 16 }
 0x217   : > { %p8463_p11 = scmp.ne.s32.totalorder %s9839_s5, %s8462_s2  ;;  %p8469_p13 = scmp.lt.u32.totalorder %s8462_s2, %s9839_s5 }
 0x219   : > { %p8465_p12 = pnand %p8463_p11, %p9004_p7 }
 0x21b   : > { %p8466_p2 = pneg %p8465_p12 }
 0x21d   : > { %p8471_p0 = pnand %p8469_p13, %p8466_p2 }
 0x21f   : > { %8474 = shalt.err (!%p8471_p0)
}
 0x220   : > { %s8475_s1 = scalar_lea.vmem %s1899_s4, 16  ;;  %s8482_s16 = scalar_lea.vmem %s1899_s4, 32 }
 0x221   : > { %p8476_p3 = scmp.ne.s32.totalorder %s1899_s4, %s8475_s1  ;;  %p8483_p6 = scmp.lt.s32.totalorder %s1899_s4, %s1899_s4 }
 0x222   : > { %p8484_p8 = scmp.lt.s32.totalorder %s8482_s16, %s8475_s1 }
 0x223   : > { %p8478_p1 = pnand %p8476_p3, %p9004_p7 }
 0x224   : > { %p8485_p9 = por %p8484_p8, %p8483_p6 }
 0x225   : > { %p8479_p4 = pneg %p8478_p1 }
 0x227   : > { %p8486_p10 = pnand %p8485_p9, %p8479_p4 }
 0x229   : > { %8489 = shalt.err (!%p8486_p10)
}
 0x22a   : > { %7707 = dma.hbm_to_vmem [thread:$0]  (!%p8992_p5), %s9839_s5, 16, %s1899_s4, [#allocation29]  }
 0x22b   : > { %p9847_p11 = scmp.ne.s32.totalorder %s9842_s15, 0 }
 0x22c   : > { %p9848_p12 = scmp.eq.s32.totalorder (!%p9847_p11), %s8975_s11, 0 }
 0x22d   : > { %1949 = sbr.rel (%p9847_p11) target bundleno = 12905 (0x3269), region = 280 }
 0x234   : > { %8495 = dma.done.wait (%p9848_p12), [#allocation3], 16   ;;  %p9849_p2 = pmov %p9848_p12 }
 0x236   : > { %8497 = vsyncadd (%p9849_p2), [#allocation3], 4294967280  ;;  %p9850_p7 = pmov %p9849_p2 }
 0x237   : > { %p9851_p13 = pmov %p9849_p2 }
 0x238   : > { %8499 = dma.done.wait (%p9850_p7), [#allocation5], 32  }
 0x239   : > { %8501 = vsyncadd (%p9851_p13), [#allocation5], 4294967264  ;;  %p9852_p0 = pmov %p9849_p2 }
 0x23b   : > { %8503 = dma.done.wait (%p9852_p0), [#allocation8], 32   ;;  %p9853_p5 = pmov %p9852_p0 }
 0x23c   : > { %p9854_p3 = pmov %p9852_p0 }
 0x23d   : > { %8505 = vsyncadd (%p9853_p5), [#allocation8], 4294967264 }
 0x23e   : > { %8507 = dma.done.wait (%p9854_p3), [#allocation11], 32   ;;  %p9855_p1 = pmov %p9852_p0 }
 0x23f   : > { %p9856_p4 = pmov %p9852_p0 }
 0x240   : > { %8509 = vsyncadd (%p9855_p1), [#allocation11], 4294967264 }
 0x241   : > { %8511 = dma.done.wait (%p9856_p4), [#allocation14], 32   ;;  %p9857_p6 = pmov %p9852_p0 }
 0x242   : > { %p9858_p8 = pmov %p9852_p0 }
 0x243   : > { %8513 = vsyncadd (%p9857_p6), [#allocation14], 4294967264 }
 0x244   : > { %8515 = dma.done.wait (%p9858_p8), [#allocation17], 32   ;;  %p9859_p9 = pmov %p9852_p0 }
 0x245   : > { %p9860_p10 = pmov %p9852_p0 }
 0x246   : > { %8517 = vsyncadd (%p9859_p9), [#allocation17], 4294967264 }
 0x247   : > { %8519 = dma.done.wait (%p9860_p10), [#allocation20], 32   ;;  %p9861_p11 = pmov %p9852_p0 }
 0x248   : > { %p9862_p12 = pmov %p9852_p0 }
 0x249   : > { %8521 = vsyncadd (%p9861_p11), [#allocation20], 4294967264 }
 0x24a   : > { %8523 = dma.done.wait (%p9862_p12), [#allocation23], 32   ;;  %p9863_p2 = pmov %p9852_p0 }
 0x24b   : > { %p9864_p7 = pmov %p9852_p0 }
 0x24c   : > { %8525 = vsyncadd (%p9863_p2), [#allocation23], 4294967264 }
 0x24d   : > { %8527 = dma.done.wait (%p9864_p7), [#allocation26], 32   ;;  %p9865_p13 = pmov %p9852_p0 }
 0x24f   : > { %8529 = vsyncadd (%p9865_p13), [#allocation26], 4294967264 }
 0x250   : > { %8531 = dma.done.wait (%p9852_p0), [#allocation29], 16   ;;  %p9866_p5 = pmov %p9852_p0 }
 0x251   : > { %s9867_s15 = sld [smem:[#allocation45_spill]]  ;;  %v8621_v0 = vmov 0.0|0.0   ;;  %vm8622_vm0 = vmmov 0   ;;  %v8623_v1 = vmov 0.0   ;;  %p2183_p3 = scmp.lt.s32.totalorder %s8975_s11, 1  ;;  %vm2238_vm1 = vcmask 1043456  }
 0x252   : > { %8533 = vsyncadd (%p9866_p5), [#allocation29], 4294967280  ;;  %7373 = vmatprep.subr.bf16.mxu0 %v8621_v0  ;;  %7395 = vmatprep.subr.bf16.mxu1 %v8621_v0  ;;  %s9868_s26 = sld [smem:[#allocation40_spill]]  ;;  %s9869_s0 = sld [smem:[#allocation41_spill]]  ;;  %vm8624_vm2 = vmmov 1   ;;  %vm2234_vm4 = vcmask 883712  }
 0x253   : > { %7023 = vmatprep.mubr.msk.f32.mxu0 %vm8622_vm0, %v8623_v1  ;;  %7034 = vmatprep.mubr.msk.f32.mxu1 %vm8622_vm0, %v8623_v1  ;;  %s9923_s11 = smov (!%p2183_p3, %s8975_s11), 1  ;;  %s9870_s22 = sld [smem:[#allocation46_spill]]  ;;  %vm7393_vm3 = vmpackc.low %vm2238_vm1, %vm8624_vm2  ;;  %vm2315_vm5 = vcmask 257024   ;;  %vm2355_vm6 = vcmask 261120   ;;  %vm2436_vm7 = vcmask 130048   ;;  %vm2512_vm8 = vcmask 27648  }
 0x254   : > { %s6674_s28 = sshll.u32 %s9923_s11, 2  ;;  %s9871_s10 = sld [smem:[#allocation49_spill]]  ;;  %vm2526_vm9 = vcmask 31744   ;;  %vm4328_vm10 = vcmask 64512   ;;  %vm5065_vm12 = vcmask 523264   ;;  %vm6288_vm13 = vcmask 7168  }
 0x255   : > { %s9872_s2 = sld [smem:[#allocation47_spill]]  ;;  %s9873_s1 = sld [smem:[#allocation48_spill]]  ;;  %vm9559_vm11 = vmpackc.low %vm4328_vm10, %vm4328_vm10 }
 0x256   : > { %s9874_s16 = sld [smem:[#allocation50_spill]]  ;;  %s9898_s3 = sld [smem:[#allocation73_spill]] }
 0x257   : > { %v2213_v2 = vld [vmem:[%s9867_s15] sm:$0xff]  ;;  %v2214_v3 = vld [vmem:[%s9867_s15 + $0x8] sm:$0xff]  ;;  %v2215_v4 = vld [vmem:[%s9867_s15 + $0x10] sm:$0xff]  ;;  %s9902_s5 = sld [smem:[#allocation43_spill]]  ;;  %s9903_s6 = sld [smem:[#allocation74_spill]] }
 0x258   : > { %v7374_v5 = vpack.c.bf16 %v2214_v3, %v2213_v2  ;;  %v2216_v6 = vld [vmem:[%s9867_s15 + $0x18] sm:$0xff]  ;;  %v2217_v8 = vld [vmem:[%s9867_s15 + $0x20] sm:$0xff]  ;;  %v2218_v9 = vld [vmem:[%s9867_s15 + $0x28] sm:$0xff]  ;;  %s2186_s4 = scalar_lea.vmem %s9868_s26, %s6674_s28  ;;  %s2190_s23 = scalar_lea.vmem %s9869_s0, %s6674_s28 }
 0x259   : > { %v7377_v7 = vpack.c.bf16 %v2216_v6, %v2215_v4  ;;  %v7380_v10 = vpack.c.bf16 %v2218_v9, %v2217_v8  ;;  %v2219_v11 = vld [vmem:[%s9867_s15 + $0x30] sm:$0xff]  ;;  %v2220_v12 = vld [vmem:[%s9867_s15 + $0x38] sm:$0xff]  ;;  %v2221_v14 = vld [vmem:[%s9867_s15 + $0x40] sm:$0xff]  ;;  %s9764_s26 = smov 64   ;;  %s9768_s0 = smov 96  }
 0x25a   : > { %7375 = vmatpush3.bf16.msra.mxu0 %v7374_v5  ;;  %v7383_v13 = vpack.c.bf16 %v2220_v12, %v2219_v11  ;;  %v2222_v15 = vld [vmem:[%s9867_s15 + $0x48] sm:$0xff]  ;;  %v2223_v17 = vld [vmem:[%s9867_s15 + $0x50] sm:$0xff]  ;;  %v2224_v18 = vld [vmem:[%s9867_s15 + $0x58] sm:$0xff]  ;;  %s9765_s28 = smov 112  }
 0x25b   : > { %7376 = vmatprep.subr.bf16.mxu0 %v8621_v0  ;;  %v7386_v16 = vpack.c.bf16 %v2222_v15, %v2221_v14  ;;  %v7389_v19 = vpack.c.bf16 %v2224_v18, %v2223_v17  ;;  %v2225_v20 = vld [vmem:[%s9867_s15 + $0x60] sm:$0xff]  ;;  %v2226_v21 = vld [vmem:[%s9867_s15 + $0x68] sm:$0xf]  ;;  %v2346_v38 = vld [vmem:[%s9871_s10 + $0x10] sm:$0xff] }
 0x25c   : > { %v7392_v22 = vpack.c.bf16 %v2226_v21, %v2225_v20  ;;  %v2211_v23 = vld [vmem:[%s2186_s4] sm:$0xf]  ;;  %v2345_v37 = vld [vmem:[%s9871_s10 + $0x8] sm:$0xff]  ;;  %v2347_v40 = vld [vmem:[%s9871_s10 + $0x18] sm:$0xff]  ;;  %s9875_s4 = sld [smem:[#allocation51_spill]] }
 0x25d   : > { %v6684_v24 = vld [vmem:[%s9870_s22] ss:$0 sm:$0xff]  ;;  %v7399_v41 = vpack.c.bf16 %v2347_v40, %v2346_v38  ;;  %s8627_s22 = smov 80  }
 0x25e   : > { %7378 = vmatpush3.bf16.msra.mxu0 %v7377_v7  ;;  %v2212_v25 = vld [vmem:[%s2190_s23] sm:$0xf]  ;;  %s9763_s23 = smov 48  }
 0x25f   : > { %7379 = vmatprep.subr.bf16.mxu0 %v8621_v0  ;;  %v2344_v36 = vld [vmem:[%s9871_s10] sm:$0xff] }
 0x260   : > { %v7396_v39 = vpack.c.bf16 %v2345_v37, %v2344_v36  ;;  %v6687_v46 = vld [vmem:[%s9872_s2] ss:$0 sm:$0xff]  ;;  %s9876_s2 = sld [smem:[#allocation52_spill]] }
 0x261   : > { %v6688_v48 = vld [vmem:[%s9873_s1] ss:$0 sm:$0xff]  ;;  %s9877_s1 = sld [smem:[#allocation55_spill]] }
 0x262   : > { %7381 = vmatpush3.bf16.msra.mxu0 %v7380_v10  ;;  %7397 = vmatpush3.bf16.msra.mxu1 %v7396_v39  ;;  %v6689_v51 = vld [vmem:[%s9874_s16] ss:$0 sm:$0xff]  ;;  %s9878_s16 = sld [smem:[#allocation57_spill]] }
 0x263   : > { %7382 = vmatprep.subr.bf16.mxu0 %v8621_v0  ;;  %7398 = vmatprep.subr.bf16.mxu1 %v8621_v0 }
 0x266   : > { %7384 = vmatpush3.bf16.msra.mxu0 %v7383_v13  ;;  %7400 = vmatpush3.bf16.msra.mxu1 %v7399_v41  ;;  %v6701_v38 = vld [vmem:[%s9876_s2] ss:$0 sm:$0xff]  ;;  %s9879_s2 = sld [smem:[#allocation53_spill]] }
 0x267   : > { %7385 = vmatprep.subr.bf16.mxu0 %v8621_v0  ;;  %7037 = vmatprep.subr.mxu1 %v8623_v1 }
 0x26a   : > { %7387 = vmatpush3.bf16.msra.mxu0 %v7386_v16 }
 0x26b   : > { %7388 = vmatprep.subr.bf16.mxu0 %v8621_v0 }
 0x26e   : > { %7390 = vmatpush3.bf16.msra.mxu0 %v7389_v19 }
 0x26f   : > { %7391 = vmatprep.subr.bf16.mxu0 %v8621_v0 }
 0x272   : > { %7394 = vmatpush3.bf16.msk.msra.mxu0 %vm7393_vm3, %v7392_v22  ;;  %v2431_v22 = vld [vmem:[%s9875_s4 + $0x10] sm:$0xff] }
 0x273   : > { %7413 = vmatprep.subr.bf16.mxu0 %v8621_v0 }
 0x275   : > { %7024 = vmatmul.mubr.msk.f32.vlgmr.msra.gmra.mrb[0].mxu0 %vm2234_vm4, %v2211_v23  ;;  %v2432_v23 = vld [vmem:[%s9875_s4 + $0x18] sm:$0xff] }
 0x276   : > { %7114 = vmatprep.mubr.msk.f32.mxu0 %vm8622_vm0, %v8623_v1 }
 0x348   : > { %v2308_v26 = vpop.f32.mrb[0].mxu0 }
 0x349   : > { %v2309_v27 = vadd.f32 %v6684_v24, %v2308_v26  ;;  %v7025_v28 = vpop.f32.mrb[1].mxu0 }
 0x34a   : > { %v2430_v28 = vld [vmem:[%s9875_s4 + $0x8] sm:$0xff] }
 0x34b   : > { %v9291_v29 = vadd.f32 %v2309_v27, %v2212_v25  ;;  %v7402_v25 = vpack.c.bf16 %v2432_v23, %v2431_v22  ;;  %v2429_v27 = vld [vmem:[%s9875_s4] sm:$0xff]  ;;  %s9901_s4 = sld [smem:[#allocation42_spill]] }
 0x34d   : > { %v2316_v30 = vsel %vm2315_vm5, %v9291_v29, 0.0 }
 0x34e   : > { %2317 = vadd.xlane.f32.xlu0 %v2316_v30  ;;  %v7405_v30 = vpack.c.bf16 %v2430_v28, %v2429_v27 }
 0x3db   : > { %v2318_v31 = vpop.xlane.xlu0 %2317 }
 0x3dc   : > { %v2320_v32 = vmul.f32 0.03125, %v2318_v31 }
 0x3de   : > { %v2321_v33 = vsub.f32 %v9291_v29, %v2320_v32 }
 0x3e0   : > { %v2322_v34 = vmul.f32 %v2321_v33, %v2321_v33 }
 0x3e2   : > { %v2323_v35 = vsel %vm2315_vm5, %v2322_v34, 0.0 }
 0x3e3   : > { %2324 = vadd.xlane.f32.xlu0 %v2323_v35 }
 0x470   : > { %v2325_v42 = vpop.xlane.xlu0 %2324 }
 0x471   : > { %v2326_v43 = vmul.f32 0.03125, %v2325_v42 }
 0x473   : > { %v2327_v44 = vadd.f32 1e-06, %v2326_v43 }
 0x475   : > { %7890 = vrsqrt.f32 %v2327_v44 }
 0x47f   : > { %v7891_v45 = vpop.eup %7890 }
 0x480   : > { %v2329_v47 = vmul.f32 %v7891_v45, %v2321_v33 }
 0x482   : > { %v2336_v49 = vmul.f32 %v6687_v46, %v2329_v47  ;;  %v2953_v47 = vld [vmem:[%s9877_s1] sm:$0xff] }
 0x484   : > { %v2343_v50 = vadd.f32 %v6688_v48, %v2336_v49  ;;  %v2954_v48 = vld [vmem:[%s9877_s1 + $0x8] sm:$0xff] }
 0x485   : > { %v7408_v49 = vpack.c.bf16 %v2954_v48, %v2953_v47 }
 0x486   : > { %7035 = vmatmul.mubr.msk.f32.vlgmr.msra.gmra.mrb[0].mxu1 %vm2355_vm6, %v2343_v50  ;;  %v2956_v50 = vld [vmem:[%s9877_s1 + $0x18] sm:$0xff] }
 0x487   : > { %7039 = vmatprep.mubr.msk.f32.mxu1 %vm8622_vm0, %v8623_v1 }
 0x559   : > { %v2425_v52 = vpop.f32.mrb[0].mxu1 }
 0x55a   : > { %v2426_v53 = vadd.f32 %v6689_v51, %v2425_v52  ;;  %v7036_v54 = vpop.f32.mrb[1].mxu1  ;;  %v3046_v52 = vld [vmem:[%s9878_s16] sm:$0xff] }
 0x55c   : > { %2524 = vrot.lane.b32.xlu0 %v2426_v53, %s9764_s26  ;;  %2434 = vrot.lane.b32.xlu1 %v2426_v53, %s9768_s0  ;;  %s9883_s26 = sld [smem:[#allocation61_spill]] }
 0x560   : > { %2604 = vrot.lane.b32.xlu0 %v2426_v53, %s8627_s22 }
 0x5ce   : > { %v2435_v55 = vpop.permute.xlu1 %2434  ;;  %v2525_v56 = vpop.permute.xlu0 %2524 }
 0x5cf   : > { %7038 = vmatpush3.xpose.msk.msra.mxu1 %vm2436_vm7, %v2435_v55 }
 0x5d0   : > { %7042 = vmatprep.subr.mxu1 %v8623_v1 }
 0x5d2   : > { %7040 = vmatmul.mubr.msk.f32.vlgmr.msra.gmra.mrb[2].mxu1 %vm2436_vm7, %v2426_v53  ;;  %v2605_v4 = vpop.permute.xlu0 %2604 }
 0x5d3   : > { %7043 = vmatpush3.msk.msra.mxu1 %vm2238_vm1, %v2525_v56  ;;  %7044 = vmatprep.mubr.msk.f32.mxu1 %vm8622_vm0, %v8623_v1 }
 0x5d4   : > { %7047 = vmatprep.subr.mxu1 %v8623_v1 }
 0x6a5   : > { %v2507_v57 = vpop.f32.mrb[2].mxu1 }
 0x6a6   : > { %v2511_v58 = vmul.f32 0.25, %v2507_v57  ;;  %v7041_v59 = vpop.f32.mrb[3].mxu1 }
 0x6a7   : > { %v6702_v59 = vld [vmem:[%s9879_s2] ss:$0 sm:$0xff]  ;;  %s9882_s2 = sld [smem:[#allocation58_spill]] }
 0x6a8   : > { %v2513_v60 = vsel %vm2512_vm8, %v2511_v58, -inf }
 0x6a9   : > { %2514 = vmax.xlane.f32.xlu1 %v2513_v60 }
 0x736   : > { %v2515_v61 = vpop.xlane.xlu1 %2514 }
 0x737   : > { %v2516_v62 = vsub.f32 %v2511_v58, %v2515_v61 }
 0x739   : > { %v2517_v63 = vmul.f32 1.442695, %v2516_v62 }
 0x73b   : > { %7892 = vpow2.f32 %v2517_v63 }
 0x745   : > { %v7893_v2 = vpop.eup %7892 }
 0x746   : > { %v2519_v3 = vsel %vm2512_vm8, %v7893_v2, 0.0 }
 0x747   : > { %2520 = vadd.xlane.f32.xlu0 %v2519_v3  ;;  %v3049_v3 = vld [vmem:[%s9878_s16 + $0x18] sm:$0xff] }
 0x75d   : > { %2602 = vrot.lane.b32.xlu0 %v2426_v53, %s9765_s28  ;;  %s9886_s28 = sld [smem:[#allocation62_spill]] }
 0x7d4   : > { %v2521_v5 = vpop.xlane.xlu0 %2520 }
 0x7d5   : > { %7894 = vrcp.f32 %v2521_v5  ;;  %v3050_v5 = vld [vmem:[%s9878_s16 + $0x20] sm:$0xff] }
 0x7d8   : > { %v2603_v8 = vpop.permute.xlu0 %2602 }
 0x7df   : > { %v7895_v6 = vpop.eup %7894 }
 0x7e0   : > { %v2523_v7 = vmul.f32 %v7895_v6, %v7893_v2  ;;  %v3048_v2 = vld [vmem:[%s9878_s16 + $0x10] sm:$0xff]  ;;  %v3051_v6 = vld [vmem:[%s9878_s16 + $0x28] sm:$0xff] }
 0x7e2   : > { %7045 = vmatmul.mubr.msk.f32.vlgmr.msra.gmra.mrb[4].mxu1 %vm2526_vm9, %v2523_v7  ;;  %v7420_v7 = vpack.c.bf16 %v3051_v6, %v3050_v5 }
 0x7e3   : > { %7048 = vmatpush3.xpose.msk.msra.mxu1 %vm2436_vm7, %v2605_v4  ;;  %7049 = vmatprep.mubr.msk.f32.mxu1 %vm8622_vm0, %v8623_v1  ;;  %v7417_v4 = vpack.c.bf16 %v3049_v3, %v3048_v2 }
 0x7e4   : > { %7052 = vmatprep.subr.mxu1 %v8623_v1 }
 0x7e6   : > { %7050 = vmatmul.mubr.msk.f32.vlgmr.msra.gmra.mrb[6].mxu1 %vm2436_vm7, %v2603_v8  ;;  %v3052_v8 = vld [vmem:[%s9878_s16 + $0x30] sm:$0xff] }
 0x7e7   : > { %7054 = vmatprep.mubr.msk.f32.mxu1 %vm8622_vm0, %v8623_v1 }
 0x8b5   : > { %v2598_v9 = vpop.f32.mrb[4].mxu1 }
 0x8b6   : > { %v7046_v10 = vpop.f32.mrb[5].mxu1 }
 0x8b9   : > { %v2676_v11 = vpop.f32.mrb[6].mxu1 }
 0x8ba   : > { %v2680_v12 = vmul.f32 0.25, %v2676_v11  ;;  %v7051_v13 = vpop.f32.mrb[7].mxu1  ;;  %v3054_v11 = vld [vmem:[%s9878_s16 + $0x40] sm:$0xff] }
 0x8bb   : > { %v3056_v13 = vld [vmem:[%s9878_s16 + $0x50] sm:$0xff] }
 0x8bc   : > { %v2681_v14 = vsel %vm2512_vm8, %v2680_v12, -inf }
 0x8bd   : > { %2682 = vmax.xlane.f32.xlu1 %v2681_v14 }
 0x8ce   : > { %2692 = vrot.lane.b32.xlu1 %v2426_v53, %s9763_s23  ;;  %s9880_s23 = sld [smem:[#allocation54_spill]]  ;;  %v3047_v53 = vld [vmem:[%s9878_s16 + $0x8] sm:$0xff] }
 0x8cf   : > { %v7414_v54 = vpack.c.bf16 %v3047_v53, %v3046_v52 }
 0x8d1   : > { %7415 = vmatpush3.bf16.msra.mxu0 %v7414_v54 }
 0x8d2   : > { %7416 = vmatprep.subr.bf16.mxu0 %v8621_v0 }
 0x8d4   : > { %v6703_v61 = vld [vmem:[%s9880_s23] ss:$0 sm:$0xff]  ;;  %s9881_s23 = sld [smem:[#allocation56_spill]] }
 0x8d5   : > { %7418 = vmatpush3.bf16.msra.mxu0 %v7417_v4 }
 0x8d6   : > { %7419 = vmatprep.subr.bf16.mxu0 %v8621_v0 }
 0x8d9   : > { %7421 = vmatpush3.bf16.msra.mxu0 %v7420_v7 }
 0x8da   : > { %7422 = vmatprep.subr.bf16.mxu0 %v8621_v0  ;;  %v6704_v23 = vld [vmem:[%s9881_s23] ss:$0 sm:$0xff]  ;;  %s9884_s23 = sld [smem:[#allocation59_spill]] }
 0x94a   : > { %v2683_v15 = vpop.xlane.xlu1 %2682 }
 0x94b   : > { %v2684_v16 = vsub.f32 %v2680_v12, %v2683_v15  ;;  %v3055_v12 = vld [vmem:[%s9878_s16 + $0x48] sm:$0xff]  ;;  %v3057_v15 = vld [vmem:[%s9878_s16 + $0x58] sm:$0xff] }
 0x94c   : > { %v7426_v14 = vpack.c.bf16 %v3055_v12, %v3054_v11 }
 0x94d   : > { %v2685_v17 = vmul.f32 1.442695, %v2684_v16  ;;  %v7429_v16 = vpack.c.bf16 %v3057_v15, %v3056_v13 }
 0x94e   : > { %v2693_v18 = vpop.permute.xlu1 %2692 }
 0x94f   : > { %7896 = vpow2.f32 %v2685_v17  ;;  %7053 = vmatpush3.msk.msra.mxu1 %vm2238_vm1, %v2693_v18  ;;  %v3058_v17 = vld [vmem:[%s9878_s16 + $0x60] sm:$0xff]  ;;  %v3059_v18 = vld [vmem:[%s9878_s16 + $0x68] sm:$0xff] }
 0x950   : > { %7401 = vmatprep.subr.bf16.mxu1 %v8621_v0 }
 0x959   : > { %v7897_v19 = vpop.eup %7896 }
 0x95a   : > { %v2687_v20 = vsel %vm2512_vm8, %v7897_v19, 0.0 }
 0x95b   : > { %2688 = vadd.xlane.f32.xlu0 %v2687_v20  ;;  %v3060_v20 = vld [vmem:[%s9878_s16 + $0x70] sm:$0xff] }
 0x9e8   : > { %v2689_v21 = vpop.xlane.xlu0 %2688 }
 0x9e9   : > { %7898 = vrcp.f32 %v2689_v21  ;;  %v3061_v21 = vld [vmem:[%s9878_s16 + $0x78] sm:$0xff] }
 0x9ea   : > { %v7435_v22 = vpack.c.bf16 %v3061_v21, %v3060_v20 }
 0x9f3   : > { %v7899_v24 = vpop.eup %7898 }
 0x9f4   : > { %v2691_v26 = vmul.f32 %v7899_v24, %v7897_v19  ;;  %v7432_v19 = vpack.c.bf16 %v3059_v18, %v3058_v17 }
 0x9f6   : > { %7055 = vmatmul.mubr.msk.f32.vlgmr.msra.gmra.mrb[8].mxu1 %vm2526_vm9, %v2691_v26 }
 0x9f7   : > { %7403 = vmatpush3.bf16.msra.mxu1 %v7402_v25  ;;  %7061 = vmatprep.mubr.msk.f32.mxu1 %vm8622_vm0, %v8623_v1 }
 0x9f8   : > { %7404 = vmatprep.subr.bf16.mxu1 %v8621_v0 }
 0xac9   : > { %v2765_v31 = vpop.f32.mrb[8].mxu1 }
 0xaca   : > { %v7056_v32 = vpop.f32.mrb[9].mxu1  ;;  %7062 = vmatmul.mubr.msk.f32.vlgmr.msra.gmra.mrb[10].mxu1 %vm2436_vm7, %v2765_v31 }
 0xacb   : > { %7406 = vmatpush3.bf16.msra.mxu1 %v7405_v30  ;;  %7068 = vmatprep.mubr.msk.f32.mxu1 %vm8622_vm0, %v8623_v1 }
 0xacc   : > { %7407 = vmatprep.subr.bf16.mxu1 %v8621_v0 }
 0xace   : > { %7069 = vmatmul.mubr.msk.f32.vlgmr.msra.gmra.mrb[12].mxu1 %vm2436_vm7, %v2598_v9  ;;  %v3053_v9 = vld [vmem:[%s9878_s16 + $0x38] sm:$0xff] }
 0xacf   : > { %7079 = vmatprep.mubr.msk.f32.mxu1 %vm8622_vm0, %v8623_v1  ;;  %7409 = vmatpush3.bf16.msra.mxu1 %v7408_v49  ;;  %v7423_v10 = vpack.c.bf16 %v3053_v9, %v3052_v8  ;;  %v3169_v49 = vld [vmem:[%s9883_s26] sm:$0xff] }
 0xad0   : > { %7410 = vmatprep.subr.bf16.mxu1 %v8621_v0 }
 0xad1   : > { %7424 = vmatpush3.bf16.msra.mxu0 %v7423_v10 }
 0xad2   : > { %7425 = vmatprep.subr.bf16.mxu0 %v8621_v0 }
 0xad5   : > { %7427 = vmatpush3.bf16.msra.mxu0 %v7426_v14 }
 0xad6   : > { %7428 = vmatprep.subr.bf16.mxu0 %v8621_v0 }
 0xad9   : > { %7430 = vmatpush3.bf16.msra.mxu0 %v7429_v16 }
 0xada   : > { %7431 = vmatprep.subr.bf16.mxu0 %v8621_v0 }
 0xadd   : > { %7433 = vmatpush3.bf16.msra.mxu0 %v7432_v19 }
 0xade   : > { %7434 = vmatprep.subr.bf16.mxu0 %v8621_v0 }
 0xae1   : > { %7436 = vmatpush3.bf16.msra.mxu0 %v7435_v22 }
 0xae2   : > { %7446 = vmatprep.subr.bf16.mxu0 %v8621_v0 }
 0xb9d   : > { %v2838_v33 = vpop.f32.mrb[10].mxu1 }
 0xb9e   : > { %v7063_v34 = vpop.f32.mrb[11].mxu1 }
 0xba1   : > { %v2911_v35 = vpop.f32.mrb[12].mxu1 }
 0xba2   : > { %v2912_v36 = vadd.f32 %v2911_v35, %v2838_v33  ;;  %v7070_v37 = vpop.f32.mrb[13].mxu1 }
 0xba3   : > { %v6706_v37 = vld [vmem:[%s9882_s2] ss:$0 sm:$0xff]  ;;  %s9885_s2 = sld [smem:[#allocation60_spill]] }
 0xba4   : > { %v2915_v39 = vadd.f32 %v2912_v36, %v9291_v29  ;;  %v2955_v29 = vld [vmem:[%s9877_s1 + $0x10] sm:$0xff]  ;;  %s9887_s1 = smov 112  }
 0xba5   : > { %v7411_v51 = vpack.c.bf16 %v2956_v50, %v2955_v29  ;;  %v3170_v29 = vld [vmem:[%s9883_s26 + $0x8] sm:$0xff] }
 0xba6   : > { %v9352_v40 = vadd.f32 %v6701_v38, %v2915_v39  ;;  %v7438_v50 = vpack.c.bf16 %v3170_v29, %v3169_v49 }
 0xba7   : > { %7412 = vmatpush3.bf16.msra.mxu1 %v7411_v51  ;;  %v3172_v51 = vld [vmem:[%s9883_s26 + $0x18] sm:$0xff] }
 0xba8   : > { %v2926_v41 = vsel %vm2315_vm5, %v9352_v40, 0.0  ;;  %7437 = vmatprep.subr.bf16.mxu1 %v8621_v0 }
 0xba9   : > { %2927 = vadd.xlane.f32.xlu1 %v2926_v41 }
 0xc36   : > { %v2928_v42 = vpop.xlane.xlu1 %2927 }
 0xc37   : > { %v2929_v43 = vmul.f32 0.03125, %v2928_v42 }
 0xc39   : > { %v2930_v44 = vsub.f32 %v9352_v40, %v2929_v43 }
 0xc3b   : > { %v2931_v45 = vmul.f32 %v2930_v44, %v2930_v44 }
 0xc3d   : > { %v2932_v46 = vsel %vm2315_vm5, %v2931_v45, 0.0 }
 0xc3e   : > { %2933 = vadd.xlane.f32.xlu0 %v2932_v46 }
 0xccb   : > { %v2934_v55 = vpop.xlane.xlu0 %2933 }
 0xccc   : > { %v2935_v56 = vmul.f32 0.03125, %v2934_v55 }
 0xcce   : > { %v2936_v57 = vadd.f32 1e-06, %v2935_v56 }
 0xcd0   : > { %7900 = vrsqrt.f32 %v2936_v57  ;;  %v6707_v57 = vld [vmem:[%s9884_s23] ss:$0 sm:$0xff]  ;;  %s9888_s23 = sld [smem:[#allocation63_spill]] }
 0xcd6   : > { %v3253_v14 = vld [vmem:[%s9888_s23] sm:$0xff]  ;;  %v3254_v15 = vld [vmem:[%s9888_s23 + $0x8] sm:$0xff] }
 0xcd7   : > { %v7447_v16 = vpack.c.bf16 %v3254_v15, %v3253_v14 }
 0xcda   : > { %v7901_v58 = vpop.eup %7900 }
 0xcdb   : > { %v2938_v60 = vmul.f32 %v7901_v58, %v2930_v44 }
 0xcdd   : > { %v2945_v62 = vmul.f32 %v6702_v59, %v2938_v60  ;;  %v6708_v59 = vld [vmem:[%s9885_s2] ss:$0 sm:$0xff]  ;;  %s9891_s2 = sld [smem:[#allocation64_spill]] }
 0xcdf   : > { %v2952_v63 = vadd.f32 %v6703_v61, %v2945_v62  ;;  %v6709_v62 = vld [vmem:[%s9886_s28] ss:$0 sm:$0xff]  ;;  %s9890_s28 = smov 48  }
 0xce1   : > { %7080 = vmatmul.mubr.msk.f32.vlgmr.msra.gmra.mrb[14].mxu1 %vm2355_vm6, %v2952_v63 }
 0xce2   : > { %7125 = vmatprep.mubr.msk.f32.mxu1 %vm8622_vm0, %v8623_v1  ;;  %7439 = vmatpush3.bf16.msra.mxu1 %v7438_v50 }
 0xce3   : > { %7440 = vmatprep.subr.bf16.mxu1 %v8621_v0  ;;  %v6721_v50 = vld [vmem:[%s9891_s2] ss:$0 sm:$0xff]  ;;  %s9894_s2 = sld [smem:[#allocation65_spill]] }
 0xdb4   : > { %v3033_v24 = vpop.f32.mrb[14].mxu1 }
 0xdb5   : > { %v3034_v25 = vadd.f32 %v6704_v23, %v3033_v24  ;;  %v7081_v26 = vpop.f32.mrb[15].mxu1 }
 0xdb7   : > { %v3037_v27 = vmul.f32 %v3034_v25, %v3034_v25 }
 0xdb9   : > { %v3038_v28 = vmul.f32 %v3037_v27, %v3034_v25 }
 0xdbb   : > { %v3039_v30 = vmul.f32 0.044715, %v3038_v28 }
 0xdbd   : > { %v3040_v31 = vadd.f32 %v3039_v30, %v3034_v25 }
 0xdbf   : > { %v3041_v32 = vmul.f32 0.7978846, %v3040_v31 }
 0xdc1   : > { %7902 = vtanh.f32 %v3041_v32 }
 0xdcb   : > { %v7903_v33 = vpop.eup %7902 }
 0xdcc   : > { %v3043_v34 = vadd.f32 1.0, %v7903_v33 }
 0xdce   : > { %v3044_v35 = vmul.f32 0.5, %v3043_v34 }
 0xdd0   : > { %v3045_v36 = vmul.f32 %v3044_v35, %v3034_v25 }
 0xdd2   : > { %7115 = vmatmul.mubr.f32.vlgmr.msra.gmra.mrb[2].mxu0 %v3045_v36 }
 0xdd3   : > { %7159 = vmatprep.mubr.msk.f32.mxu0 %vm8622_vm0, %v8623_v1  ;;  %7448 = vmatpush3.bf16.msra.mxu0 %v7447_v16 }
 0xdd4   : > { %7455 = vmatprep.subr.bf16.mxu0 %v8621_v0 }
 0xea5   : > { %v3135_v38 = vpop.f32.mrb[2].mxu0 }
 0xea6   : > { %v3136_v39 = vadd.f32 %v6706_v37, %v3135_v38  ;;  %v7116_v41 = vpop.f32.mrb[3].mxu0 }
 0xea7   : > { %v3256_v41 = vld [vmem:[%s9888_s23 + $0x18] sm:$0xff] }
 0xea8   : > { %v9398_v42 = vadd.f32 %v3136_v39, %v9352_v40  ;;  %v3171_v40 = vld [vmem:[%s9883_s26 + $0x10] sm:$0xff] }
 0xea9   : > { %v7441_v52 = vpack.c.bf16 %v3172_v51, %v3171_v40  ;;  %v3255_v39 = vld [vmem:[%s9888_s23 + $0x10] sm:$0xff] }
 0xeaa   : > { %v3142_v43 = vsel %vm2315_vm5, %v9398_v42, 0.0 }
 0xeab   : > { %3143 = vadd.xlane.f32.xlu0 %v3142_v43  ;;  %7442 = vmatpush3.bf16.msra.mxu1 %v7441_v52 }
 0xeac   : > { %7128 = vmatprep.subr.mxu1 %v8623_v1 }
 0xf38   : > { %v3144_v44 = vpop.xlane.xlu0 %3143 }
 0xf39   : > { %v3145_v45 = vmul.f32 0.03125, %v3144_v44  ;;  %v7444_v44 = vpack.c.bf16 %v3256_v41, %v3255_v39 }
 0xf3b   : > { %v3146_v46 = vsub.f32 %v9398_v42, %v3145_v45 }
 0xf3d   : > { %v3147_v47 = vmul.f32 %v3146_v46, %v3146_v46 }
 0xf3f   : > { %v3148_v48 = vsel %vm2315_vm5, %v3147_v47, 0.0 }
 0xf40   : > { %3149 = vadd.xlane.f32.xlu0 %v3148_v48 }
 0xfcd   : > { %v3150_v53 = vpop.xlane.xlu0 %3149 }
 0xfce   : > { %v3151_v54 = vmul.f32 0.03125, %v3150_v53 }
 0xfd0   : > { %v3152_v55 = vadd.f32 1e-06, %v3151_v54 }
 0xfd2   : > { %7904 = vrsqrt.f32 %v3152_v55 }
 0xfdc   : > { %v7905_v56 = vpop.eup %7904 }
 0xfdd   : > { %v3154_v58 = vmul.f32 %v7905_v56, %v3146_v46 }
 0xfdf   : > { %v3161_v60 = vmul.f32 %v6707_v57, %v3154_v58 }
 0xfe1   : > { %v3168_v61 = vadd.f32 %v6708_v59, %v3161_v60 }
 0xfe3   : > { %7126 = vmatmul.mubr.msk.f32.vlgmr.msra.gmra.mrb[16].mxu1 %vm2355_vm6, %v3168_v61 }
 0xfe4   : > { %7130 = vmatprep.mubr.msk.f32.mxu1 %vm8622_vm0, %v8623_v1 }
0x10b6   : > { %v3249_v63 = vpop.f32.mrb[16].mxu1 }
0x10b7   : > { %v3250_v2 = vadd.f32 %v6709_v62, %v3249_v63  ;;  %v7127_v3 = vpop.f32.mrb[17].mxu1 }
0x10b9   : > { %3258 = vrot.lane.b32.xlu0 %v3250_v2, %s9768_s0  ;;  %s9895_s0 = sld [smem:[#allocation66_spill]] }
0x10bd   : > { %3425 = vrot.lane.b32.xlu0 %v3250_v2, %s8627_s22  ;;  %s9889_s22 = smov 64  }
0x10c1   : > { %3423 = vrot.lane.b32.xlu0 %v3250_v2, %s9887_s1 }
0x112b   : > { %v3259_v4 = vpop.permute.xlu0 %3258 }
0x112c   : > { %7129 = vmatpush3.xpose.msk.msra.mxu1 %vm2436_vm7, %v3259_v4 }
0x112d   : > { %7133 = vmatprep.subr.mxu1 %v8623_v1 }
0x112f   : > { %7131 = vmatmul.mubr.msk.f32.vlgmr.msra.gmra.mrb[18].mxu1 %vm2436_vm7, %v3250_v2  ;;  %v3426_v20 = vpop.permute.xlu0 %3425 }
0x1130   : > { %7135 = vmatprep.mubr.msk.f32.mxu1 %vm8622_vm0, %v8623_v1 }
0x1133   : > { %v3424_v22 = vpop.permute.xlu0 %3423 }
0x1202   : > { %v3330_v5 = vpop.f32.mrb[18].mxu1 }
0x1203   : > { %v3334_v6 = vmul.f32 0.25, %v3330_v5  ;;  %v7132_v7 = vpop.f32.mrb[19].mxu1 }
0x1205   : > { %v3335_v8 = vsel %vm2512_vm8, %v3334_v6, -inf }
0x1206   : > { %3336 = vmax.xlane.f32.xlu1 %v3335_v8  ;;  %v6722_v8 = vld [vmem:[%s9894_s2] ss:$0 sm:$0xff]  ;;  %s9897_s2 = sld [smem:[#allocation70_spill]] }
0x1293   : > { %v3337_v9 = vpop.xlane.xlu1 %3336 }
0x1294   : > { %v3338_v10 = vsub.f32 %v3334_v6, %v3337_v9 }
0x1296   : > { %v3339_v11 = vmul.f32 1.442695, %v3338_v10  ;;  %v6723_v10 = vld [vmem:[%s9895_s0] ss:$0 sm:$0xff]  ;;  %s9896_s0 = sld [smem:[#allocation68_spill]] }
0x1298   : > { %7906 = vpow2.f32 %v3339_v11 }
0x12a2   : > { %v7907_v12 = vpop.eup %7906 }
0x12a3   : > { %v3341_v13 = vsel %vm2512_vm8, %v7907_v12, 0.0 }
0x12a4   : > { %3342 = vadd.xlane.f32.xlu1 %v3341_v13 }
0x12b5   : > { %3346 = vrot.lane.b32.xlu1 %v3250_v2, %s9889_s22  ;;  %s9892_s22 = sld [smem:[#allocation67_spill]] }
0x12bb   : > { %v3774_v58 = vld [vmem:[%s9892_s22] sm:$0xff]  ;;  %v3775_v59 = vld [vmem:[%s9892_s22 + $0x8] sm:$0xff]  ;;  %v3777_v61 = vld [vmem:[%s9892_s22 + $0x18] sm:$0xff] }
0x12bc   : > { %v7450_v60 = vpack.c.bf16 %v3775_v59, %v3774_v58  ;;  %v3990_v59 = vld [vmem:[%s9898_s3] sm:$0xff] }
0x1331   : > { %v3343_v17 = vpop.xlane.xlu1 %3342 }
0x1332   : > { %7908 = vrcp.f32 %v3343_v17 }
0x1335   : > { %v3347_v18 = vpop.permute.xlu1 %3346 }
0x1336   : > { %7134 = vmatpush3.msk.msra.mxu1 %vm2238_vm1, %v3347_v18 }
0x1337   : > { %7138 = vmatprep.subr.mxu1 %v8623_v1 }
0x133c   : > { %v7909_v19 = vpop.eup %7908 }
0x133d   : > { %v3345_v21 = vmul.f32 %v7909_v19, %v7907_v12 }
0x133f   : > { %7136 = vmatmul.mubr.msk.f32.vlgmr.msra.gmra.mrb[20].mxu1 %vm2526_vm9, %v3345_v21 }
0x1340   : > { %7139 = vmatpush3.xpose.msk.msra.mxu1 %vm2436_vm7, %v3426_v20  ;;  %7140 = vmatprep.mubr.msk.f32.mxu1 %vm8622_vm0, %v8623_v1 }
0x1341   : > { %7143 = vmatprep.subr.mxu1 %v8623_v1 }
0x1343   : > { %7141 = vmatmul.mubr.msk.f32.vlgmr.msra.gmra.mrb[22].mxu1 %vm2436_vm7, %v3424_v22 }
0x1344   : > { %7145 = vmatprep.mubr.msk.f32.mxu1 %vm8622_vm0, %v8623_v1 }
0x1412   : > { %v3419_v23 = vpop.f32.mrb[20].mxu1 }
0x1413   : > { %v7137_v24 = vpop.f32.mrb[21].mxu1  ;;  %7160 = vmatmul.mubr.msk.f32.vlgmr.msra.gmra.mrb[4].mxu0 %vm2436_vm7, %v3419_v23 }
0x1414   : > { %7205 = vmatprep.mubr.msk.f32.mxu0 %vm8622_vm0, %v8623_v1 }
0x1416   : > { %v3497_v25 = vpop.f32.mrb[22].mxu1 }
0x1417   : > { %v3501_v26 = vmul.f32 0.25, %v3497_v25  ;;  %v7142_v27 = vpop.f32.mrb[23].mxu1 }
0x1419   : > { %v3502_v28 = vsel %vm2512_vm8, %v3501_v26, -inf }
0x141a   : > { %3503 = vmax.xlane.f32.xlu0 %v3502_v28 }
0x1430   : > { %3513 = vrot.lane.b32.xlu0 %v3250_v2, %s9890_s28  ;;  %s9893_s28 = sld [smem:[#allocation69_spill]] }
0x1436   : > { %v3867_v63 = vld [vmem:[%s9893_s28] sm:$0xff]  ;;  %v3868_v2 = vld [vmem:[%s9893_s28 + $0x8] sm:$0xff]  ;;  %v3869_v13 = vld [vmem:[%s9893_s28 + $0x10] sm:$0xff] }
0x1437   : > { %v7456_v3 = vpack.c.bf16 %v3868_v2, %v3867_v63  ;;  %v3870_v14 = vld [vmem:[%s9893_s28 + $0x18] sm:$0xff]  ;;  %v3871_v16 = vld [vmem:[%s9893_s28 + $0x20] sm:$0xff]  ;;  %v3872_v17 = vld [vmem:[%s9893_s28 + $0x28] sm:$0xff] }
0x1438   : > { %v7459_v15 = vpack.c.bf16 %v3870_v14, %v3869_v13  ;;  %v7462_v18 = vpack.c.bf16 %v3872_v17, %v3871_v16  ;;  %v3873_v19 = vld [vmem:[%s9893_s28 + $0x30] sm:$0xff]  ;;  %v3875_v21 = vld [vmem:[%s9893_s28 + $0x40] sm:$0xff]  ;;  %v3876_v22 = vld [vmem:[%s9893_s28 + $0x48] sm:$0xff] }
0x1439   : > { %7457 = vmatpush3.bf16.msra.mxu0 %v7456_v3  ;;  %v3877_v23 = vld [vmem:[%s9893_s28 + $0x50] sm:$0xff]  ;;  %v7468_v24 = vpack.c.bf16 %v3876_v22, %v3875_v21  ;;  %v3878_v25 = vld [vmem:[%s9893_s28 + $0x58] sm:$0xff]  ;;  %v3879_v27 = vld [vmem:[%s9893_s28 + $0x60] sm:$0xff] }
0x143a   : > { %7458 = vmatprep.subr.bf16.mxu0 %v8621_v0  ;;  %v3880_v28 = vld [vmem:[%s9893_s28 + $0x68] sm:$0xff]  ;;  %v6729_v13 = vld [vmem:[%s9903_s6] ss:$0 sm:$0xff]  ;;  %s9780_s6 = smov 104  }
0x143d   : > { %7460 = vmatpush3.bf16.msra.mxu0 %v7459_v15 }
0x143e   : > { %7461 = vmatprep.subr.bf16.mxu0 %v8621_v0 }
0x1441   : > { %7463 = vmatpush3.bf16.msra.mxu0 %v7462_v18 }
0x1442   : > { %7464 = vmatprep.subr.bf16.mxu0 %v8621_v0 }
0x14a7   : > { %v3504_v30 = vpop.xlane.xlu0 %3503 }
0x14a8   : > { %v3505_v31 = vsub.f32 %v3501_v26, %v3504_v30  ;;  %v7471_v26 = vpack.c.bf16 %v3878_v25, %v3877_v23  ;;  %v7474_v30 = vpack.c.bf16 %v3880_v28, %v3879_v27 }
0x14aa   : > { %v3506_v32 = vmul.f32 1.442695, %v3505_v31  ;;  %v3881_v31 = vld [vmem:[%s9893_s28 + $0x70] sm:$0xff] }
0x14ab   : > { %v3514_v33 = vpop.permute.xlu0 %3513 }
0x14ac   : > { %7910 = vpow2.f32 %v3506_v32  ;;  %7144 = vmatpush3.msk.msra.mxu1 %vm2238_vm1, %v3514_v33  ;;  %v3882_v32 = vld [vmem:[%s9893_s28 + $0x78] sm:$0xff] }
0x14ad   : > { %7443 = vmatprep.subr.bf16.mxu1 %v8621_v0  ;;  %v7477_v33 = vpack.c.bf16 %v3882_v32, %v3881_v31 }
0x14b6   : > { %v7911_v34 = vpop.eup %7910 }
0x14b7   : > { %v3508_v35 = vsel %vm2512_vm8, %v7911_v34, 0.0 }
0x14b8   : > { %3509 = vadd.xlane.f32.xlu1 %v3508_v35 }
0x14e6   : > { %v3732_v36 = vpop.f32.mrb[4].mxu0 }
0x14e7   : > { %v7161_v37 = vpop.f32.mrb[5].mxu0 }
0x1545   : > { %v3510_v38 = vpop.xlane.xlu1 %3509 }
0x1546   : > { %7912 = vrcp.f32 %v3510_v38 }
0x1550   : > { %v7913_v43 = vpop.eup %7912 }
0x1551   : > { %v3512_v45 = vmul.f32 %v7913_v43, %v7911_v34  ;;  %v6724_v34 = vld [vmem:[%s9896_s0] ss:$0 sm:$0xff]  ;;  %s9899_s0 = sld [smem:[#allocation71_spill]] }
0x1553   : > { %7146 = vmatmul.mubr.msk.f32.vlgmr.msra.gmra.mrb[24].mxu1 %vm2526_vm9, %v3512_v45 }
0x1554   : > { %7445 = vmatpush3.bf16.msra.mxu1 %v7444_v44  ;;  %7152 = vmatprep.mubr.msk.f32.mxu1 %vm8622_vm0, %v8623_v1 }
0x1555   : > { %7449 = vmatprep.subr.bf16.mxu1 %v8621_v0 }
0x1626   : > { %v3586_v46 = vpop.f32.mrb[24].mxu1 }
0x1627   : > { %v7147_v47 = vpop.f32.mrb[25].mxu1  ;;  %7153 = vmatmul.mubr.msk.f32.vlgmr.msra.gmra.mrb[26].mxu1 %vm2436_vm7, %v3586_v46 }
0x1628   : > { %7170 = vmatprep.mubr.msk.f32.mxu1 %vm8622_vm0, %v8623_v1  ;;  %7451 = vmatpush3.bf16.msra.mxu1 %v7450_v60  ;;  %v3991_v60 = vld [vmem:[%s9898_s3 + $0x8] sm:$0xff] }
0x1629   : > { %7452 = vmatprep.subr.bf16.mxu1 %v8621_v0 }
0x16fa   : > { %v3659_v48 = vpop.f32.mrb[26].mxu1 }
0x16fb   : > { %v3733_v49 = vadd.f32 %v3732_v36, %v3659_v48  ;;  %v7154_v29 = vpop.f32.mrb[27].mxu1 }
0x16fd   : > { %v3736_v40 = vadd.f32 %v3733_v49, %v9398_v42  ;;  %v3776_v42 = vld [vmem:[%s9892_s22 + $0x10] sm:$0xff]  ;;  %v6726_v49 = vld [vmem:[%s9897_s2] ss:$0 sm:$0xff]  ;;  %s9900_s2 = sld [smem:[#allocation72_spill]] }
0x16fe   : > { %v7453_v62 = vpack.c.bf16 %v3777_v61, %v3776_v42  ;;  %v7480_v42 = vpack.c.bf16 %v3991_v60, %v3990_v59  ;;  %v3992_v61 = vld [vmem:[%s9898_s3 + $0x10] sm:$0xff] }
0x16ff   : > { %v9459_v51 = vadd.f32 %v6721_v50, %v3736_v40 }
0x1700   : > { %7454 = vmatpush3.bf16.msra.mxu1 %v7453_v62  ;;  %v3993_v62 = vld [vmem:[%s9898_s3 + $0x18] sm:$0xff]  ;;  %s9513_s3 = sshll.u32 %s9923_s11, 4  ;;  %s9778_s11 = smov 120  }
0x1701   : > { %v3747_v52 = vsel %vm2315_vm5, %v9459_v51, 0.0  ;;  %7479 = vmatprep.subr.bf16.mxu1 %v8621_v0  ;;  %s2195_s8 = scalar_lea.vmem %s9901_s4, %s9513_s3  ;;  %s9520_s10 = scalar_lea.vmem %s9902_s5, %s9513_s3 }
0x1702   : > { %3748 = vadd.xlane.f32.xlu1 %v3747_v52  ;;  %v4075_v17 = vld [vmem:[%s2195_s8 + $0x8] sm:$0xff]  ;;  %s9906_s5 = sld [smem:[#allocation78_spill]]  ;;  %s9777_s4 = smov 88  }
0x178f   : > { %v3749_v53 = vpop.xlane.xlu1 %3748 }
0x1790   : > { %v3750_v54 = vmul.f32 0.03125, %v3749_v53 }
0x1792   : > { %v3751_v55 = vsub.f32 %v9459_v51, %v3750_v54 }
0x1794   : > { %v3752_v56 = vmul.f32 %v3751_v55, %v3751_v55 }
0x1796   : > { %v3753_v57 = vsel %vm2315_vm5, %v3752_v56, 0.0 }
0x1797   : > { %3754 = vadd.xlane.f32.xlu1 %v3753_v57 }
0x1824   : > { %v3755_v4 = vpop.xlane.xlu1 %3754 }
0x1825   : > { %v3756_v5 = vmul.f32 0.03125, %v3755_v4 }
0x1827   : > { %v3757_v6 = vadd.f32 1e-06, %v3756_v5  ;;  %v6727_v5 = vld [vmem:[%s9899_s0] ss:$0 sm:$0xff]  ;;  %s9904_s0 = sld [smem:[#allocation75_spill]] }
0x1829   : > { %7914 = vrsqrt.f32 %v3757_v6 }
0x1833   : > { %v7915_v7 = vpop.eup %7914 }
0x1834   : > { %v3759_v9 = vmul.f32 %v7915_v7, %v3751_v55  ;;  %v6728_v7 = vld [vmem:[%s9900_s2] ss:$0 sm:$0xff]  ;;  %s9905_s2 = sld [smem:[#allocation76_spill]] }
0x1836   : > { %v3766_v11 = vmul.f32 %v6722_v8, %v3759_v9 }
0x1838   : > { %v3773_v12 = vadd.f32 %v6723_v10, %v3766_v11  ;;  %v8630_v10 = vmov 0   ;;  %v4076_v11 = vld [vmem:[%s9520_s10] sm:$0xff] }
0x1839   : > { %7848 = vset.pattern.permute.xlu1 %v8630_v10  ;;  %7889 = vset.pattern.permute.xlu0 %v8630_v10 }
0x183a   : > { %7171 = vmatmul.mubr.msk.f32.vlgmr.msra.gmra.mrb[28].mxu1 %vm2355_vm6, %v3773_v12  ;;  %v4077_v12 = vld [vmem:[%s9520_s10 + $0x8] sm:$0xff] }
0x183b   : > { %7216 = vmatprep.mubr.msk.f32.mxu1 %vm8622_vm0, %v8623_v1  ;;  %v3874_v1 = vld [vmem:[%s9893_s28 + $0x38] sm:$0xff]  ;;  %7481 = vmatpush3.bf16.msra.mxu1 %v7480_v42  ;;  %v4182_v23 = vld [vmem:[%s9905_s2 + $0x8] sm:$0xff] }
0x183c   : > { %v7465_v20 = vpack.c.bf16 %v3874_v1, %v3873_v19  ;;  %7482 = vmatprep.subr.bf16.mxu1 %v8621_v0  ;;  %v6731_v19 = vld [vmem:[%s9904_s0] ss:$0 sm:$0xff]  ;;  %s9910_s0 = smov 96  }
0x183e   : > { %7466 = vmatpush3.bf16.msra.mxu0 %v7465_v20 }
0x183f   : > { %7467 = vmatprep.subr.bf16.mxu0 %v8621_v0 }
0x1842   : > { %7469 = vmatpush3.bf16.msra.mxu0 %v7468_v24 }
0x1843   : > { %7470 = vmatprep.subr.bf16.mxu0 %v8621_v0 }
0x1846   : > { %7472 = vmatpush3.bf16.msra.mxu0 %v7471_v26  ;;  %v4181_v26 = vld [vmem:[%s9905_s2] sm:$0xff]  ;;  %s9915_s2 = smov 104  }
0x1847   : > { %7473 = vmatprep.subr.bf16.mxu0 %v8621_v0 }
0x184a   : > { %7475 = vmatpush3.bf16.msra.mxu0 %v7474_v30 }
0x184b   : > { %7476 = vmatprep.subr.bf16.mxu0 %v8621_v0  ;;  %v4074_v0 = vld [vmem:[%s2195_s8] sm:$0xff]  ;;  %s9907_s8 = sld [smem:[#allocation77_spill]] }
0x184e   : > { %7478 = vmatpush3.bf16.msra.mxu0 %v7477_v33 }
0x190d   : > { %v3854_v35 = vpop.f32.mrb[28].mxu1 }
0x190e   : > { %v3855_v36 = vadd.f32 %v6724_v34, %v3854_v35  ;;  %v7172_v37 = vpop.f32.mrb[29].mxu1 }
0x1910   : > { %v3858_v38 = vmul.f32 %v3855_v36, %v3855_v36 }
0x1912   : > { %v3859_v39 = vmul.f32 %v3858_v38, %v3855_v36 }
0x1914   : > { %v3860_v41 = vmul.f32 0.044715, %v3859_v39 }
0x1916   : > { %v3861_v43 = vadd.f32 %v3860_v41, %v3855_v36 }
0x1918   : > { %v3862_v44 = vmul.f32 0.7978846, %v3861_v43 }
0x191a   : > { %7916 = vtanh.f32 %v3862_v44 }
0x1924   : > { %v7917_v45 = vpop.eup %7916 }
0x1925   : > { %v3864_v46 = vadd.f32 1.0, %v7917_v45  ;;  %v4230_v45 = vld [vmem:[%s9906_s5] sm:$0xff] }
0x1927   : > { %v3865_v47 = vmul.f32 0.5, %v3864_v46  ;;  %v4231_v46 = vld [vmem:[%s9906_s5 + $0x8] sm:$0xff] }
0x1929   : > { %v3866_v48 = vmul.f32 %v3865_v47, %v3855_v36  ;;  %v7485_v47 = vpack.c.bf16 %v4231_v46, %v4230_v45 }
0x192b   : > { %7206 = vmatmul.mubr.f32.vlgmr.msra.gmra.mrb[6].mxu0 %v3866_v48 }
0x19fe   : > { %v3956_v29 = vpop.f32.mrb[6].mxu0 }
0x19ff   : > { %v3957_v50 = vadd.f32 %v6726_v49, %v3956_v29  ;;  %v7207_v40 = vpop.f32.mrb[7].mxu0 }
0x1a01   : > { %v3960_v52 = vadd.f32 %v3957_v50, %v9459_v51  ;;  %v7483_v51 = vpack.c.bf16 %v3993_v62, %v3992_v61  ;;  %v6737_v62 = vld [vmem:[#allocation4] ss:$0 sm:$0xff] }
0x1a03   : > { %v3963_v53 = vsel %vm2315_vm5, %v3960_v52, 0.0  ;;  %7484 = vmatpush3.bf16.msra.mxu1 %v7483_v51 }
0x1a04   : > { %3964 = vadd.xlane.f32.xlu1 %v3963_v53 }
0x1a15   : > { %4081 = vperm.xlu1 %7848, %v4076_v11  }
0x1a19   : > { %4086 = vperm.xlu1 %7848, %v4077_v12  }
0x1a91   : > { %v3965_v54 = vpop.xlane.xlu1 %3964 }
0x1a92   : > { %v3966_v55 = vmul.f32 0.03125, %v3965_v54  ;;  %v6735_v54 = vld [vmem:[%s9907_s8] ss:$0 sm:$0xff]  ;;  %s9911_s8 = sld [smem:[#allocation79_spill]] }
0x1a94   : > { %v3967_v56 = vsub.f32 %v3960_v52, %v3966_v55 }
0x1a95   : > { %v4082_v18 = vpop.permute.xlu1 %4081 }
0x1a96   : > { %v3968_v57 = vmul.f32 %v3967_v56, %v3967_v56  ;;  %v4095_v21 = vmul.f32 %v6731_v19, %v4082_v18 }
0x1a98   : > { %v3969_v58 = vsel %vm2315_vm5, %v3968_v57, 0.0 }
0x1a99   : > { %3970 = vadd.xlane.f32.xlu0 %v3969_v58  ;;  %v4087_v1 = vpop.permute.xlu1 %4086 }
0x1a9a   : > { %v4096_v20 = vmul.f32 %v6731_v19, %v4087_v1 }
0x1b26   : > { %v3971_v63 = vpop.xlane.xlu0 %3970 }
0x1b27   : > { %v3972_v2 = vmul.f32 0.03125, %v3971_v63 }
0x1b29   : > { %v3973_v3 = vadd.f32 1e-06, %v3972_v2 }
0x1b2b   : > { %7918 = vrsqrt.f32 %v3973_v3 }
0x1b35   : > { %v7919_v4 = vpop.eup %7918 }
0x1b36   : > { %v3975_v6 = vmul.f32 %v7919_v4, %v3967_v56  ;;  %v6736_v56 = vld [vmem:[#allocation2] ss:$0 sm:$0xff] }
0x1b38   : > { %v3982_v8 = vmul.f32 %v6727_v5, %v3975_v6 }
0x1b3a   : > { %v3989_v9 = vadd.f32 %v6728_v7, %v3982_v8 }
0x1b3c   : > { %7217 = vmatmul.mubr.msk.f32.vlgmr.msra.gmra.mrb[30].mxu1 %vm2355_vm6, %v3989_v9 }
0x1b3d   : > { %7221 = vmatprep.mubr.msk.f32.mxu1 %vm2526_vm9, %v4074_v0 }
0x1c0f   : > { %v4070_v14 = vpop.f32.mrb[30].mxu1 }
0x1c10   : > { %v4071_v15 = vadd.f32 %v6729_v13, %v4070_v14  ;;  %v7218_v16 = vpop.f32.mrb[31].mxu1 }
0x1c12   : > { %7219 = vmatprep.subr.msk.mxu1 %vm2238_vm1, %v4071_v15 }
0x1c13   : > { %7220 = vmatpush3.msk.msra.mxu1 %vm2238_vm1, %v4071_v15 }
0x1c14   : > { %7222 = vmatmul.mubr.msk.f32.vlgmr.msra.gmra.mrb[32].mxu1 %vm2526_vm9, %v4075_v17  ;;  %7486 = vmatprep.subr.bf16.mxu1 %v7485_v47 }
0x1c15   : > { %7488 = vmatpush3.bf16.msra.mxu1 %v7485_v47 }
0x1ce7   : > { %v7223_v22 = vpop.f32.mrb[32].mxu1 }
0x1ce8   : > { %v4178_v24 = vadd.f32 %v7223_v22, %v4096_v20  ;;  %v4172_v25 = vpop.f32.mrb[33].mxu1 }
0x1ce9   : > { %v4173_v27 = vadd.f32 %v4172_v25, %v4095_v21 }
0x1cea   : > { %v9531_v28 = vadd.f32 %v4182_v23, %v4178_v24 }
0x1ceb   : > { %v9533_v30 = vadd.f32 %v4181_v26, %v4173_v27 }
0x1cec   : > { %v4190_v31 = vsel %vm2436_vm7, %v9531_v28, 0.0 }
0x1ced   : > { %4191 = vadd.xlane.f32.xlu0 %v4190_v31  ;;  %v4187_v32 = vsel %vm2436_vm7, %v9533_v30, 0.0 }
0x1cee   : > { %4188 = vadd.xlane.f32.xlu1 %v4187_v32 }
0x1d7a   : > { %v4192_v33 = vpop.xlane.xlu0 %4191 }
0x1d7b   : > { %v4195_v34 = vmul.f32 0.0625, %v4192_v33  ;;  %v4189_v35 = vpop.xlane.xlu1 %4188 }
0x1d7c   : > { %v4194_v36 = vmul.f32 0.0625, %v4189_v35 }
0x1d7d   : > { %v4197_v37 = vsub.f32 %v9531_v28, %v4195_v34 }
0x1d7e   : > { %v4196_v38 = vsub.f32 %v9533_v30, %v4194_v36 }
0x1d7f   : > { %v4199_v43 = vmul.f32 %v4197_v37, %v4197_v37 }
0x1d80   : > { %v4198_v39 = vmul.f32 %v4196_v38, %v4196_v38 }
0x1d81   : > { %v4203_v44 = vsel %vm2436_vm7, %v4199_v43, 0.0 }
0x1d82   : > { %v4200_v41 = vsel %vm2436_vm7, %v4198_v39, 0.0 }
0x1d83   : > { %4201 = vadd.xlane.f32.xlu0 %v4200_v41 }
0x1d87   : > { %4204 = vadd.xlane.f32.xlu0 %v4203_v44 }
0x1e10   : > { %v4202_v48 = vpop.xlane.xlu0 %4201 }
0x1e11   : > { %v4206_v49 = vmul.f32 0.0625, %v4202_v48 }
0x1e13   : > { %v4208_v29 = vadd.f32 1e-06, %v4206_v49 }
0x1e14   : > { %v4205_v50 = vpop.xlane.xlu0 %4204 }
0x1e15   : > { %7920 = vrsqrt.f32 %v4208_v29  ;;  %v4207_v40 = vmul.f32 0.0625, %v4205_v50 }
0x1e17   : > { %v4209_v52 = vadd.f32 1e-06, %v4207_v40 }
0x1e19   : > { %7922 = vrsqrt.f32 %v4209_v52 }
0x1e1f   : > { %v7921_v53 = vpop.eup %7920 }
0x1e20   : > { %v4212_v55 = vmul.f32 %v7921_v53, %v4196_v38 }
0x1e22   : > { %v4220_v57 = vmul.f32 %v6735_v54, %v4212_v55 }
0x1e23   : > { %v7923_v58 = vpop.eup %7922 }
0x1e24   : > { %v4213_v59 = vmul.f32 %v7923_v58, %v4197_v37  ;;  %v4228_v60 = vadd.f32 %v6736_v56, %v4220_v57 }
0x1e26   : > { %v4221_v42 = vmul.f32 %v6735_v54, %v4213_v59  ;;  %7228 = vmatprep.mubr.msk.f32.mxu1 %vm2436_vm7, %v4228_v60 }
0x1e28   : > { %v4229_v61 = vadd.f32 %v6736_v56, %v4221_v42 }
0x1e2a   : > { %7229 = vmatmul.mubr.msk.f32.vlgmr.msra.gmra.mrb[34].mxu1 %vm2436_vm7, %v4229_v61 }
0x1efd   : > { %v7230_v51 = vpop.f32.mrb[34].mxu1 }
0x1efe   : > { %v4317_v63 = vadd.f32 %v7230_v51, %v6737_v62  ;;  %v4311_v2 = vpop.f32.mrb[35].mxu1 }
0x1eff   : > { %v4312_v3 = vadd.f32 %v6737_v62, %v4311_v2 }
0x1f01   : > { %7235 = vmatprep.mubr.msk.f32.mxu1 %vm4328_vm10, %v4312_v3  ;;  %v9549_v4 = vpack.i.bf16 %v4317_v63, %v4312_v3 }
0x1f03   : > { %7855 = vrot.lane.b32.xlu1 %v9549_v4, %s9780_s6  ;;  %7850 = vrot.lane.b32.xlu0 %v9549_v4, %s9887_s1  ;;  %s9914_s6 = sld [smem:[#allocation84_spill]] }
0x1f07   : > { %4523 = vrot.lane.b32.xlu0 %v4312_v3, %s9778_s11 }
0x1f0b   : > { %4525 = vrot.lane.b32.xlu0 %v4317_v63, %s9778_s11  ;;  %s9913_s11 = sld [smem:[#allocation83_spill]] }
0x1f75   : > { %v7856_v5 = vpop.permute.xlu1 %7855  ;;  %v7851_v6 = vpop.permute.xlu0 %7850 }
0x1f76   : > { %v7858_v7 = vunpack.i.h.bf16 %v7856_v5  ;;  %v7857_v8 = vunpack.i.l.bf16 %v7856_v5  ;;  %v7853_v9 = vunpack.i.h.bf16 %v7851_v6  ;;  %v7852_v0 = vunpack.i.l.bf16 %v7851_v6  ;;  %v4321_v6 = vld [vmem:[%s9911_s8 + $0x8] sm:$0xff] }
0x1f78   : > { %v7499_v11 = vpack.c.bf16 %v7858_v7, %v7857_v8  ;;  %v7489_v12 = vpack.c.bf16 %v7853_v9, %v7852_v0  ;;  %v4320_v7 = vld [vmem:[%s9911_s8] sm:$0xff] }
0x1f79   : > { %v4524_v13 = vpop.permute.xlu0 %4523 }
0x1f7a   : > { %7491 = vmatprep.subr.msk.bf16.mxu1 %vm9559_vm11, %v7489_v12  ;;  %7501 = vmatprep.subr.msk.bf16.mxu0 %vm9559_vm11, %v7499_v11 }
0x1f7b   : > { %7249 = vmatprep.mubr.msk.f32.mxu0 %vm4328_vm10, %v4524_v13  ;;  %7494 = vmatpush3.bf16.xpose.msk.msra.mxu1 %vm9559_vm11, %v7489_v12  ;;  %v6756_v13 = vld [vmem:[#allocation6] ss:$0 sm:$0xff] }
0x1f7c   : > { %7504 = vmatpush3.bf16.xpose.msk.msra.mxu0 %vm9559_vm11, %v7499_v11 }
0x1f7d   : > { %v4526_v14 = vpop.permute.xlu0 %4525 }
0x1f82   : > { %7236 = vmatmul.mubr.msk.f32.vlgmr.msra.gmra.mrb[36].mxu1 %vm4328_vm10, %v4317_v63 }
0x1f83   : > { %7250 = vmatmul.mubr.msk.f32.vlgmr.msra.gmra.mrb[8].mxu0 %vm4328_vm10, %v4526_v14 }
0x2055   : > { %v7237_v15 = vpop.f32.mrb[36].mxu1 }
0x2056   : > { %v4413_v16 = vmul.f32 0.35355338, %v7237_v15  ;;  %v7251_v17 = vpop.f32.mrb[8].mxu0  ;;  %v4403_v18 = vpop.f32.mrb[37].mxu1 }
0x2057   : > { %v4412_v19 = vmul.f32 0.35355338, %v4403_v18  ;;  %v4605_v1 = vpop.f32.mrb[9].mxu0  ;;  %v4615_v23 = vmul.f32 0.35355338, %v7251_v17 }
0x2058   : > { %v4417_v20 = vsel %vm2436_vm7, %v4413_v16, -inf  ;;  %v4614_v21 = vmul.f32 0.35355338, %v4605_v1 }
0x2059   : > { %4418 = vmax.xlane.f32.xlu1 %v4417_v20  ;;  %v4414_v22 = vsel %vm2436_vm7, %v4412_v19, -inf  ;;  %v4619_v25 = vsel %vm2436_vm7, %v4615_v23, -inf }
0x205a   : > { %4415 = vmax.xlane.f32.xlu0 %v4414_v22  ;;  %v4616_v24 = vsel %vm2436_vm7, %v4614_v21, -inf }
0x205e   : > { %4617 = vmax.xlane.f32.xlu0 %v4616_v24 }
0x2062   : > { %4620 = vmax.xlane.f32.xlu0 %v4619_v25 }
0x20e6   : > { %v4419_v26 = vpop.xlane.xlu1 %4418 }
0x20e7   : > { %v4421_v27 = vsub.f32 %v4413_v16, %v4419_v26  ;;  %v4416_v31 = vpop.xlane.xlu0 %4415 }
0x20e8   : > { %v4420_v32 = vsub.f32 %v4412_v19, %v4416_v31 }
0x20e9   : > { %v4424_v33 = vmul.f32 1.442695, %v4421_v27 }
0x20ea   : > { %v4422_v34 = vmul.f32 1.442695, %v4420_v32 }
0x20eb   : > { %7924 = vpow2.f32 %v4424_v33  ;;  %v4618_v35 = vpop.xlane.xlu0 %4617 }
0x20ec   : > { %7926 = vpow2.f32 %v4422_v34  ;;  %v4622_v36 = vsub.f32 %v4614_v21, %v4618_v35 }
0x20ee   : > { %v4624_v37 = vmul.f32 1.442695, %v4622_v36 }
0x20ef   : > { %v4621_v38 = vpop.xlane.xlu0 %4620 }
0x20f0   : > { %7928 = vpow2.f32 %v4624_v37  ;;  %v4623_v39 = vsub.f32 %v4615_v23, %v4621_v38 }
0x20f2   : > { %v4626_v41 = vmul.f32 1.442695, %v4623_v39 }
0x20f4   : > { %7930 = vpow2.f32 %v4626_v41 }
0x20f5   : > { %v7925_v43 = vpop.eup %7924 }
0x20f6   : > { %v7927_v44 = vpop.eup %7926  ;;  %v4429_v45 = vsel %vm2436_vm7, %v7925_v43, 0.0 }
0x20f7   : > { %4430 = vadd.xlane.f32.xlu1 %v4429_v45  ;;  %v4426_v46 = vsel %vm2436_vm7, %v7927_v44, 0.0 }
0x20f8   : > { %4427 = vadd.xlane.f32.xlu0 %v4426_v46 }
0x20fa   : > { %v7929_v47 = vpop.eup %7928 }
0x20fb   : > { %v4628_v48 = vsel %vm2436_vm7, %v7929_v47, 0.0 }
0x20fc   : > { %4629 = vadd.xlane.f32.xlu0 %v4628_v48 }
0x20fe   : > { %v7931_v49 = vpop.eup %7930 }
0x20ff   : > { %v4631_v29 = vsel %vm2436_vm7, %v7931_v49, 0.0 }
0x2100   : > { %4632 = vadd.xlane.f32.xlu1 %v4631_v29 }
0x2111   : > { %7865 = vrot.lane.b32.xlu1 %v9549_v4, %s9777_s4  ;;  %s9912_s4 = sld [smem:[#allocation81_spill]] }
0x2112   : > { %7860 = vrot.lane.b32.xlu0 %v9549_v4, %s9910_s0 }
0x2117   : > { %v4942_v31 = vld [vmem:[%s9912_s4] sm:$0xff]  ;;  %v4943_v32 = vld [vmem:[%s9912_s4 + $0x8] sm:$0xff]  ;;  %s9916_s4 = smov 120  }
0x2118   : > { %v7509_v33 = vpack.c.bf16 %v4943_v32, %v4942_v31 }
0x211a   : > { %7510 = vmatprep.subr.bf16.mxu0 %v7509_v33 }
0x211b   : > { %7512 = vmatpush3.bf16.msra.mxu0 %v7509_v33 }
0x2184   : > { %v4431_v50 = vpop.xlane.xlu1 %4430 }
0x2185   : > { %v4428_v40 = vpop.xlane.xlu0 %4427 }
0x2186   : > { %7932 = vrcp.f32 %v4428_v40  ;;  %v5050_v40 = vld [vmem:[%s9913_s11] sm:$0xff] }
0x2187   : > { %7934 = vrcp.f32 %v4431_v50 }
0x2189   : > { %v4630_v52 = vpop.xlane.xlu0 %4629 }
0x218a   : > { %7936 = vrcp.f32 %v4630_v52  ;;  %v5051_v52 = vld [vmem:[%s9913_s11 + $0x8] sm:$0xff] }
0x218d   : > { %v4633_v53 = vpop.xlane.xlu1 %4632  ;;  %v7861_v54 = vpop.permute.xlu0 %7860 }
0x218e   : > { %7938 = vrcp.f32 %v4633_v53  ;;  %v7863_v55 = vunpack.i.h.bf16 %v7861_v54  ;;  %v7862_v56 = vunpack.i.l.bf16 %v7861_v54  ;;  %v7513_v53 = vpack.c.bf16 %v5051_v52, %v5050_v40  ;;  %v5052_v54 = vld [vmem:[%s9913_s11 + $0x10] sm:$0xff]  ;;  %v6765_v52 = vld [vmem:[#allocation13] ss:$0 sm:$0xff] }
0x2190   : > { %v7933_v57 = vpop.eup %7932  ;;  %v7495_v58 = vpack.c.bf16 %v7863_v55, %v7862_v56  ;;  %7514 = vmatprep.subr.bf16.mxu0 %v7513_v53  ;;  %v5053_v55 = vld [vmem:[%s9913_s11 + $0x18] sm:$0xff] }
0x2191   : > { %v7935_v59 = vpop.eup %7934  ;;  %v7866_v60 = vpop.permute.xlu1 %7865  ;;  %v4434_v42 = vmul.f32 %v7933_v57, %v7927_v44  ;;  %v7517_v56 = vpack.c.bf16 %v5053_v55, %v5052_v54  ;;  %v5054_v57 = vld [vmem:[%s9913_s11 + $0x20] sm:$0xff] }
0x2192   : > { %v7868_v61 = vunpack.i.h.bf16 %v7866_v60  ;;  %v7867_v62 = vunpack.i.l.bf16 %v7866_v60  ;;  %7496 = vmatprep.subr.bf16.mxu1 %v7495_v58  ;;  %v4435_v63 = vmul.f32 %v7935_v59, %v7925_v43  ;;  %v6757_v43 = vld [vmem:[#allocation7] ss:$0 sm:$0xff]  ;;  %v5056_v60 = vld [vmem:[%s9913_s11 + $0x30] sm:$0xff] }
0x2193   : > { %7498 = vmatpush3.bf16.msra.mxu1 %v7495_v58  ;;  %7242 = vmatprep.mubr.msk.f32.mxu1 %vm2436_vm7, %v4434_v42  ;;  %v5055_v58 = vld [vmem:[%s9913_s11 + $0x28] sm:$0xff]  ;;  %v5057_v42 = vld [vmem:[%s9913_s11 + $0x38] sm:$0xff] }
0x2194   : > { %v7937_v51 = vpop.eup %7936  ;;  %v7505_v2 = vpack.c.bf16 %v7868_v61, %v7867_v62  ;;  %v7521_v59 = vpack.c.bf16 %v5055_v58, %v5054_v57  ;;  %v7525_v61 = vpack.c.bf16 %v5057_v42, %v5056_v60  ;;  %v6759_v62 = vld [vmem:[#allocation10] ss:$0 sm:$0xff]  ;;  %v6767_v42 = vld [vmem:[#allocation16] ss:$0 sm:$0xff] }
0x2195   : > { %v4636_v3 = vmul.f32 %v7937_v51, %v7929_v47  ;;  %v6758_v47 = vld [vmem:[#allocation9] ss:$0 sm:$0xff] }
0x2196   : > { %7243 = vmatmul.mubr.msk.f32.vlgmr.msra.gmra.mrb[38].mxu1 %vm2436_vm7, %v4435_v63  ;;  %7506 = vmatprep.subr.bf16.mxu1 %v7505_v2 }
0x2197   : > { %7508 = vmatpush3.bf16.msra.mxu1 %v7505_v2  ;;  %7256 = vmatprep.mubr.msk.f32.mxu1 %vm2436_vm7, %v4636_v3 }
0x2198   : > { %v7939_v4 = vpop.eup %7938  ;;  %7259 = vmatprep.subr.mxu1 %v4321_v6 }
0x2199   : > { %v4637_v5 = vmul.f32 %v7939_v4, %v7931_v49 }
0x219b   : > { %7257 = vmatmul.mubr.msk.f32.vlgmr.msra.gmra.mrb[40].mxu1 %vm2436_vm7, %v4637_v5 }
0x219c   : > { %7260 = vmatpush3.msra.mxu1 %v4321_v6 }
0x219d   : > { %7264 = vmatprep.subr.mxu1 %v4320_v7 }
0x2269   : > { %v7244_v8 = vpop.f32.mrb[38].mxu1 }
0x226a   : > { %v4514_v9 = vpop.f32.mrb[39].mxu1 }
0x226e   : > { %v7258_v0 = vpop.f32.mrb[40].mxu1 }
0x226f   : > { %v4716_v11 = vpop.f32.mrb[41].mxu1 }
0x2270   : > { %7261 = vmatprep.mubr.msk.f32.mxu1 %vm4328_vm10, %v4716_v11 }
0x2271   : > { %7262 = vmatmul.mubr.msk.f32.vlgmr.msra.gmra.mrb[42].mxu1 %vm4328_vm10, %v7258_v0 }
0x2272   : > { %7266 = vmatprep.mubr.msk.f32.mxu1 %vm4328_vm10, %v4514_v9  ;;  %7265 = vmatpush3.msra.mxu1 %v4320_v7 }
0x2279   : > { %7267 = vmatmul.mubr.msk.f32.vlgmr.msra.gmra.mrb[42].mxu1 %vm4328_vm10, %v7244_v8 }
0x234c   : > { %v7268_v12 = vpop.f32.mrb[42].mxu1 }
0x234d   : > { %v4888_v14 = vadd.f32 %v7268_v12, %v9531_v28  ;;  %v4878_v15 = vpop.f32.mrb[43].mxu1 }
0x234e   : > { %v4887_v16 = vadd.f32 %v4878_v15, %v9533_v30 }
0x234f   : > { %v9598_v17 = vadd.f32 %v6756_v13, %v4888_v14 }
0x2350   : > { %v9600_v18 = vadd.f32 %v6756_v13, %v4887_v16 }
0x2351   : > { %v4903_v19 = vsel %vm2436_vm7, %v9598_v17, 0.0 }
0x2352   : > { %4904 = vadd.xlane.f32.xlu0 %v4903_v19  ;;  %v4900_v1 = vsel %vm2436_vm7, %v9600_v18, 0.0 }
0x2353   : > { %4901 = vadd.xlane.f32.xlu1 %v4900_v1 }
0x23df   : > { %v4905_v20 = vpop.xlane.xlu0 %4904 }
0x23e0   : > { %v4907_v21 = vmul.f32 0.0625, %v4905_v20  ;;  %v4902_v28 = vpop.xlane.xlu1 %4901 }
0x23e1   : > { %v4906_v22 = vmul.f32 0.0625, %v4902_v28 }
0x23e2   : > { %v4909_v30 = vsub.f32 %v9598_v17, %v4907_v21 }
0x23e3   : > { %v4908_v23 = vsub.f32 %v9600_v18, %v4906_v22  ;;  %v6762_v22 = vld [vmem:[#allocation12] ss:$0 sm:$0xff] }
0x23e4   : > { %v4911_v24 = vmul.f32 %v4909_v30, %v4909_v30 }
0x23e5   : > { %v4910_v25 = vmul.f32 %v4908_v23, %v4908_v23 }
0x23e6   : > { %v4915_v26 = vsel %vm2436_vm7, %v4911_v24, 0.0 }
0x23e7   : > { %4916 = vadd.xlane.f32.xlu1 %v4915_v26  ;;  %v4912_v27 = vsel %vm2436_vm7, %v4910_v25, 0.0 }
0x23e8   : > { %4913 = vadd.xlane.f32.xlu0 %v4912_v27 }
0x2474   : > { %v4917_v34 = vpop.xlane.xlu1 %4916 }
0x2475   : > { %v4919_v35 = vmul.f32 0.0625, %v4917_v34  ;;  %v4914_v36 = vpop.xlane.xlu0 %4913 }
0x2476   : > { %v4918_v37 = vmul.f32 0.0625, %v4914_v36 }
0x2477   : > { %v4921_v38 = vadd.f32 1e-06, %v4919_v35 }
0x2478   : > { %v4920_v39 = vadd.f32 1e-06, %v4918_v37 }
0x2479   : > { %7940 = vrsqrt.f32 %v4921_v38 }
0x247a   : > { %7942 = vrsqrt.f32 %v4920_v39 }
0x2483   : > { %v7941_v41 = vpop.eup %7940 }
0x2484   : > { %v7943_v44 = vpop.eup %7942  ;;  %v4925_v45 = vmul.f32 %v7941_v41, %v4909_v30 }
0x2485   : > { %v4924_v46 = vmul.f32 %v7943_v44, %v4908_v23  ;;  %v5194_v44 = vld [vmem:[%s9914_s6 + $0x8] sm:$0xff] }
0x2486   : > { %v4933_v48 = vmul.f32 %v6757_v43, %v4925_v45 }
0x2487   : > { %v4932_v49 = vmul.f32 %v6757_v43, %v4924_v46  ;;  %v5193_v43 = vld [vmem:[%s9914_s6] sm:$0xff] }
0x2488   : > { %v4941_v50 = vadd.f32 %v6758_v47, %v4933_v48  ;;  %v7529_v45 = vpack.c.bf16 %v5194_v44, %v5193_v43 }
0x2489   : > { %v4940_v29 = vadd.f32 %v6758_v47, %v4932_v49 }
0x248a   : > { %7530 = vmatprep.subr.bf16.mxu1 %v7529_v45 }
0x248b   : > { %7273 = vmatprep.mubr.msk.f32.mxu0 %vm2436_vm7, %v4940_v29  ;;  %7532 = vmatpush3.bf16.msra.mxu1 %v7529_v45 }
0x248c   : > { %7274 = vmatmul.mubr.msk.f32.vlgmr.msra.gmra.mrb[10].mxu0 %vm2436_vm7, %v4941_v50 }
0x248d   : > { %7516 = vmatpush3.bf16.msra.mxu0 %v7513_v53 }
0x248e   : > { %7518 = vmatprep.subr.bf16.mxu0 %v7517_v56 }
0x2491   : > { %7520 = vmatpush3.bf16.msra.mxu0 %v7517_v56  ;;  %v6766_v56 = vld [vmem:[#allocation15] ss:$0 sm:$0xff] }
0x2492   : > { %7522 = vmatprep.subr.bf16.mxu0 %v7521_v59 }
0x2495   : > { %7524 = vmatpush3.bf16.msra.mxu0 %v7521_v59 }
0x2496   : > { %7526 = vmatprep.subr.bf16.mxu0 %v7525_v61 }
0x2499   : > { %7528 = vmatpush3.bf16.msra.mxu0 %v7525_v61 }
0x255f   : > { %v7275_v51 = vpop.f32.mrb[10].mxu0 }
0x2560   : > { %v5029_v63 = vadd.f32 %v7275_v51, %v6759_v62  ;;  %v5023_v2 = vpop.f32.mrb[11].mxu0 }
0x2561   : > { %v5024_v3 = vadd.f32 %v6759_v62, %v5023_v2 }
0x2562   : > { %v5033_v4 = vmul.f32 %v5029_v63, %v5029_v63 }
0x2563   : > { %v5032_v5 = vmul.f32 %v5024_v3, %v5024_v3 }
0x2564   : > { %v5035_v6 = vmul.f32 %v5033_v4, %v5029_v63 }
0x2565   : > { %v5034_v7 = vmul.f32 %v5032_v5, %v5024_v3 }
0x2566   : > { %v5037_v8 = vmul.f32 0.044715, %v5035_v6 }
0x2567   : > { %v5036_v9 = vmul.f32 0.044715, %v5034_v7 }
0x2568   : > { %v5039_v0 = vadd.f32 %v5037_v8, %v5029_v63 }
0x2569   : > { %v5038_v11 = vadd.f32 %v5036_v9, %v5024_v3 }
0x256a   : > { %v5041_v12 = vmul.f32 0.7978846, %v5039_v0 }
0x256b   : > { %v5040_v13 = vmul.f32 0.7978846, %v5038_v11 }
0x256c   : > { %7944 = vtanh.f32 %v5041_v12 }
0x256d   : > { %7946 = vtanh.f32 %v5040_v13 }
0x2576   : > { %v7945_v14 = vpop.eup %7944 }
0x2577   : > { %v7947_v15 = vpop.eup %7946  ;;  %v5045_v16 = vadd.f32 1.0, %v7945_v14 }
0x2578   : > { %v5044_v19 = vadd.f32 1.0, %v7947_v15 }
0x2579   : > { %v5047_v1 = vmul.f32 0.5, %v5045_v16 }
0x257a   : > { %v5046_v20 = vmul.f32 0.5, %v5044_v19 }
0x257b   : > { %v5049_v28 = vmul.f32 %v5047_v1, %v5029_v63 }
0x257c   : > { %v5048_v21 = vmul.f32 %v5046_v20, %v5024_v3 }
0x257e   : > { %7292 = vmatprep.mubr.msk.f32.mxu0 %vm5065_vm12, %v5048_v21 }
0x257f   : > { %7293 = vmatmul.mubr.msk.f32.vlgmr.msra.gmra.mrb[12].mxu0 %vm5065_vm12, %v5049_v28 }
0x2652   : > { %v7294_v30 = vpop.f32.mrb[12].mxu0 }
0x2653   : > { %v5144_v23 = vadd.f32 %v7294_v30, %v6762_v22  ;;  %v5138_v24 = vpop.f32.mrb[13].mxu0 }
0x2654   : > { %v5139_v25 = vadd.f32 %v6762_v22, %v5138_v24 }
0x2655   : > { %v9625_v26 = vadd.f32 %v5144_v23, %v9598_v17 }
0x2656   : > { %v9628_v27 = vadd.f32 %v5139_v25, %v9600_v18 }
0x2657   : > { %v5154_v31 = vsel %vm2436_vm7, %v9625_v26, 0.0 }
0x2658   : > { %5155 = vadd.xlane.f32.xlu1 %v5154_v31  ;;  %v5151_v32 = vsel %vm2436_vm7, %v9628_v27, 0.0 }
0x2659   : > { %5152 = vadd.xlane.f32.xlu0 %v5151_v32 }
0x26e5   : > { %v5156_v33 = vpop.xlane.xlu1 %5155 }
0x26e6   : > { %v5158_v34 = vmul.f32 0.0625, %v5156_v33  ;;  %v5153_v35 = vpop.xlane.xlu0 %5152 }
0x26e7   : > { %v5157_v36 = vmul.f32 0.0625, %v5153_v35 }
0x26e8   : > { %v5160_v17 = vsub.f32 %v9625_v26, %v5158_v34 }
0x26e9   : > { %v5159_v37 = vsub.f32 %v9628_v27, %v5157_v36 }
0x26ea   : > { %v5162_v18 = vmul.f32 %v5160_v17, %v5160_v17 }
0x26eb   : > { %v5161_v38 = vmul.f32 %v5159_v37, %v5159_v37 }
0x26ec   : > { %v5166_v39 = vsel %vm2436_vm7, %v5162_v18, 0.0 }
0x26ed   : > { %5167 = vadd.xlane.f32.xlu1 %v5166_v39  ;;  %v5163_v41 = vsel %vm2436_vm7, %v5161_v38, 0.0 }
0x26ee   : > { %5164 = vadd.xlane.f32.xlu0 %v5163_v41 }
0x277a   : > { %v5168_v46 = vpop.xlane.xlu1 %5167 }
0x277b   : > { %v5170_v47 = vmul.f32 0.0625, %v5168_v46  ;;  %v5165_v48 = vpop.xlane.xlu0 %5164 }
0x277c   : > { %v5169_v49 = vmul.f32 0.0625, %v5165_v48 }
0x277d   : > { %v5172_v29 = vadd.f32 1e-06, %v5170_v47 }
0x277e   : > { %v5171_v50 = vadd.f32 1e-06, %v5169_v49 }
0x277f   : > { %7948 = vrsqrt.f32 %v5172_v29 }
0x2780   : > { %7950 = vrsqrt.f32 %v5171_v50 }
0x2789   : > { %v7949_v40 = vpop.eup %7948 }
0x278a   : > { %v7951_v53 = vpop.eup %7950  ;;  %v5176_v54 = vmul.f32 %v7949_v40, %v5160_v17 }
0x278b   : > { %v5175_v55 = vmul.f32 %v7951_v53, %v5159_v37 }
0x278c   : > { %v5184_v57 = vmul.f32 %v6765_v52, %v5176_v54 }
0x278d   : > { %v5183_v58 = vmul.f32 %v6765_v52, %v5175_v55 }
0x278e   : > { %v5192_v60 = vadd.f32 %v6766_v56, %v5184_v57 }
0x278f   : > { %v5191_v59 = vadd.f32 %v6766_v56, %v5183_v58 }
0x2791   : > { %7299 = vmatprep.mubr.msk.f32.mxu1 %vm2436_vm7, %v5191_v59 }
0x2792   : > { %7300 = vmatmul.mubr.msk.f32.vlgmr.msra.gmra.mrb[44].mxu1 %vm2436_vm7, %v5192_v60 }
0x2865   : > { %v7301_v61 = vpop.f32.mrb[44].mxu1 }
0x2866   : > { %v5280_v62 = vadd.f32 %v7301_v61, %v6767_v42  ;;  %v5274_v51 = vpop.f32.mrb[45].mxu1 }
0x2867   : > { %v5275_v63 = vadd.f32 %v6767_v42, %v5274_v51 }
0x2869   : > { %7306 = vmatprep.mubr.msk.f32.mxu1 %vm4328_vm10, %v5275_v63  ;;  %v9643_v2 = vpack.i.bf16 %v5280_v62, %v5275_v63 }
0x286b   : > { %7875 = vrot.lane.b32.xlu1 %v9643_v2, %s9915_s2  ;;  %7870 = vrot.lane.b32.xlu0 %v9643_v2, %s9887_s1  ;;  %s9917_s1 = smov 88   ;;  %s9918_s2 = sld [smem:[#allocation85_spill]] }
0x286f   : > { %5485 = vrot.lane.b32.xlu1 %v5275_v63, %s9916_s4 }
0x2873   : > { %5487 = vrot.lane.b32.xlu1 %v5280_v62, %s9916_s4  ;;  %s9919_s4 = sld [smem:[#allocation88_spill]] }
0x28dd   : > { %v7876_v3 = vpop.permute.xlu1 %7875  ;;  %v7871_v4 = vpop.permute.xlu0 %7870 }
0x28de   : > { %v7878_v5 = vunpack.i.h.bf16 %v7876_v3  ;;  %v7877_v6 = vunpack.i.l.bf16 %v7876_v3  ;;  %v7873_v7 = vunpack.i.h.bf16 %v7871_v4  ;;  %v7872_v8 = vunpack.i.l.bf16 %v7871_v4  ;;  %v5284_v3 = vld [vmem:[%s9918_s2 + $0x8] sm:$0xff]  ;;  %v5283_v4 = vld [vmem:[%s9918_s2] sm:$0xff] }
0x28e0   : > { %v7543_v9 = vpack.c.bf16 %v7878_v5, %v7877_v6  ;;  %v7533_v0 = vpack.c.bf16 %v7873_v7, %v7872_v8 }
0x28e1   : > { %v5486_v11 = vpop.permute.xlu1 %5485 }
0x28e2   : > { %7535 = vmatprep.subr.msk.bf16.mxu1 %vm9559_vm11, %v7533_v0  ;;  %7545 = vmatprep.subr.msk.bf16.mxu0 %vm9559_vm11, %v7543_v9 }
0x28e3   : > { %7320 = vmatprep.mubr.msk.f32.mxu0 %vm4328_vm10, %v5486_v11  ;;  %7538 = vmatpush3.bf16.xpose.msk.msra.mxu1 %vm9559_vm11, %v7533_v0  ;;  %v6786_v0 = vld [vmem:[#allocation18] ss:$0 sm:$0xff] }
0x28e4   : > { %7548 = vmatpush3.bf16.xpose.msk.msra.mxu0 %vm9559_vm11, %v7543_v9 }
0x28e5   : > { %v5488_v12 = vpop.permute.xlu1 %5487 }
0x28ea   : > { %7307 = vmatmul.mubr.msk.f32.vlgmr.msra.gmra.mrb[46].mxu1 %vm4328_vm10, %v5280_v62 }
0x28eb   : > { %7321 = vmatmul.mubr.msk.f32.vlgmr.msra.gmra.mrb[14].mxu0 %vm4328_vm10, %v5488_v12 }
0x29bd   : > { %v7308_v13 = vpop.f32.mrb[46].mxu1 }
0x29be   : > { %v5375_v14 = vmul.f32 0.35355338, %v7308_v13  ;;  %v7322_v15 = vpop.f32.mrb[14].mxu0  ;;  %v5365_v16 = vpop.f32.mrb[47].mxu1 }
0x29bf   : > { %v5374_v19 = vmul.f32 0.35355338, %v5365_v16  ;;  %v5567_v1 = vpop.f32.mrb[15].mxu0  ;;  %v5577_v10 = vmul.f32 0.35355338, %v7322_v15 }
0x29c0   : > { %v5379_v20 = vsel %vm2436_vm7, %v5375_v14, -inf  ;;  %v5576_v21 = vmul.f32 0.35355338, %v5567_v1 }
0x29c1   : > { %5380 = vmax.xlane.f32.xlu1 %v5379_v20  ;;  %v5376_v28 = vsel %vm2436_vm7, %v5374_v19, -inf  ;;  %v5581_v30 = vsel %vm2436_vm7, %v5577_v10, -inf }
0x29c2   : > { %5377 = vmax.xlane.f32.xlu0 %v5376_v28  ;;  %v5578_v22 = vsel %vm2436_vm7, %v5576_v21, -inf }
0x29c6   : > { %5579 = vmax.xlane.f32.xlu0 %v5578_v22 }
0x29ca   : > { %5582 = vmax.xlane.f32.xlu0 %v5581_v30 }
0x2a4e   : > { %v5381_v23 = vpop.xlane.xlu1 %5380 }
0x2a4f   : > { %v5383_v24 = vsub.f32 %v5375_v14, %v5381_v23  ;;  %v5378_v25 = vpop.xlane.xlu0 %5377 }
0x2a50   : > { %v5382_v31 = vsub.f32 %v5374_v19, %v5378_v25  ;;  %v5905_v25 = vld [vmem:[%s9919_s4 + $0x8] sm:$0xff] }
0x2a51   : > { %v5386_v32 = vmul.f32 1.442695, %v5383_v24  ;;  %v5904_v24 = vld [vmem:[%s9919_s4] sm:$0xff] }
0x2a52   : > { %v5384_v33 = vmul.f32 1.442695, %v5382_v31  ;;  %v7553_v31 = vpack.c.bf16 %v5905_v25, %v5904_v24 }
0x2a53   : > { %7952 = vpow2.f32 %v5386_v32  ;;  %v5580_v34 = vpop.xlane.xlu0 %5579 }
0x2a54   : > { %7954 = vpow2.f32 %v5384_v33  ;;  %v5584_v35 = vsub.f32 %v5576_v21, %v5580_v34  ;;  %7554 = vmatprep.subr.bf16.mxu0 %v7553_v31 }
0x2a55   : > { %7556 = vmatpush3.bf16.msra.mxu0 %v7553_v31 }
0x2a56   : > { %v5586_v36 = vmul.f32 1.442695, %v5584_v35 }
0x2a57   : > { %v5583_v17 = vpop.xlane.xlu0 %5582 }
0x2a58   : > { %7956 = vpow2.f32 %v5586_v36  ;;  %v5585_v37 = vsub.f32 %v5577_v10, %v5583_v17 }
0x2a5a   : > { %v5588_v18 = vmul.f32 1.442695, %v5585_v37 }
0x2a5c   : > { %7958 = vpow2.f32 %v5588_v18  ;;  %v6787_v18 = vld [vmem:[#allocation19] ss:$0 sm:$0xff] }
0x2a5d   : > { %v7953_v38 = vpop.eup %7952 }
0x2a5e   : > { %v7955_v39 = vpop.eup %7954  ;;  %v5391_v41 = vsel %vm2436_vm7, %v7953_v38, 0.0 }
0x2a5f   : > { %5392 = vadd.xlane.f32.xlu1 %v5391_v41  ;;  %v5388_v43 = vsel %vm2436_vm7, %v7955_v39, 0.0 }
0x2a60   : > { %5389 = vadd.xlane.f32.xlu0 %v5388_v43  ;;  %v6788_v43 = vld [vmem:[#allocation21] ss:$0 sm:$0xff] }
0x2a62   : > { %v7957_v44 = vpop.eup %7956 }
0x2a63   : > { %v5590_v45 = vsel %vm2436_vm7, %v7957_v44, 0.0 }
0x2a64   : > { %5591 = vadd.xlane.f32.xlu0 %v5590_v45 }
0x2a66   : > { %v7959_v46 = vpop.eup %7958 }
0x2a67   : > { %v5593_v47 = vsel %vm2436_vm7, %v7959_v46, 0.0 }
0x2a68   : > { %5594 = vadd.xlane.f32.xlu1 %v5593_v47 }
0x2a79   : > { %7885 = vrot.lane.b32.xlu1 %v9643_v2, %s9917_s1  ;;  %s9921_s1 = sld [smem:[#allocation44_spill]] }
0x2a7a   : > { %7880 = vrot.lane.b32.xlu0 %v9643_v2, %s9910_s0  ;;  %s9920_s0 = sld [smem:[#allocation89_spill]] }
0x2aec   : > { %v5393_v48 = vpop.xlane.xlu1 %5392 }
0x2aed   : > { %v5390_v49 = vpop.xlane.xlu0 %5389 }
0x2aee   : > { %7960 = vrcp.f32 %v5390_v49  ;;  %v6013_v49 = vld [vmem:[%s9920_s0 + $0x8] sm:$0xff] }
0x2aef   : > { %7962 = vrcp.f32 %v5393_v48  ;;  %v6012_v48 = vld [vmem:[%s9920_s0] sm:$0xff] }
0x2af1   : > { %v5592_v29 = vpop.xlane.xlu0 %5591 }
0x2af2   : > { %7964 = vrcp.f32 %v5592_v29  ;;  %v7557_v29 = vpack.c.bf16 %v6013_v49, %v6012_v48 }
0x2af4   : > { %7558 = vmatprep.subr.bf16.mxu0 %v7557_v29 }
0x2af5   : > { %v5595_v50 = vpop.xlane.xlu1 %5594  ;;  %v7881_v40 = vpop.permute.xlu0 %7880 }
0x2af6   : > { %7966 = vrcp.f32 %v5595_v50  ;;  %v7883_v52 = vunpack.i.h.bf16 %v7881_v40  ;;  %v7882_v53 = vunpack.i.l.bf16 %v7881_v40  ;;  %v6014_v50 = vld [vmem:[%s9920_s0 + $0x10] sm:$0xff]  ;;  %v6015_v40 = vld [vmem:[%s9920_s0 + $0x18] sm:$0xff] }
0x2af8   : > { %v7961_v54 = vpop.eup %7960  ;;  %v7539_v55 = vpack.c.bf16 %v7883_v52, %v7882_v53  ;;  %v7561_v52 = vpack.c.bf16 %v6015_v40, %v6014_v50  ;;  %v6016_v53 = vld [vmem:[%s9920_s0 + $0x20] sm:$0xff] }
0x2af9   : > { %v7963_v56 = vpop.eup %7962  ;;  %v7886_v57 = vpop.permute.xlu1 %7885  ;;  %v5396_v58 = vmul.f32 %v7961_v54, %v7955_v39  ;;  %v6017_v54 = vld [vmem:[%s9920_s0 + $0x28] sm:$0xff] }
0x2afa   : > { %v7888_v59 = vunpack.i.h.bf16 %v7886_v57  ;;  %v7887_v60 = vunpack.i.l.bf16 %v7886_v57  ;;  %7540 = vmatprep.subr.bf16.mxu1 %v7539_v55  ;;  %v5397_v61 = vmul.f32 %v7963_v56, %v7953_v38  ;;  %v6018_v56 = vld [vmem:[%s9920_s0 + $0x30] sm:$0xff]  ;;  %v6019_v57 = vld [vmem:[%s9920_s0 + $0x38] sm:$0xff]  ;;  %s2205_s0 = scalar_lea.vmem %s9921_s1, %s9513_s3 }
0x2afb   : > { %7542 = vmatpush3.bf16.msra.mxu1 %v7539_v55  ;;  %7313 = vmatprep.mubr.msk.f32.mxu1 %vm2436_vm7, %v5396_v58  ;;  %v7565_v55 = vpack.c.bf16 %v6017_v54, %v6016_v53  ;;  %v7569_v58 = vpack.c.bf16 %v6019_v57, %v6018_v56 }
0x2afc   : > { %v7965_v42 = vpop.eup %7964  ;;  %v7549_v62 = vpack.c.bf16 %v7888_v59, %v7887_v60  ;;  %v6789_v59 = vld [vmem:[#allocation22] ss:$0 sm:$0xff] }
0x2afd   : > { %v5598_v51 = vmul.f32 %v7965_v42, %v7957_v44 }
0x2afe   : > { %7314 = vmatmul.mubr.msk.f32.vlgmr.msra.gmra.mrb[48].mxu1 %vm2436_vm7, %v5397_v61  ;;  %7550 = vmatprep.subr.bf16.mxu1 %v7549_v62 }
0x2aff   : > { %7552 = vmatpush3.bf16.msra.mxu1 %v7549_v62  ;;  %7327 = vmatprep.mubr.msk.f32.mxu1 %vm2436_vm7, %v5598_v51 }
0x2b00   : > { %v7967_v63 = vpop.eup %7966  ;;  %7330 = vmatprep.subr.mxu1 %v5284_v3 }
0x2b01   : > { %v5599_v2 = vmul.f32 %v7967_v63, %v7959_v46 }
0x2b03   : > { %7328 = vmatmul.mubr.msk.f32.vlgmr.msra.gmra.mrb[50].mxu1 %vm2436_vm7, %v5599_v2 }
0x2b04   : > { %7331 = vmatpush3.msra.mxu1 %v5284_v3 }
0x2b05   : > { %7335 = vmatprep.subr.mxu1 %v5283_v4 }
0x2bd1   : > { %v7315_v5 = vpop.f32.mrb[48].mxu1 }
0x2bd2   : > { %v5476_v6 = vpop.f32.mrb[49].mxu1 }
0x2bd6   : > { %v7329_v7 = vpop.f32.mrb[50].mxu1 }
0x2bd7   : > { %v5678_v8 = vpop.f32.mrb[51].mxu1 }
0x2bd8   : > { %7332 = vmatprep.mubr.msk.f32.mxu1 %vm4328_vm10, %v5678_v8 }
0x2bd9   : > { %7333 = vmatmul.mubr.msk.f32.vlgmr.msra.gmra.mrb[52].mxu1 %vm4328_vm10, %v7329_v7 }
0x2bda   : > { %7337 = vmatprep.mubr.msk.f32.mxu1 %vm4328_vm10, %v5476_v6  ;;  %7336 = vmatpush3.msra.mxu1 %v5283_v4 }
0x2be1   : > { %7338 = vmatmul.mubr.msk.f32.vlgmr.msra.gmra.mrb[52].mxu1 %vm4328_vm10, %v7315_v5 }
0x2cb4   : > { %v7339_v9 = vpop.f32.mrb[52].mxu1 }
0x2cb5   : > { %v5850_v11 = vadd.f32 %v7339_v9, %v9625_v26  ;;  %v5840_v12 = vpop.f32.mrb[53].mxu1 }
0x2cb6   : > { %v5849_v13 = vadd.f32 %v5840_v12, %v9628_v27 }
0x2cb7   : > { %v9686_v14 = vadd.f32 %v6786_v0, %v5850_v11 }
0x2cb8   : > { %v9688_v15 = vadd.f32 %v6786_v0, %v5849_v13 }
0x2cb9   : > { %v5865_v16 = vsel %vm2436_vm7, %v9686_v14, 0.0 }
0x2cba   : > { %5866 = vadd.xlane.f32.xlu0 %v5865_v16  ;;  %v5862_v19 = vsel %vm2436_vm7, %v9688_v15, 0.0 }
0x2cbb   : > { %5863 = vadd.xlane.f32.xlu1 %v5862_v19 }
0x2d47   : > { %v5867_v1 = vpop.xlane.xlu0 %5866 }
0x2d48   : > { %v5869_v20 = vmul.f32 0.0625, %v5867_v1  ;;  %v5864_v26 = vpop.xlane.xlu1 %5863 }
0x2d49   : > { %v5868_v21 = vmul.f32 0.0625, %v5864_v26  ;;  %v6792_v26 = vld [vmem:[#allocation24] ss:$0 sm:$0xff] }
0x2d4a   : > { %v5871_v27 = vsub.f32 %v9686_v14, %v5869_v20 }
0x2d4b   : > { %v5870_v28 = vsub.f32 %v9688_v15, %v5868_v21 }
0x2d4c   : > { %v5873_v10 = vmul.f32 %v5871_v27, %v5871_v27 }
0x2d4d   : > { %v5872_v22 = vmul.f32 %v5870_v28, %v5870_v28 }
0x2d4e   : > { %v5877_v30 = vsel %vm2436_vm7, %v5873_v10, 0.0 }
0x2d4f   : > { %5878 = vadd.xlane.f32.xlu1 %v5877_v30  ;;  %v5874_v23 = vsel %vm2436_vm7, %v5872_v22, 0.0 }
0x2d50   : > { %5875 = vadd.xlane.f32.xlu0 %v5874_v23 }
0x2ddc   : > { %v5879_v32 = vpop.xlane.xlu1 %5878 }
0x2ddd   : > { %v5881_v33 = vmul.f32 0.0625, %v5879_v32  ;;  %v5876_v34 = vpop.xlane.xlu0 %5875 }
0x2dde   : > { %v5880_v35 = vmul.f32 0.0625, %v5876_v34 }
0x2ddf   : > { %v5883_v36 = vadd.f32 1e-06, %v5881_v33 }
0x2de0   : > { %v5882_v17 = vadd.f32 1e-06, %v5880_v35 }
0x2de1   : > { %7968 = vrsqrt.f32 %v5883_v36 }
0x2de2   : > { %7970 = vrsqrt.f32 %v5882_v17 }
0x2deb   : > { %v7969_v37 = vpop.eup %7968 }
0x2dec   : > { %v7971_v38 = vpop.eup %7970  ;;  %v5887_v39 = vmul.f32 %v7969_v37, %v5871_v27  ;;  %v6244_v37 = vld [vmem:[%s2205_s0] sm:$0xff] }
0x2ded   : > { %v5886_v41 = vmul.f32 %v7971_v38, %v5870_v28 }
0x2dee   : > { %v5895_v44 = vmul.f32 %v6787_v18, %v5887_v39  ;;  %v6246_v39 = vsel %vm2234_vm4, %v6244_v37, 0.0 }
0x2def   : > { %v5894_v45 = vmul.f32 %v6787_v18, %v5886_v41  ;;  %v6154_v41 = vld [vmem:[%s8957_s9] sm:$0xff] }
0x2df0   : > { %v5903_v47 = vadd.f32 %v6788_v43, %v5895_v44 }
0x2df1   : > { %v5902_v46 = vadd.f32 %v6788_v43, %v5894_v45  ;;  %v6155_v43 = vld [vmem:[%s8957_s9 + $0x8] sm:$0xff] }
0x2df2   : > { %v7573_v44 = vpack.c.bf16 %v6155_v43, %v6154_v41 }
0x2df3   : > { %7344 = vmatprep.mubr.msk.f32.mxu0 %vm2436_vm7, %v5902_v46 }
0x2df4   : > { %7345 = vmatmul.mubr.msk.f32.vlgmr.msra.gmra.mrb[16].mxu0 %vm2436_vm7, %v5903_v47  ;;  %7574 = vmatprep.subr.bf16.mxu1 %v7573_v44 }
0x2df5   : > { %7560 = vmatpush3.bf16.msra.mxu0 %v7557_v29  ;;  %7576 = vmatpush3.bf16.msra.mxu1 %v7573_v44 }
0x2df6   : > { %7562 = vmatprep.subr.bf16.mxu0 %v7561_v52 }
0x2df9   : > { %7564 = vmatpush3.bf16.msra.mxu0 %v7561_v52 }
0x2dfa   : > { %7566 = vmatprep.subr.bf16.mxu0 %v7565_v55 }
0x2dfd   : > { %7568 = vmatpush3.bf16.msra.mxu0 %v7565_v55 }
0x2dfe   : > { %7570 = vmatprep.subr.bf16.mxu0 %v7569_v58 }
0x2e01   : > { %7572 = vmatpush3.bf16.msra.mxu0 %v7569_v58 }
0x2ec7   : > { %v7346_v60 = vpop.f32.mrb[16].mxu0 }
0x2ec8   : > { %v5991_v42 = vadd.f32 %v7346_v60, %v6789_v59  ;;  %v5985_v61 = vpop.f32.mrb[17].mxu0 }
0x2ec9   : > { %v5986_v62 = vadd.f32 %v6789_v59, %v5985_v61 }
0x2eca   : > { %v5995_v51 = vmul.f32 %v5991_v42, %v5991_v42 }
0x2ecb   : > { %v5994_v63 = vmul.f32 %v5986_v62, %v5986_v62 }
0x2ecc   : > { %v5997_v2 = vmul.f32 %v5995_v51, %v5991_v42 }
0x2ecd   : > { %v5996_v3 = vmul.f32 %v5994_v63, %v5986_v62  ;;  %v6796_v63 = vld [vmem:[#allocation27] ss:$0 sm:$0xff] }
0x2ece   : > { %v5999_v4 = vmul.f32 0.044715, %v5997_v2 }
0x2ecf   : > { %v5998_v5 = vmul.f32 0.044715, %v5996_v3 }
0x2ed0   : > { %v6001_v6 = vadd.f32 %v5999_v4, %v5991_v42 }
0x2ed1   : > { %v6000_v7 = vadd.f32 %v5998_v5, %v5986_v62 }
0x2ed2   : > { %v6003_v8 = vmul.f32 0.7978846, %v6001_v6 }
0x2ed3   : > { %v6002_v9 = vmul.f32 0.7978846, %v6000_v7 }
0x2ed4   : > { %7972 = vtanh.f32 %v6003_v8 }
0x2ed5   : > { %7974 = vtanh.f32 %v6002_v9 }
0x2ede   : > { %v7973_v0 = vpop.eup %7972 }
0x2edf   : > { %v7975_v11 = vpop.eup %7974  ;;  %v6007_v12 = vadd.f32 1.0, %v7973_v0 }
0x2ee0   : > { %v6006_v13 = vadd.f32 1.0, %v7975_v11 }
0x2ee1   : > { %v6009_v16 = vmul.f32 0.5, %v6007_v12 }
0x2ee2   : > { %v6008_v19 = vmul.f32 0.5, %v6006_v13  ;;  %v6797_v13 = vld [vmem:[#allocation28] ss:$0 sm:$0xff] }
0x2ee3   : > { %v6011_v20 = vmul.f32 %v6009_v16, %v5991_v42  ;;  %v6795_v42 = vld [vmem:[#allocation25] ss:$0 sm:$0xff] }
0x2ee4   : > { %v6010_v1 = vmul.f32 %v6008_v19, %v5986_v62 }
0x2ee6   : > { %7363 = vmatprep.mubr.msk.f32.mxu0 %vm5065_vm12, %v6010_v1 }
0x2ee7   : > { %7364 = vmatmul.mubr.msk.f32.vlgmr.msra.gmra.mrb[18].mxu0 %vm5065_vm12, %v6011_v20 }
0x2fba   : > { %v7365_v21 = vpop.f32.mrb[18].mxu0 }
0x2fbb   : > { %v6105_v27 = vadd.f32 %v7365_v21, %v6792_v26  ;;  %v6099_v28 = vpop.f32.mrb[19].mxu0 }
0x2fbc   : > { %v6100_v10 = vadd.f32 %v6792_v26, %v6099_v28 }
0x2fbd   : > { %v6109_v22 = vadd.f32 %v6105_v27, %v9686_v14  ;;  %v6245_v14 = vld [vmem:[%s2205_s0 + $0x8] sm:$0xff]  ;;  %s2210_s0 = scalar_lea.vmem %s8967_s14, %s9513_s3 }
0x2fbe   : > { %v6108_v30 = vadd.f32 %v6100_v10, %v9688_v15  ;;  %v6249_v38 = vsel %vm2234_vm4, %v6245_v14, 0.0 }
0x2fbf   : > { %v6115_v23 = vsel %vm2436_vm7, %v6109_v22, 0.0 }
0x2fc0   : > { %6116 = vadd.xlane.f32.xlu1 %v6115_v23  ;;  %v6112_v24 = vsel %vm2436_vm7, %v6108_v30, 0.0 }
0x2fc1   : > { %6113 = vadd.xlane.f32.xlu0 %v6112_v24 }
0x304d   : > { %v6117_v25 = vpop.xlane.xlu1 %6116 }
0x304e   : > { %v6119_v31 = vmul.f32 0.0625, %v6117_v25  ;;  %v6114_v32 = vpop.xlane.xlu0 %6113 }
0x304f   : > { %v6118_v33 = vmul.f32 0.0625, %v6114_v32 }
0x3050   : > { %v6121_v34 = vsub.f32 %v6109_v22, %v6119_v31 }
0x3051   : > { %v6120_v35 = vsub.f32 %v6108_v30, %v6118_v33 }
0x3052   : > { %v6123_v36 = vmul.f32 %v6121_v34, %v6121_v34 }
0x3053   : > { %v6122_v17 = vmul.f32 %v6120_v35, %v6120_v35 }
0x3054   : > { %v6127_v15 = vsel %vm2436_vm7, %v6123_v36, 0.0  ;;  %v7985_v36 = vld [vmem:[%s9520_s10] sm:$0xff] }
0x3055   : > { %6128 = vadd.xlane.f32.xlu1 %v6127_v15  ;;  %v6124_v18 = vsel %vm2436_vm7, %v6122_v17, 0.0 }
0x3056   : > { %6125 = vadd.xlane.f32.xlu0 %v6124_v18 }
0x3059   : > { %6250 = vadd.xlane.f32.xlu1 %v6249_v38 }
0x305a   : > { %6247 = vadd.xlane.f32.xlu0 %v6246_v39 }
0x30e2   : > { %v6129_v45 = vpop.xlane.xlu1 %6128 }
0x30e3   : > { %v6131_v46 = vmul.f32 0.0625, %v6129_v45  ;;  %v6126_v47 = vpop.xlane.xlu0 %6125 }
0x30e4   : > { %v6130_v48 = vmul.f32 0.0625, %v6126_v47 }
0x30e5   : > { %v6133_v49 = vadd.f32 1e-06, %v6131_v46 }
0x30e6   : > { %v6132_v29 = vadd.f32 1e-06, %v6130_v48  ;;  %v6251_v50 = vpop.xlane.xlu1 %6250 }
0x30e7   : > { %7976 = vrsqrt.f32 %v6133_v49  ;;  %v6254_v40 = vmul.f32 0.009259259, %v6251_v50  ;;  %v6248_v52 = vpop.xlane.xlu0 %6247 }
0x30e8   : > { %7978 = vrsqrt.f32 %v6132_v29  ;;  %v6253_v53 = vmul.f32 0.009259259, %v6248_v52 }
0x30e9   : > { %v6256_v54 = vsub.f32 %v6245_v14, %v6254_v40 }
0x30ea   : > { %v6255_v55 = vsub.f32 %v6244_v37, %v6253_v53 }
0x30eb   : > { %v6258_v56 = vmul.f32 %v6256_v54, %v6256_v54 }
0x30ec   : > { %v6257_v57 = vmul.f32 %v6255_v55, %v6255_v55 }
0x30ed   : > { %v6262_v58 = vsel %vm2234_vm4, %v6258_v56, 0.0 }
0x30ee   : > { %6263 = vadd.xlane.f32.xlu1 %v6262_v58  ;;  %v6259_v59 = vsel %vm2234_vm4, %v6257_v57, 0.0 }
0x30ef   : > { %6260 = vadd.xlane.f32.xlu0 %v6259_v59 }
0x30f1   : > { %v7977_v60 = vpop.eup %7976 }
0x30f2   : > { %v7979_v61 = vpop.eup %7978  ;;  %v6137_v62 = vmul.f32 %v7977_v60, %v6121_v34  ;;  %v7984_v34 = vld [vmem:[%s9520_s10 + $0x8] sm:$0xff] }
0x30f3   : > { %v6136_v51 = vmul.f32 %v7979_v61, %v6120_v35 }
0x30f4   : > { %v6145_v2 = vmul.f32 %v6795_v42, %v6137_v62 }
0x30f5   : > { %v6144_v3 = vmul.f32 %v6795_v42, %v6136_v51 }
0x30f6   : > { %v6153_v5 = vadd.f32 %v6796_v63, %v6145_v2 }
0x30f7   : > { %v6152_v4 = vadd.f32 %v6796_v63, %v6144_v3 }
0x30f9   : > { %7370 = vmatprep.mubr.msk.f32.mxu1 %vm2436_vm7, %v6152_v4 }
0x30fa   : > { %7371 = vmatmul.mubr.msk.f32.vlgmr.msra.gmra.mrb[54].mxu1 %vm2436_vm7, %v6153_v5 }
0x317b   : > { %v6264_v6 = vpop.xlane.xlu1 %6263 }
0x317c   : > { %v6261_v7 = vpop.xlane.xlu0 %6260  ;;  %v6267_v8 = vmul.f32 0.009345794, %v6264_v6 }
0x317d   : > { %v6266_v9 = vmul.f32 0.009345794, %v6261_v7 }
0x317e   : > { %v6269_v0 = vadd.f32 1e-06, %v6267_v8 }
0x317f   : > { %v6268_v11 = vadd.f32 1e-06, %v6266_v9 }
0x3180   : > { %7980 = vrsqrt.f32 %v6269_v0 }
0x3181   : > { %7982 = vrsqrt.f32 %v6268_v11 }
0x318a   : > { %v7981_v12 = vpop.eup %7980 }
0x318b   : > { %v7983_v16 = vpop.eup %7982  ;;  %v6273_v20 = vmul.f32 %v7981_v12, %v6256_v54 }
0x318c   : > { %v6272_v27 = vmul.f32 %v7983_v16, %v6255_v55 }
0x31cd   : > { %v7372_v19 = vpop.f32.mrb[54].mxu1 }
0x31ce   : > { %v6241_v1 = vadd.f32 %v7372_v19, %v6797_v13  ;;  %v6235_v26 = vpop.f32.mrb[55].mxu1 }
0x31cf   : > { %v6236_v21 = vadd.f32 %v6797_v13, %v6235_v26 }
0x31d0   : > { %v6275_v28 = vsub.f32 %v6241_v1, %v6273_v20 }
0x31d1   : > { %v6274_v10 = vsub.f32 %v6236_v21, %v6272_v27 }
0x31d2   : > { %v6277_v22 = vmul.f32 %v6275_v28, %v6275_v28 }
0x31d3   : > { %v6276_v30 = vmul.f32 %v6274_v10, %v6274_v10 }
0x31d4   : > { %v6281_v23 = vsel %vm2234_vm4, %v6277_v22, 0.0 }
0x31d5   : > { %6282 = vadd.xlane.f32.xlu1 %v6281_v23  ;;  %v6278_v24 = vsel %vm2234_vm4, %v6276_v30, 0.0 }
0x31d6   : > { %6279 = vadd.xlane.f32.xlu0 %v6278_v24 }
0x3262   : > { %v6283_v25 = vpop.xlane.xlu1 %6282 }
0x3263   : > { %v6285_v31 = vmul.f32 0.009259259, %v6283_v25  ;;  %v6280_v32 = vpop.xlane.xlu0 %6279 }
0x3264   : > { %v6284_v33 = vmul.f32 0.009259259, %v6280_v32 }
0x3265   : > { %v6287_v35 = vmul.f32 %v7984_v34, %v6285_v31 }
0x3266   : > { %v6286_v17 = vmul.f32 %v7985_v36, %v6284_v33 }
0x3267   : > { %6290 = vst.msk [vmem:[%s2210_s0 + $0x8] sm:$0xff] %vm6288_vm13, %v6287_v35 }
0x3268   : > { %6289 = vst.msk [vmem:[%s2210_s0] sm:$0xff] %vm6288_vm13, %v6286_v17 }
0x3269 PF: > { %s151_s7 = sadd.s32 1, %s8536_s7  }
0x326a   : > { %p148_p1 = scmp.ge.s32.totalorder %s151_s7, 4  }
0x326c   :  { %150 = sbr.rel (!%p148_p1) target bundleno = 143 (0x8f), region = 460 }
0x3273   :  { %6312 = vsyncpa [#allocation3], 1 }
0x3274   :  { %6314 = vsyncpa [#allocation3 + $0x1], 1 }
0x3275   :  { %6315 = vsyncpa [#allocation5], 1 }
0x3276   :  { %6316 = vsyncpa [#allocation8], 1 }
0x3277   :  { %6317 = vsyncpa [#allocation11], 1 }
0x3278   :  { %6318 = vsyncpa [#allocation14], 1 }
0x3279   :  { %6319 = vsyncpa [#allocation17], 1 }
0x327a   :  { %6320 = vsyncpa [#allocation20], 1 }
0x327b   :  { %6321 = vsyncpa [#allocation23], 1 }
0x327c   :  { %6322 = vsyncpa [#allocation26], 1 }
0x327d   :  { %6323 = vsyncpa [#allocation29], 1 }

</bundles_post_ra>
